<compile_context>
chip_gen: v5e
topology: v5e:2x2
jax: 0.10.0
libtpu: 0.0.40
codegen_flags: <defaults>
</compile_context>

<pallas_src>
import functools

import jax
import jax.numpy as jnp
from jax.experimental import pallas as pl
from jax.experimental.pallas import tpu as pltpu


# --------------------------------------------------------------------------- #
# Small helpers (tiling / physical-VMEM accounting)
# --------------------------------------------------------------------------- #
def _largest_divisor_leq(n, cap):
    cap = max(1, min(n, cap))
    for d in range(cap, 0, -1):
        if n % d == 0:
            return d
    return 1


def _round_up(a, b):
    return -(-a // b) * b


def _sublane_pack(itemsize):
    return {4: 8, 2: 16, 1: 32}.get(itemsize, 8)


def _phys_vmem_bytes(shape, itemsize):
    """Physical VMEM footprint of one buffer: minor dim padded to 128 lanes,
    second-minor padded to the dtype's sublane pack; leading dims multiply."""
    dims = list(shape)
    if len(dims) == 1:
        dims = [1] + dims
    dims[-1] = _round_up(dims[-1], 128)
    dims[-2] = _round_up(dims[-2], _sublane_pack(itemsize))
    total = itemsize
    for d in dims:
        total *= d
    return total


def _vmem_capacity_bytes():
    try:
        cap = int(pltpu.get_tpu_info().vmem_capacity_bytes)
        if cap > 0:
            return cap
    except Exception:
        pass
    return 64 << 20        # conservative default (v7x-sized VMEM)


def _tensorcores_per_chip():
    try:
        kind = jax.devices()[0].device_kind.lower()
    except Exception:
        return 1
    return 2 if "v7" in kind else 1


def _pick_ct(C, Nb, HW, itemsize, cap_bytes):
    """Largest channel tile (divisor of C) whose padded block fits the cap.
    Prefer full C or sublane-pack multiples so the block stays tile-aligned."""
    if _phys_vmem_bytes((Nb, C, HW), itemsize) <= cap_bytes:
        return C
    pack = _sublane_pack(itemsize)
    divs = [d for d in range(C - 1, 0, -1) if C % d == 0]
    for d in divs:
        if d % pack == 0 and _phys_vmem_bytes((Nb, d, HW), itemsize) <= cap_bytes:
            return d
    for d in divs:
        if _phys_vmem_bytes((Nb, d, HW), itemsize) <= cap_bytes:
            return d
    return 1


def _pick_csub(Ct, itemsize):
    """Static sub-chunk of the channel tile for the fused sum/max pass."""
    pack = _sublane_pack(itemsize)
    csub = _largest_divisor_leq(Ct, max(pack, 16))
    if Ct // csub > 64:        # keep the static unroll bounded
        csub = Ct
    return csub


# --------------------------------------------------------------------------- #
# Kernel
# --------------------------------------------------------------------------- #
def _spatial_attention_kernel(w_ref, x_ref, o_ref,
                              sum_ref, max_ref, apad_ref, mpad_ref,
                              *, K, C, H, W, CSUB):
    # w_ref    : SMEM (2*K*K,) f32 conv weights, layout [in_ch(avg,max), kh, kw]
    # x_ref    : VMEM (Nb, Ct, H*W) lane-dense input block (native dtype)
    # o_ref    : VMEM (Nb, H*W) lane-dense output block (unit dim squeezed)
    # sum_ref  : VMEM (Nb, H*W) f32 running channel sum
    # max_ref  : VMEM (Nb, H*W) f32 running channel max
    # apad/mpad: VMEM (Nb, PADL) f32 flat zero-padded avg / max maps (row stride Wp)
    c_idx = pl.program_id(1)
    c_num = pl.num_programs(1)

    Nb, Ct, HW = x_ref.shape
    pad = K // 2
    Wp = W + 2 * pad
    Lrow = H * Wp

    # ---- fused single pass over the channel block: running sum + max -------
    nsub = Ct // CSUB
    chunk0 = x_ref[:, 0:CSUB, :]                       # (Nb, CSUB, HW)
    sum_acc = chunk0.astype(jnp.float32)
    max_acc = chunk0                                   # native dtype: max is exact
    for j in range(1, nsub):                           # static, bounded unroll
        chunk = x_ref[:, j * CSUB:(j + 1) * CSUB, :]
        sum_acc = sum_acc + chunk.astype(jnp.float32)
        max_acc = jnp.maximum(max_acc, chunk)
    part_sum = jnp.sum(sum_acc, axis=1)                # (Nb, HW) f32
    part_max = jnp.max(max_acc, axis=1).astype(jnp.float32)

    @pl.when(c_idx == 0)
    def _init():                                       # assign-on-first: no -inf init
        sum_ref[...] = part_sum
        max_ref[...] = part_max

    @pl.when(c_idx != 0)
    def _accumulate():
        sum_ref[...] = sum_ref[...] + part_sum
        max_ref[...] = jnp.maximum(max_ref[...], part_max)

    @pl.when(c_idx == c_num - 1)
    def _finalize():
        avg = sum_ref[...] * (1.0 / C)                 # channel mean, (Nb, HW)
        mx = max_ref[...]

        # Flat zero-padded maps with row stride Wp (zero borders == SAME padding).
        apad_ref[...] = jnp.zeros_like(apad_ref)
        mpad_ref[...] = jnp.zeros_like(mpad_ref)
        for h in range(H):                             # cold path: H tiny row copies
            dst = (pad + h) * Wp + pad
            apad_ref[:, dst:dst + W] = avg[:, h * W:(h + 1) * W]
            mpad_ref[:, dst:dst + W] = mx[:, h * W:(h + 1) * W]

        # 7x7 two-channel conv in flat form: tap (kh, kw) is a single contiguous
        # lane slice at offset kh*Wp + kw.  Only two live accumulators.
        ya = jnp.zeros((Nb, Lrow), dtype=jnp.float32)
        ym = jnp.zeros((Nb, Lrow), dtype=jnp.float32)
        for kh in range(K):
            for kw in range(K):
                off = kh * Wp + kw
                ya = ya + w_ref[kh * K + kw] * apad_ref[:, off:off + Lrow]
                ym = ym + w_ref[K * K + kh * K + kw] * mpad_ref[:, off:off + Lrow]
        y = ya + ym                                    # valid at lanes h*Wp + w (w < W)
        s = y * jax.nn.sigmoid(y)                      # y * sigmoid(y)

        # Compact the Wp-strided rows into the lane-dense (Nb, H*W) output block.
        for h in range(H):
            o_ref[:, h * W:(h + 1) * W] = s[:, h * Wp:h * Wp + W].astype(o_ref.dtype)


# --------------------------------------------------------------------------- #
# Wrapper
# --------------------------------------------------------------------------- #
def spatial_attention(x, conv_weight, *, kernel_size=7):
    """x: (N, C, H, W) f32/bf16.  conv_weight: (1, 2, K, K).  Returns (N, 1, H, W) f32."""
    N, C, H, W = x.shape
    K = kernel_size
    pad = K // 2
    HW = H * W
    Wp = W + 2 * pad
    Hp = H + 2 * pad
    PADL = Hp * Wp + Wp            # flat padded map + one spare zero row so the
                                   # last (kh, kw) tap slice stays in bounds
    itemsize = x.dtype.itemsize

    vmem_cap = _vmem_capacity_bytes()
    n_tc = _tensorcores_per_chip()

    # ---- batch tile ---------------------------------------------------------
    # Batch several images per grid step when H*W is small (amortize ~0.35us per
    # step); keep >=2 steps on the parallel batch axis only on multi-TensorCore
    # chips (v7x) so both cores get work -- on v5e/v6e it would only add steps.
    nb_cap = max(1, 4096 // max(HW, 1))
    if n_tc >= 2 and N >= 2:
        nb_cap = min(nb_cap, max(1, N // 2))
    Nb = _largest_divisor_leq(N, nb_cap)

    # ---- channel tile (padded physical-VMEM budget) -------------------------
    block_cap = min(vmem_cap // 8, 12 << 20)      # ~8 MiB on v7x, 12 MiB on v5e/v6e
    Ct = _pick_ct(C, Nb, HW, itemsize, block_cap)
    CSUB = _pick_csub(Ct, itemsize)

    grid = (N // Nb, C // Ct)

    # ---- explicit VMEM limit from (8,128)-padded footprints -----------------
    x_blocks = 2 * _phys_vmem_bytes((Nb, Ct, HW), itemsize)       # double-buffered in
    out_blocks = 2 * _phys_vmem_bytes((Nb, HW), 4)                # double-buffered out
    scratch_bytes = (2 * _phys_vmem_bytes((Nb, HW), 4)
                     + 2 * _phys_vmem_bytes((Nb, PADL), 4))
    temp_bytes = (2 * _phys_vmem_bytes((Nb, CSUB, HW), 4)         # fused-pass accs
                  + 2 * _phys_vmem_bytes((Nb, H * Wp), 4))        # conv accumulators
    vmem_limit = x_blocks + out_blocks + scratch_bytes + temp_bytes + (8 << 20)
    vmem_limit = max(32 << 20, vmem_limit)
    vmem_limit = int(min(vmem_limit, max(48 << 20, vmem_cap // 2)))

    x_flat = x.reshape(N, C, HW)                       # free: HBM is contiguous
    w_flat = conv_weight.astype(jnp.float32).reshape(-1)  # (2*K*K,) scalars -> SMEM

    kernel = functools.partial(_spatial_attention_kernel,
                               K=K, C=C, H=H, W=W, CSUB=CSUB)

    out = pl.pallas_call(
        kernel,
        out_shape=jax.ShapeDtypeStruct((N, 1, HW), jnp.float32),
        grid=grid,
        in_specs=[
            pl.BlockSpec(memory_space=pltpu.MemorySpace.SMEM),        # conv weights
            pl.BlockSpec((Nb, Ct, HW), lambda n, c: (n, c, 0)),       # lane-dense x
        ],
        # Unit channel dim squeezed from the kernel view; block's last two dims
        # equal the full array dims, and the output store is lane-dense.
        out_specs=pl.BlockSpec((Nb, None, HW), lambda n, c: (n, 0, 0)),
        scratch_shapes=[
            pltpu.VMEM((Nb, HW), jnp.float32),       # running channel sum
            pltpu.VMEM((Nb, HW), jnp.float32),       # running channel max
            pltpu.VMEM((Nb, PADL), jnp.float32),     # flat zero-padded avg map
            pltpu.VMEM((Nb, PADL), jnp.float32),     # flat zero-padded max map
        ],
        compiler_params=pltpu.CompilerParams(
            dimension_semantics=("parallel", "arbitrary"),
            vmem_limit_bytes=vmem_limit,
        ),
    )(w_flat, x_flat)

    return out.reshape(N, 1, H, W)                    # free metadata reshape


# --------------------------------------------------------------------------- #
# Reference + self-check
# --------------------------------------------------------------------------- #
def _reference(x, conv_weight):
    avg = jnp.mean(x, axis=1, keepdims=True)
    mx = jnp.max(x, axis=1, keepdims=True)
    cat = jnp.concatenate([avg, mx], axis=1)
    y = jax.lax.conv_general_dilated(
        cat, conv_weight, window_strides=(1, 1), padding="SAME",
        dimension_numbers=("NCHW", "OIHW", "NCHW"))
    return y * jax.nn.sigmoid(y)


if __name__ == "__main__":
    key = jax.random.PRNGKey(0)
    kx, kw = jax.random.split(key)

    N, C, H, W = 2, 4, 16, 16
    K = 7

    x = jax.random.normal(kx, (N, C, H, W), dtype=jnp.float32)
    # Deterministic synthetic weight (shape matches nn.Conv2d(2, 1, 7, bias=False)).
    conv_weight = (jax.random.normal(kw, (1, 2, K, K), dtype=jnp.float32)
                   * (1.0 / (2 * K * K) ** 0.5))

    out = jax.block_until_ready(spatial_attention(x, conv_weight, kernel_size=K))
    ref = jax.block_until_ready(_reference(x, conv_weight))

    assert out.shape == (N, 1, H, W)
    assert jnp.allclose(out, ref, atol=1e-4, rtol=1e-4), "mismatch vs reference"

    print("KERNEL_OK")
</pallas_src>

<mosaic_0001>
module attributes {stable_mosaic.version = 11 : i64} {
  func.func @_spatial_attention_kernel(%arg0: i32, %arg1: i32, %arg2: memref<98xf32, #tpu.memory_space<smem>>, %arg3: memref<2x4x256xf32, #tpu.memory_space<vmem>>, %arg4: memref<2x1x256xf32, #tpu.memory_space<vmem>>, %arg5: memref<2x256xf32, #tpu.memory_space<vmem>>, %arg6: memref<2x256xf32, #tpu.memory_space<vmem>>, %arg7: memref<2x506xf32, #tpu.memory_space<vmem>>, %arg8: memref<2x506xf32, #tpu.memory_space<vmem>>) attributes {dimension_semantics = [#tpu.dimension_semantics<parallel>, #tpu.dimension_semantics<arbitrary>], iteration_bounds = array<i64: 1, 1>, scalar_prefetch = 0 : i64, scratch_operands = 4 : i64, tpu.core_type = #tpu.core_type<tc>, window_params = [{transform_indices = @transform_0, window_bounds = array<i64: 98>}, {transform_indices = @transform_1, window_bounds = array<i64: 2, 4, 256>}, {transform_indices = @transform_2, window_bounds = array<i64: 2, 1, 256>}]} {
    %c0 = arith.constant 0 : index
    %c0_0 = arith.constant 0 : index
    %c0_1 = arith.constant 0 : index
    %0 = vector.load %arg3[%c0, %c0_0, %c0_1] : memref<2x4x256xf32, #tpu.memory_space<vmem>>, vector<2x4x256xf32>
    %cst = arith.constant dense<0.000000e+00> : vector<2x256xf32>
    %1 = vector.multi_reduction <add>, %0, %cst [1] : vector<2x4x256xf32> to vector<2x256xf32>
    %cst_2 = arith.constant dense<0xFF800000> : vector<2x256xf32>
    %2 = vector.multi_reduction <maximumf>, %0, %cst_2 [1] : vector<2x4x256xf32> to vector<2x256xf32>
    %c0_i32 = arith.constant 0 : i32
    %3 = arith.cmpi eq, %arg1, %c0_i32 : i32
    %4 = arith.extui %3 : i1 to i32
    %c0_i32_3 = arith.constant 0 : i32
    %5 = arith.cmpi ne, %4, %c0_i32_3 : i32
    scf.if %5 {
      %c0_8 = arith.constant 0 : index
      %c0_9 = arith.constant 0 : index
      %12 = vector.load %arg5[%c0_8, %c0_9] : memref<2x256xf32, #tpu.memory_space<vmem>>, vector<2x256xf32>
      tpu.vector_store %arg5[%c0_8, %c0_9], %1 {strides = array<i32>} : memref<2x256xf32, #tpu.memory_space<vmem>>, vector<2x256xf32>,
      %c0_10 = arith.constant 0 : index
      %c0_11 = arith.constant 0 : index
      %13 = vector.load %arg6[%c0_10, %c0_11] : memref<2x256xf32, #tpu.memory_space<vmem>>, vector<2x256xf32>
      tpu.vector_store %arg6[%c0_10, %c0_11], %2 {strides = array<i32>} : memref<2x256xf32, #tpu.memory_space<vmem>>, vector<2x256xf32>,
    } else {
    }
    %c0_i32_4 = arith.constant 0 : i32
    %6 = arith.cmpi ne, %arg1, %c0_i32_4 : i32
    %7 = arith.extui %6 : i1 to i32
    %c0_i32_5 = arith.constant 0 : i32
    %8 = arith.cmpi ne, %7, %c0_i32_5 : i32
    scf.if %8 {
      %c0_8 = arith.constant 0 : index
      %c0_9 = arith.constant 0 : index
      %12 = vector.load %arg5[%c0_8, %c0_9] : memref<2x256xf32, #tpu.memory_space<vmem>>, vector<2x256xf32>
      %13 = arith.addf %12, %1 : vector<2x256xf32>
      %c0_10 = arith.constant 0 : index
      %c0_11 = arith.constant 0 : index
      %14 = vector.load %arg5[%c0_10, %c0_11] : memref<2x256xf32, #tpu.memory_space<vmem>>, vector<2x256xf32>
      tpu.vector_store %arg5[%c0_10, %c0_11], %13 {strides = array<i32>} : memref<2x256xf32, #tpu.memory_space<vmem>>, vector<2x256xf32>,
      %c0_12 = arith.constant 0 : index
      %c0_13 = arith.constant 0 : index
      %15 = vector.load %arg6[%c0_12, %c0_13] : memref<2x256xf32, #tpu.memory_space<vmem>>, vector<2x256xf32>
      %16 = arith.maximumf %15, %2 : vector<2x256xf32>
      %c0_14 = arith.constant 0 : index
      %c0_15 = arith.constant 0 : index
      %17 = vector.load %arg6[%c0_14, %c0_15] : memref<2x256xf32, #tpu.memory_space<vmem>>, vector<2x256xf32>
      tpu.vector_store %arg6[%c0_14, %c0_15], %16 {strides = array<i32>} : memref<2x256xf32, #tpu.memory_space<vmem>>, vector<2x256xf32>,
    } else {
    }
    %c0_i32_6 = arith.constant 0 : i32
    %9 = arith.cmpi eq, %arg1, %c0_i32_6 : i32
    %10 = arith.extui %9 : i1 to i32
    %c0_i32_7 = arith.constant 0 : i32
    %11 = arith.cmpi ne, %10, %c0_i32_7 : i32
    scf.if %11 {
      %c0_8 = arith.constant 0 : index
      %c0_9 = arith.constant 0 : index
      %12 = vector.load %arg5[%c0_8, %c0_9] : memref<2x256xf32, #tpu.memory_space<vmem>>, vector<2x256xf32>
      %cst_10 = arith.constant 2.500000e-01 : f32
      %13 = vector.broadcast %cst_10 : f32 to vector<2x256xf32>
      %14 = arith.mulf %12, %13 : vector<2x256xf32>
      %c0_11 = arith.constant 0 : index
      %c0_12 = arith.constant 0 : index
      %15 = vector.load %arg6[%c0_11, %c0_12] : memref<2x256xf32, #tpu.memory_space<vmem>>, vector<2x256xf32>
      %cst_13 = arith.constant 0.000000e+00 : f32
      %16 = vector.broadcast %cst_13 : f32 to vector<2x506xf32>
      %c0_14 = arith.constant 0 : index
      %c0_15 = arith.constant 0 : index
      %17 = vector.load %arg7[%c0_14, %c0_15] : memref<2x506xf32, #tpu.memory_space<vmem>>, vector<2x506xf32>
      tpu.vector_store %arg7[%c0_14, %c0_15], %16 {strides = array<i32>} : memref<2x506xf32, #tpu.memory_space<vmem>>, vector<2x506xf32>,
      %cst_16 = arith.constant 0.000000e+00 : f32
      %18 = vector.broadcast %cst_16 : f32 to vector<2x506xf32>
      %c0_17 = arith.constant 0 : index
      %c0_18 = arith.constant 0 : index
      %19 = vector.load %arg8[%c0_17, %c0_18] : memref<2x506xf32, #tpu.memory_space<vmem>>, vector<2x506xf32>
      tpu.vector_store %arg8[%c0_17, %c0_18], %18 {strides = array<i32>} : memref<2x506xf32, #tpu.memory_space<vmem>>, vector<2x506xf32>,
      %20 = vector.extract_strided_slice %14 {offsets = [0, 0], sizes = [2, 16], strides = [1, 1]} : vector<2x256xf32> to vector<2x16xf32>
      %c0_19 = arith.constant 0 : index
      %c69 = arith.constant 69 : index
      %21 = vector.load %arg7[%c0_19, %c69] : memref<2x506xf32, #tpu.memory_space<vmem>>, vector<2x16xf32>
      tpu.vector_store %arg7[%c0_19, %c69], %20 {strides = array<i32>} : memref<2x506xf32, #tpu.memory_space<vmem>>, vector<2x16xf32>,
      %22 = vector.extract_strided_slice %15 {offsets = [0, 0], sizes = [2, 16], strides = [1, 1]} : vector<2x256xf32> to vector<2x16xf32>
      %c0_20 = arith.constant 0 : index
      %c69_21 = arith.constant 69 : index
      %23 = vector.load %arg8[%c0_20, %c69_21] : memref<2x506xf32, #tpu.memory_space<vmem>>, vector<2x16xf32>
      tpu.vector_store %arg8[%c0_20, %c69_21], %22 {strides = array<i32>} : memref<2x506xf32, #tpu.memory_space<vmem>>, vector<2x16xf32>,
      %24 = vector.extract_strided_slice %14 {offsets = [0, 16], sizes = [2, 16], strides = [1, 1]} : vector<2x256xf32> to vector<2x16xf32>
      %c0_22 = arith.constant 0 : index
      %c91 = arith.constant 91 : index
      %25 = vector.load %arg7[%c0_22, %c91] : memref<2x506xf32, #tpu.memory_space<vmem>>, vector<2x16xf32>
      tpu.vector_store %arg7[%c0_22, %c91], %24 {strides = array<i32>} : memref<2x506xf32, #tpu.memory_space<vmem>>, vector<2x16xf32>,
      %26 = vector.extract_strided_slice %15 {offsets = [0, 16], sizes = [2, 16], strides = [1, 1]} : vector<2x256xf32> to vector<2x16xf32>
      %c0_23 = arith.constant 0 : index
      %c91_24 = arith.constant 91 : index
      %27 = vector.load %arg8[%c0_23, %c91_24] : memref<2x506xf32, #tpu.memory_space<vmem>>, vector<2x16xf32>
      tpu.vector_store %arg8[%c0_23, %c91_24], %26 {strides = array<i32>} : memref<2x506xf32, #tpu.memory_space<vmem>>, vector<2x16xf32>,
      %28 = vector.extract_strided_slice %14 {offsets = [0, 32], sizes = [2, 16], strides = [1, 1]} : vector<2x256xf32> to vector<2x16xf32>
      %c0_25 = arith.constant 0 : index
      %c113 = arith.constant 113 : index
      %29 = vector.load %arg7[%c0_25, %c113] : memref<2x506xf32, #tpu.memory_space<vmem>>, vector<2x16xf32>
      tpu.vector_store %arg7[%c0_25, %c113], %28 {strides = array<i32>} : memref<2x506xf32, #tpu.memory_space<vmem>>, vector<2x16xf32>,
      %30 = vector.extract_strided_slice %15 {offsets = [0, 32], sizes = [2, 16], strides = [1, 1]} : vector<2x256xf32> to vector<2x16xf32>
      %c0_26 = arith.constant 0 : index
      %c113_27 = arith.constant 113 : index
      %31 = vector.load %arg8[%c0_26, %c113_27] : memref<2x506xf32, #tpu.memory_space<vmem>>, vector<2x16xf32>
      tpu.vector_store %arg8[%c0_26, %c113_27], %30 {strides = array<i32>} : memref<2x506xf32, #tpu.memory_space<vmem>>, vector<2x16xf32>,
      %32 = vector.extract_strided_slice %14 {offsets = [0, 48], sizes = [2, 16], strides = [1, 1]} : vector<2x256xf32> to vector<2x16xf32>
      %c0_28 = arith.constant 0 : index
      %c135 = arith.constant 135 : index
      %33 = vector.load %arg7[%c0_28, %c135] : memref<2x506xf32, #tpu.memory_space<vmem>>, vector<2x16xf32>
      tpu.vector_store %arg7[%c0_28, %c135], %32 {strides = array<i32>} : memref<2x506xf32, #tpu.memory_space<vmem>>, vector<2x16xf32>,
      %34 = vector.extract_strided_slice %15 {offsets = [0, 48], sizes = [2, 16], strides = [1, 1]} : vector<2x256xf32> to vector<2x16xf32>
      %c0_29 = arith.constant 0 : index
      %c135_30 = arith.constant 135 : index
      %35 = vector.load %arg8[%c0_29, %c135_30] : memref<2x506xf32, #tpu.memory_space<vmem>>, vector<2x16xf32>
      tpu.vector_store %arg8[%c0_29, %c135_30], %34 {strides = array<i32>} : memref<2x506xf32, #tpu.memory_space<vmem>>, vector<2x16xf32>,
      %36 = vector.extract_strided_slice %14 {offsets = [0, 64], sizes = [2, 16], strides = [1, 1]} : vector<2x256xf32> to vector<2x16xf32>
      %c0_31 = arith.constant 0 : index
      %c157 = arith.constant 157 : index
      %37 = vector.load %arg7[%c0_31, %c157] : memref<2x506xf32, #tpu.memory_space<vmem>>, vector<2x16xf32>
      tpu.vector_store %arg7[%c0_31, %c157], %36 {strides = array<i32>} : memref<2x506xf32, #tpu.memory_space<vmem>>, vector<2x16xf32>,
      %38 = vector.extract_strided_slice %15 {offsets = [0, 64], sizes = [2, 16], strides = [1, 1]} : vector<2x256xf32> to vector<2x16xf32>
      %c0_32 = arith.constant 0 : index
      %c157_33 = arith.constant 157 : index
      %39 = vector.load %arg8[%c0_32, %c157_33] : memref<2x506xf32, #tpu.memory_space<vmem>>, vector<2x16xf32>
      tpu.vector_store %arg8[%c0_32, %c157_33], %38 {strides = array<i32>} : memref<2x506xf32, #tpu.memory_space<vmem>>, vector<2x16xf32>,
      %40 = vector.extract_strided_slice %14 {offsets = [0, 80], sizes = [2, 16], strides = [1, 1]} : vector<2x256xf32> to vector<2x16xf32>
      %c0_34 = arith.constant 0 : index
      %c179 = arith.constant 179 : index
      %41 = vector.load %arg7[%c0_34, %c179] : memref<2x506xf32, #tpu.memory_space<vmem>>, vector<2x16xf32>
      tpu.vector_store %arg7[%c0_34, %c179], %40 {strides = array<i32>} : memref<2x506xf32, #tpu.memory_space<vmem>>, vector<2x16xf32>,
      %42 = vector.extract_strided_slice %15 {offsets = [0, 80], sizes = [2, 16], strides = [1, 1]} : vector<2x256xf32> to vector<2x16xf32>
      %c0_35 = arith.constant 0 : index
      %c179_36 = arith.constant 179 : index
      %43 = vector.load %arg8[%c0_35, %c179_36] : memref<2x506xf32, #tpu.memory_space<vmem>>, vector<2x16xf32>
      tpu.vector_store %arg8[%c0_35, %c179_36], %42 {strides = array<i32>} : memref<2x506xf32, #tpu.memory_space<vmem>>, vector<2x16xf32>,
      %44 = vector.extract_strided_slice %14 {offsets = [0, 96], sizes = [2, 16], strides = [1, 1]} : vector<2x256xf32> to vector<2x16xf32>
      %c0_37 = arith.constant 0 : index
      %c201 = arith.constant 201 : index
      %45 = vector.load %arg7[%c0_37, %c201] : memref<2x506xf32, #tpu.memory_space<vmem>>, vector<2x16xf32>
      tpu.vector_store %arg7[%c0_37, %c201], %44 {strides = array<i32>} : memref<2x506xf32, #tpu.memory_space<vmem>>, vector<2x16xf32>,
      %46 = vector.extract_strided_slice %15 {offsets = [0, 96], sizes = [2, 16], strides = [1, 1]} : vector<2x256xf32> to vector<2x16xf32>
      %c0_38 = arith.constant 0 : index
      %c201_39 = arith.constant 201 : index
      %47 = vector.load %arg8[%c0_38, %c201_39] : memref<2x506xf32, #tpu.memory_space<vmem>>, vector<2x16xf32>
      tpu.vector_store %arg8[%c0_38, %c201_39], %46 {strides = array<i32>} : memref<2x506xf32, #tpu.memory_space<vmem>>, vector<2x16xf32>,
      %48 = vector.extract_strided_slice %14 {offsets = [0, 112], sizes = [2, 16], strides = [1, 1]} : vector<2x256xf32> to vector<2x16xf32>
      %c0_40 = arith.constant 0 : index
      %c223 = arith.constant 223 : index
      %49 = vector.load %arg7[%c0_40, %c223] : memref<2x506xf32, #tpu.memory_space<vmem>>, vector<2x16xf32>
      tpu.vector_store %arg7[%c0_40, %c223], %48 {strides = array<i32>} : memref<2x506xf32, #tpu.memory_space<vmem>>, vector<2x16xf32>,
      %50 = vector.extract_strided_slice %15 {offsets = [0, 112], sizes = [2, 16], strides = [1, 1]} : vector<2x256xf32> to vector<2x16xf32>
      %c0_41 = arith.constant 0 : index
      %c223_42 = arith.constant 223 : index
      %51 = vector.load %arg8[%c0_41, %c223_42] : memref<2x506xf32, #tpu.memory_space<vmem>>, vector<2x16xf32>
      tpu.vector_store %arg8[%c0_41, %c223_42], %50 {strides = array<i32>} : memref<2x506xf32, #tpu.memory_space<vmem>>, vector<2x16xf32>,
      %52 = vector.extract_strided_slice %14 {offsets = [0, 128], sizes = [2, 16], strides = [1, 1]} : vector<2x256xf32> to vector<2x16xf32>
      %c0_43 = arith.constant 0 : index
      %c245 = arith.constant 245 : index
      %53 = vector.load %arg7[%c0_43, %c245] : memref<2x506xf32, #tpu.memory_space<vmem>>, vector<2x16xf32>
      tpu.vector_store %arg7[%c0_43, %c245], %52 {strides = array<i32>} : memref<2x506xf32, #tpu.memory_space<vmem>>, vector<2x16xf32>,
      %54 = vector.extract_strided_slice %15 {offsets = [0, 128], sizes = [2, 16], strides = [1, 1]} : vector<2x256xf32> to vector<2x16xf32>
      %c0_44 = arith.constant 0 : index
      %c245_45 = arith.constant 245 : index
      %55 = vector.load %arg8[%c0_44, %c245_45] : memref<2x506xf32, #tpu.memory_space<vmem>>, vector<2x16xf32>
      tpu.vector_store %arg8[%c0_44, %c245_45], %54 {strides = array<i32>} : memref<2x506xf32, #tpu.memory_space<vmem>>, vector<2x16xf32>,
      %56 = vector.extract_strided_slice %14 {offsets = [0, 144], sizes = [2, 16], strides = [1, 1]} : vector<2x256xf32> to vector<2x16xf32>
      %c0_46 = arith.constant 0 : index
      %c267 = arith.constant 267 : index
      %57 = vector.load %arg7[%c0_46, %c267] : memref<2x506xf32, #tpu.memory_space<vmem>>, vector<2x16xf32>
      tpu.vector_store %arg7[%c0_46, %c267], %56 {strides = array<i32>} : memref<2x506xf32, #tpu.memory_space<vmem>>, vector<2x16xf32>,
      %58 = vector.extract_strided_slice %15 {offsets = [0, 144], sizes = [2, 16], strides = [1, 1]} : vector<2x256xf32> to vector<2x16xf32>
      %c0_47 = arith.constant 0 : index
      %c267_48 = arith.constant 267 : index
      %59 = vector.load %arg8[%c0_47, %c267_48] : memref<2x506xf32, #tpu.memory_space<vmem>>, vector<2x16xf32>
      tpu.vector_store %arg8[%c0_47, %c267_48], %58 {strides = array<i32>} : memref<2x506xf32, #tpu.memory_space<vmem>>, vector<2x16xf32>,
      %60 = vector.extract_strided_slice %14 {offsets = [0, 160], sizes = [2, 16], strides = [1, 1]} : vector<2x256xf32> to vector<2x16xf32>
      %c0_49 = arith.constant 0 : index
      %c289 = arith.constant 289 : index
      %61 = vector.load %arg7[%c0_49, %c289] : memref<2x506xf32, #tpu.memory_space<vmem>>, vector<2x16xf32>
      tpu.vector_store %arg7[%c0_49, %c289], %60 {strides = array<i32>} : memref<2x506xf32, #tpu.memory_space<vmem>>, vector<2x16xf32>,
      %62 = vector.extract_strided_slice %15 {offsets = [0, 160], sizes = [2, 16], strides = [1, 1]} : vector<2x256xf32> to vector<2x16xf32>
      %c0_50 = arith.constant 0 : index
      %c289_51 = arith.constant 289 : index
      %63 = vector.load %arg8[%c0_50, %c289_51] : memref<2x506xf32, #tpu.memory_space<vmem>>, vector<2x16xf32>
      tpu.vector_store %arg8[%c0_50, %c289_51], %62 {strides = array<i32>} : memref<2x506xf32, #tpu.memory_space<vmem>>, vector<2x16xf32>,
      %64 = vector.extract_strided_slice %14 {offsets = [0, 176], sizes = [2, 16], strides = [1, 1]} : vector<2x256xf32> to vector<2x16xf32>
      %c0_52 = arith.constant 0 : index
      %c311 = arith.constant 311 : index
      %65 = vector.load %arg7[%c0_52, %c311] : memref<2x506xf32, #tpu.memory_space<vmem>>, vector<2x16xf32>
      tpu.vector_store %arg7[%c0_52, %c311], %64 {strides = array<i32>} : memref<2x506xf32, #tpu.memory_space<vmem>>, vector<2x16xf32>,
      %66 = vector.extract_strided_slice %15 {offsets = [0, 176], sizes = [2, 16], strides = [1, 1]} : vector<2x256xf32> to vector<2x16xf32>
      %c0_53 = arith.constant 0 : index
      %c311_54 = arith.constant 311 : index
      %67 = vector.load %arg8[%c0_53, %c311_54] : memref<2x506xf32, #tpu.memory_space<vmem>>, vector<2x16xf32>
      tpu.vector_store %arg8[%c0_53, %c311_54], %66 {strides = array<i32>} : memref<2x506xf32, #tpu.memory_space<vmem>>, vector<2x16xf32>,
      %68 = vector.extract_strided_slice %14 {offsets = [0, 192], sizes = [2, 16], strides = [1, 1]} : vector<2x256xf32> to vector<2x16xf32>
      %c0_55 = arith.constant 0 : index
      %c333 = arith.constant 333 : index
      %69 = vector.load %arg7[%c0_55, %c333] : memref<2x506xf32, #tpu.memory_space<vmem>>, vector<2x16xf32>
      tpu.vector_store %arg7[%c0_55, %c333], %68 {strides = array<i32>} : memref<2x506xf32, #tpu.memory_space<vmem>>, vector<2x16xf32>,
      %70 = vector.extract_strided_slice %15 {offsets = [0, 192], sizes = [2, 16], strides = [1, 1]} : vector<2x256xf32> to vector<2x16xf32>
      %c0_56 = arith.constant 0 : index
      %c333_57 = arith.constant 333 : index
      %71 = vector.load %arg8[%c0_56, %c333_57] : memref<2x506xf32, #tpu.memory_space<vmem>>, vector<2x16xf32>
      tpu.vector_store %arg8[%c0_56, %c333_57], %70 {strides = array<i32>} : memref<2x506xf32, #tpu.memory_space<vmem>>, vector<2x16xf32>,
      %72 = vector.extract_strided_slice %14 {offsets = [0, 208], sizes = [2, 16], strides = [1, 1]} : vector<2x256xf32> to vector<2x16xf32>
      %c0_58 = arith.constant 0 : index
      %c355 = arith.constant 355 : index
      %73 = vector.load %arg7[%c0_58, %c355] : memref<2x506xf32, #tpu.memory_space<vmem>>, vector<2x16xf32>
      tpu.vector_store %arg7[%c0_58, %c355], %72 {strides = array<i32>} : memref<2x506xf32, #tpu.memory_space<vmem>>, vector<2x16xf32>,
      %74 = vector.extract_strided_slice %15 {offsets = [0, 208], sizes = [2, 16], strides = [1, 1]} : vector<2x256xf32> to vector<2x16xf32>
      %c0_59 = arith.constant 0 : index
      %c355_60 = arith.constant 355 : index
      %75 = vector.load %arg8[%c0_59, %c355_60] : memref<2x506xf32, #tpu.memory_space<vmem>>, vector<2x16xf32>
      tpu.vector_store %arg8[%c0_59, %c355_60], %74 {strides = array<i32>} : memref<2x506xf32, #tpu.memory_space<vmem>>, vector<2x16xf32>,
      %76 = vector.extract_strided_slice %14 {offsets = [0, 224], sizes = [2, 16], strides = [1, 1]} : vector<2x256xf32> to vector<2x16xf32>
      %c0_61 = arith.constant 0 : index
      %c377 = arith.constant 377 : index
      %77 = vector.load %arg7[%c0_61, %c377] : memref<2x506xf32, #tpu.memory_space<vmem>>, vector<2x16xf32>
      tpu.vector_store %arg7[%c0_61, %c377], %76 {strides = array<i32>} : memref<2x506xf32, #tpu.memory_space<vmem>>, vector<2x16xf32>,
      %78 = vector.extract_strided_slice %15 {offsets = [0, 224], sizes = [2, 16], strides = [1, 1]} : vector<2x256xf32> to vector<2x16xf32>
      %c0_62 = arith.constant 0 : index
      %c377_63 = arith.constant 377 : index
      %79 = vector.load %arg8[%c0_62, %c377_63] : memref<2x506xf32, #tpu.memory_space<vmem>>, vector<2x16xf32>
      tpu.vector_store %arg8[%c0_62, %c377_63], %78 {strides = array<i32>} : memref<2x506xf32, #tpu.memory_space<vmem>>, vector<2x16xf32>,
      %80 = vector.extract_strided_slice %14 {offsets = [0, 240], sizes = [2, 16], strides = [1, 1]} : vector<2x256xf32> to vector<2x16xf32>
      %c0_64 = arith.constant 0 : index
      %c399 = arith.constant 399 : index
      %81 = vector.load %arg7[%c0_64, %c399] : memref<2x506xf32, #tpu.memory_space<vmem>>, vector<2x16xf32>
      tpu.vector_store %arg7[%c0_64, %c399], %80 {strides = array<i32>} : memref<2x506xf32, #tpu.memory_space<vmem>>, vector<2x16xf32>,
      %82 = vector.extract_strided_slice %15 {offsets = [0, 240], sizes = [2, 16], strides = [1, 1]} : vector<2x256xf32> to vector<2x16xf32>
      %c0_65 = arith.constant 0 : index
      %c399_66 = arith.constant 399 : index
      %83 = vector.load %arg8[%c0_65, %c399_66] : memref<2x506xf32, #tpu.memory_space<vmem>>, vector<2x16xf32>
      tpu.vector_store %arg8[%c0_65, %c399_66], %82 {strides = array<i32>} : memref<2x506xf32, #tpu.memory_space<vmem>>, vector<2x16xf32>,
      %cst_67 = arith.constant 0.000000e+00 : f32
      %84 = vector.broadcast %cst_67 : f32 to vector<2x352xf32>
      %cst_68 = arith.constant 0.000000e+00 : f32
      %85 = vector.broadcast %cst_68 : f32 to vector<2x352xf32>
      %c0_69 = arith.constant 0 : index
      %86 = memref.load %arg2[%c0_69] : memref<98xf32, #tpu.memory_space<smem>>
      %c0_70 = arith.constant 0 : index
      %c0_71 = arith.constant 0 : index
      %87 = vector.load %arg7[%c0_70, %c0_71] : memref<2x506xf32, #tpu.memory_space<vmem>>, vector<2x352xf32>
      %88 = vector.broadcast %86 : f32 to vector<2x352xf32>
      %89 = arith.mulf %88, %87 : vector<2x352xf32>
      %90 = arith.addf %84, %89 : vector<2x352xf32>
      %c49 = arith.constant 49 : index
      %91 = memref.load %arg2[%c49] : memref<98xf32, #tpu.memory_space<smem>>
      %c0_72 = arith.constant 0 : index
      %c0_73 = arith.constant 0 : index
      %92 = vector.load %arg8[%c0_72, %c0_73] : memref<2x506xf32, #tpu.memory_space<vmem>>, vector<2x352xf32>
      %93 = vector.broadcast %91 : f32 to vector<2x352xf32>
      %94 = arith.mulf %93, %92 : vector<2x352xf32>
      %95 = arith.addf %85, %94 : vector<2x352xf32>
      %c1 = arith.constant 1 : index
      %96 = memref.load %arg2[%c1] : memref<98xf32, #tpu.memory_space<smem>>
      %c0_74 = arith.constant 0 : index
      %c1_75 = arith.constant 1 : index
      %97 = vector.load %arg7[%c0_74, %c1_75] : memref<2x506xf32, #tpu.memory_space<vmem>>, vector<2x352xf32>
      %98 = vector.broadcast %96 : f32 to vector<2x352xf32>
      %99 = arith.mulf %98, %97 : vector<2x352xf32>
      %100 = arith.addf %90, %99 : vector<2x352xf32>
      %c50 = arith.constant 50 : index
      %101 = memref.load %arg2[%c50] : memref<98xf32, #tpu.memory_space<smem>>
      %c0_76 = arith.constant 0 : index
      %c1_77 = arith.constant 1 : index
      %102 = vector.load %arg8[%c0_76, %c1_77] : memref<2x506xf32, #tpu.memory_space<vmem>>, vector<2x352xf32>
      %103 = vector.broadcast %101 : f32 to vector<2x352xf32>
      %104 = arith.mulf %103, %102 : vector<2x352xf32>
      %105 = arith.addf %95, %104 : vector<2x352xf32>
      %c2 = arith.constant 2 : index
      %106 = memref.load %arg2[%c2] : memref<98xf32, #tpu.memory_space<smem>>
      %c0_78 = arith.constant 0 : index
      %c2_79 = arith.constant 2 : index
      %107 = vector.load %arg7[%c0_78, %c2_79] : memref<2x506xf32, #tpu.memory_space<vmem>>, vector<2x352xf32>
      %108 = vector.broadcast %106 : f32 to vector<2x352xf32>
      %109 = arith.mulf %108, %107 : vector<2x352xf32>
      %110 = arith.addf %100, %109 : vector<2x352xf32>
      %c51 = arith.constant 51 : index
      %111 = memref.load %arg2[%c51] : memref<98xf32, #tpu.memory_space<smem>>
      %c0_80 = arith.constant 0 : index
      %c2_81 = arith.constant 2 : index
      %112 = vector.load %arg8[%c0_80, %c2_81] : memref<2x506xf32, #tpu.memory_space<vmem>>, vector<2x352xf32>
      %113 = vector.broadcast %111 : f32 to vector<2x352xf32>
      %114 = arith.mulf %113, %112 : vector<2x352xf32>
      %115 = arith.addf %105, %114 : vector<2x352xf32>
      %c3 = arith.constant 3 : index
      %116 = memref.load %arg2[%c3] : memref<98xf32, #tpu.memory_space<smem>>
      %c0_82 = arith.constant 0 : index
      %c3_83 = arith.constant 3 : index
      %117 = vector.load %arg7[%c0_82, %c3_83] : memref<2x506xf32, #tpu.memory_space<vmem>>, vector<2x352xf32>
      %118 = vector.broadcast %116 : f32 to vector<2x352xf32>
      %119 = arith.mulf %118, %117 : vector<2x352xf32>
      %120 = arith.addf %110, %119 : vector<2x352xf32>
      %c52 = arith.constant 52 : index
      %121 = memref.load %arg2[%c52] : memref<98xf32, #tpu.memory_space<smem>>
      %c0_84 = arith.constant 0 : index
      %c3_85 = arith.constant 3 : index
      %122 = vector.load %arg8[%c0_84, %c3_85] : memref<2x506xf32, #tpu.memory_space<vmem>>, vector<2x352xf32>
      %123 = vector.broadcast %121 : f32 to vector<2x352xf32>
      %124 = arith.mulf %123, %122 : vector<2x352xf32>
      %125 = arith.addf %115, %124 : vector<2x352xf32>
      %c4 = arith.constant 4 : index
      %126 = memref.load %arg2[%c4] : memref<98xf32, #tpu.memory_space<smem>>
      %c0_86 = arith.constant 0 : index
      %c4_87 = arith.constant 4 : index
      %127 = vector.load %arg7[%c0_86, %c4_87] : memref<2x506xf32, #tpu.memory_space<vmem>>, vector<2x352xf32>
      %128 = vector.broadcast %126 : f32 to vector<2x352xf32>
      %129 = arith.mulf %128, %127 : vector<2x352xf32>
      %130 = arith.addf %120, %129 : vector<2x352xf32>
      %c53 = arith.constant 53 : index
      %131 = memref.load %arg2[%c53] : memref<98xf32, #tpu.memory_space<smem>>
      %c0_88 = arith.constant 0 : index
      %c4_89 = arith.constant 4 : index
      %132 = vector.load %arg8[%c0_88, %c4_89] : memref<2x506xf32, #tpu.memory_space<vmem>>, vector<2x352xf32>
      %133 = vector.broadcast %131 : f32 to vector<2x352xf32>
      %134 = arith.mulf %133, %132 : vector<2x352xf32>
      %135 = arith.addf %125, %134 : vector<2x352xf32>
      %c5 = arith.constant 5 : index
      %136 = memref.load %arg2[%c5] : memref<98xf32, #tpu.memory_space<smem>>
      %c0_90 = arith.constant 0 : index
      %c5_91 = arith.constant 5 : index
      %137 = vector.load %arg7[%c0_90, %c5_91] : memref<2x506xf32, #tpu.memory_space<vmem>>, vector<2x352xf32>
      %138 = vector.broadcast %136 : f32 to vector<2x352xf32>
      %139 = arith.mulf %138, %137 : vector<2x352xf32>
      %140 = arith.addf %130, %139 : vector<2x352xf32>
      %c54 = arith.constant 54 : index
      %141 = memref.load %arg2[%c54] : memref<98xf32, #tpu.memory_space<smem>>
      %c0_92 = arith.constant 0 : index
      %c5_93 = arith.constant 5 : index
      %142 = vector.load %arg8[%c0_92, %c5_93] : memref<2x506xf32, #tpu.memory_space<vmem>>, vector<2x352xf32>
      %143 = vector.broadcast %141 : f32 to vector<2x352xf32>
      %144 = arith.mulf %143, %142 : vector<2x352xf32>
      %145 = arith.addf %135, %144 : vector<2x352xf32>
      %c6 = arith.constant 6 : index
      %146 = memref.load %arg2[%c6] : memref<98xf32, #tpu.memory_space<smem>>
      %c0_94 = arith.constant 0 : index
      %c6_95 = arith.constant 6 : index
      %147 = vector.load %arg7[%c0_94, %c6_95] : memref<2x506xf32, #tpu.memory_space<vmem>>, vector<2x352xf32>
      %148 = vector.broadcast %146 : f32 to vector<2x352xf32>
      %149 = arith.mulf %148, %147 : vector<2x352xf32>
      %150 = arith.addf %140, %149 : vector<2x352xf32>
      %c55 = arith.constant 55 : index
      %151 = memref.load %arg2[%c55] : memref<98xf32, #tpu.memory_space<smem>>
      %c0_96 = arith.constant 0 : index
      %c6_97 = arith.constant 6 : index
      %152 = vector.load %arg8[%c0_96, %c6_97] : memref<2x506xf32, #tpu.memory_space<vmem>>, vector<2x352xf32>
      %153 = vector.broadcast %151 : f32 to vector<2x352xf32>
      %154 = arith.mulf %153, %152 : vector<2x352xf32>
      %155 = arith.addf %145, %154 : vector<2x352xf32>
      %c7 = arith.constant 7 : index
      %156 = memref.load %arg2[%c7] : memref<98xf32, #tpu.memory_space<smem>>
      %c0_98 = arith.constant 0 : index
      %c22 = arith.constant 22 : index
      %157 = vector.load %arg7[%c0_98, %c22] : memref<2x506xf32, #tpu.memory_space<vmem>>, vector<2x352xf32>
      %158 = vector.broadcast %156 : f32 to vector<2x352xf32>
      %159 = arith.mulf %158, %157 : vector<2x352xf32>
      %160 = arith.addf %150, %159 : vector<2x352xf32>
      %c56 = arith.constant 56 : index
      %161 = memref.load %arg2[%c56] : memref<98xf32, #tpu.memory_space<smem>>
      %c0_99 = arith.constant 0 : index
      %c22_100 = arith.constant 22 : index
      %162 = vector.load %arg8[%c0_99, %c22_100] : memref<2x506xf32, #tpu.memory_space<vmem>>, vector<2x352xf32>
      %163 = vector.broadcast %161 : f32 to vector<2x352xf32>
      %164 = arith.mulf %163, %162 : vector<2x352xf32>
      %165 = arith.addf %155, %164 : vector<2x352xf32>
      %c8 = arith.constant 8 : index
      %166 = memref.load %arg2[%c8] : memref<98xf32, #tpu.memory_space<smem>>
      %c0_101 = arith.constant 0 : index
      %c23 = arith.constant 23 : index
      %167 = vector.load %arg7[%c0_101, %c23] : memref<2x506xf32, #tpu.memory_space<vmem>>, vector<2x352xf32>
      %168 = vector.broadcast %166 : f32 to vector<2x352xf32>
      %169 = arith.mulf %168, %167 : vector<2x352xf32>
      %170 = arith.addf %160, %169 : vector<2x352xf32>
      %c57 = arith.constant 57 : index
      %171 = memref.load %arg2[%c57] : memref<98xf32, #tpu.memory_space<smem>>
      %c0_102 = arith.constant 0 : index
      %c23_103 = arith.constant 23 : index
      %172 = vector.load %arg8[%c0_102, %c23_103] : memref<2x506xf32, #tpu.memory_space<vmem>>, vector<2x352xf32>
      %173 = vector.broadcast %171 : f32 to vector<2x352xf32>
      %174 = arith.mulf %173, %172 : vector<2x352xf32>
      %175 = arith.addf %165, %174 : vector<2x352xf32>
      %c9 = arith.constant 9 : index
      %176 = memref.load %arg2[%c9] : memref<98xf32, #tpu.memory_space<smem>>
      %c0_104 = arith.constant 0 : index
      %c24 = arith.constant 24 : index
      %177 = vector.load %arg7[%c0_104, %c24] : memref<2x506xf32, #tpu.memory_space<vmem>>, vector<2x352xf32>
      %178 = vector.broadcast %176 : f32 to vector<2x352xf32>
      %179 = arith.mulf %178, %177 : vector<2x352xf32>
      %180 = arith.addf %170, %179 : vector<2x352xf32>
      %c58 = arith.constant 58 : index
      %181 = memref.load %arg2[%c58] : memref<98xf32, #tpu.memory_space<smem>>
      %c0_105 = arith.constant 0 : index
      %c24_106 = arith.constant 24 : index
      %182 = vector.load %arg8[%c0_105, %c24_106] : memref<2x506xf32, #tpu.memory_space<vmem>>, vector<2x352xf32>
      %183 = vector.broadcast %181 : f32 to vector<2x352xf32>
      %184 = arith.mulf %183, %182 : vector<2x352xf32>
      %185 = arith.addf %175, %184 : vector<2x352xf32>
      %c10 = arith.constant 10 : index
      %186 = memref.load %arg2[%c10] : memref<98xf32, #tpu.memory_space<smem>>
      %c0_107 = arith.constant 0 : index
      %c25 = arith.constant 25 : index
      %187 = vector.load %arg7[%c0_107, %c25] : memref<2x506xf32, #tpu.memory_space<vmem>>, vector<2x352xf32>
      %188 = vector.broadcast %186 : f32 to vector<2x352xf32>
      %189 = arith.mulf %188, %187 : vector<2x352xf32>
      %190 = arith.addf %180, %189 : vector<2x352xf32>
      %c59 = arith.constant 59 : index
      %191 = memref.load %arg2[%c59] : memref<98xf32, #tpu.memory_space<smem>>
      %c0_108 = arith.constant 0 : index
      %c25_109 = arith.constant 25 : index
      %192 = vector.load %arg8[%c0_108, %c25_109] : memref<2x506xf32, #tpu.memory_space<vmem>>, vector<2x352xf32>
      %193 = vector.broadcast %191 : f32 to vector<2x352xf32>
      %194 = arith.mulf %193, %192 : vector<2x352xf32>
      %195 = arith.addf %185, %194 : vector<2x352xf32>
      %c11 = arith.constant 11 : index
      %196 = memref.load %arg2[%c11] : memref<98xf32, #tpu.memory_space<smem>>
      %c0_110 = arith.constant 0 : index
      %c26 = arith.constant 26 : index
      %197 = vector.load %arg7[%c0_110, %c26] : memref<2x506xf32, #tpu.memory_space<vmem>>, vector<2x352xf32>
      %198 = vector.broadcast %196 : f32 to vector<2x352xf32>
      %199 = arith.mulf %198, %197 : vector<2x352xf32>
      %200 = arith.addf %190, %199 : vector<2x352xf32>
      %c60 = arith.constant 60 : index
      %201 = memref.load %arg2[%c60] : memref<98xf32, #tpu.memory_space<smem>>
      %c0_111 = arith.constant 0 : index
      %c26_112 = arith.constant 26 : index
      %202 = vector.load %arg8[%c0_111, %c26_112] : memref<2x506xf32, #tpu.memory_space<vmem>>, vector<2x352xf32>
      %203 = vector.broadcast %201 : f32 to vector<2x352xf32>
      %204 = arith.mulf %203, %202 : vector<2x352xf32>
      %205 = arith.addf %195, %204 : vector<2x352xf32>
      %c12 = arith.constant 12 : index
      %206 = memref.load %arg2[%c12] : memref<98xf32, #tpu.memory_space<smem>>
      %c0_113 = arith.constant 0 : index
      %c27 = arith.constant 27 : index
      %207 = vector.load %arg7[%c0_113, %c27] : memref<2x506xf32, #tpu.memory_space<vmem>>, vector<2x352xf32>
      %208 = vector.broadcast %206 : f32 to vector<2x352xf32>
      %209 = arith.mulf %208, %207 : vector<2x352xf32>
      %210 = arith.addf %200, %209 : vector<2x352xf32>
      %c61 = arith.constant 61 : index
      %211 = memref.load %arg2[%c61] : memref<98xf32, #tpu.memory_space<smem>>
      %c0_114 = arith.constant 0 : index
      %c27_115 = arith.constant 27 : index
      %212 = vector.load %arg8[%c0_114, %c27_115] : memref<2x506xf32, #tpu.memory_space<vmem>>, vector<2x352xf32>
      %213 = vector.broadcast %211 : f32 to vector<2x352xf32>
      %214 = arith.mulf %213, %212 : vector<2x352xf32>
      %215 = arith.addf %205, %214 : vector<2x352xf32>
      %c13 = arith.constant 13 : index
      %216 = memref.load %arg2[%c13] : memref<98xf32, #tpu.memory_space<smem>>
      %c0_116 = arith.constant 0 : index
      %c28 = arith.constant 28 : index
      %217 = vector.load %arg7[%c0_116, %c28] : memref<2x506xf32, #tpu.memory_space<vmem>>, vector<2x352xf32>
      %218 = vector.broadcast %216 : f32 to vector<2x352xf32>
      %219 = arith.mulf %218, %217 : vector<2x352xf32>
      %220 = arith.addf %210, %219 : vector<2x352xf32>
      %c62 = arith.constant 62 : index
      %221 = memref.load %arg2[%c62] : memref<98xf32, #tpu.memory_space<smem>>
      %c0_117 = arith.constant 0 : index
      %c28_118 = arith.constant 28 : index
      %222 = vector.load %arg8[%c0_117, %c28_118] : memref<2x506xf32, #tpu.memory_space<vmem>>, vector<2x352xf32>
      %223 = vector.broadcast %221 : f32 to vector<2x352xf32>
      %224 = arith.mulf %223, %222 : vector<2x352xf32>
      %225 = arith.addf %215, %224 : vector<2x352xf32>
      %c14 = arith.constant 14 : index
      %226 = memref.load %arg2[%c14] : memref<98xf32, #tpu.memory_space<smem>>
      %c0_119 = arith.constant 0 : index
      %c44 = arith.constant 44 : index
      %227 = vector.load %arg7[%c0_119, %c44] : memref<2x506xf32, #tpu.memory_space<vmem>>, vector<2x352xf32>
      %228 = vector.broadcast %226 : f32 to vector<2x352xf32>
      %229 = arith.mulf %228, %227 : vector<2x352xf32>
      %230 = arith.addf %220, %229 : vector<2x352xf32>
      %c63 = arith.constant 63 : index
      %231 = memref.load %arg2[%c63] : memref<98xf32, #tpu.memory_space<smem>>
      %c0_120 = arith.constant 0 : index
      %c44_121 = arith.constant 44 : index
      %232 = vector.load %arg8[%c0_120, %c44_121] : memref<2x506xf32, #tpu.memory_space<vmem>>, vector<2x352xf32>
      %233 = vector.broadcast %231 : f32 to vector<2x352xf32>
      %234 = arith.mulf %233, %232 : vector<2x352xf32>
      %235 = arith.addf %225, %234 : vector<2x352xf32>
      %c15 = arith.constant 15 : index
      %236 = memref.load %arg2[%c15] : memref<98xf32, #tpu.memory_space<smem>>
      %c0_122 = arith.constant 0 : index
      %c45 = arith.constant 45 : index
      %237 = vector.load %arg7[%c0_122, %c45] : memref<2x506xf32, #tpu.memory_space<vmem>>, vector<2x352xf32>
      %238 = vector.broadcast %236 : f32 to vector<2x352xf32>
      %239 = arith.mulf %238, %237 : vector<2x352xf32>
      %240 = arith.addf %230, %239 : vector<2x352xf32>
      %c64 = arith.constant 64 : index
      %241 = memref.load %arg2[%c64] : memref<98xf32, #tpu.memory_space<smem>>
      %c0_123 = arith.constant 0 : index
      %c45_124 = arith.constant 45 : index
      %242 = vector.load %arg8[%c0_123, %c45_124] : memref<2x506xf32, #tpu.memory_space<vmem>>, vector<2x352xf32>
      %243 = vector.broadcast %241 : f32 to vector<2x352xf32>
      %244 = arith.mulf %243, %242 : vector<2x352xf32>
      %245 = arith.addf %235, %244 : vector<2x352xf32>
      %c16 = arith.constant 16 : index
      %246 = memref.load %arg2[%c16] : memref<98xf32, #tpu.memory_space<smem>>
      %c0_125 = arith.constant 0 : index
      %c46 = arith.constant 46 : index
      %247 = vector.load %arg7[%c0_125, %c46] : memref<2x506xf32, #tpu.memory_space<vmem>>, vector<2x352xf32>
      %248 = vector.broadcast %246 : f32 to vector<2x352xf32>
      %249 = arith.mulf %248, %247 : vector<2x352xf32>
      %250 = arith.addf %240, %249 : vector<2x352xf32>
      %c65 = arith.constant 65 : index
      %251 = memref.load %arg2[%c65] : memref<98xf32, #tpu.memory_space<smem>>
      %c0_126 = arith.constant 0 : index
      %c46_127 = arith.constant 46 : index
      %252 = vector.load %arg8[%c0_126, %c46_127] : memref<2x506xf32, #tpu.memory_space<vmem>>, vector<2x352xf32>
      %253 = vector.broadcast %251 : f32 to vector<2x352xf32>
      %254 = arith.mulf %253, %252 : vector<2x352xf32>
      %255 = arith.addf %245, %254 : vector<2x352xf32>
      %c17 = arith.constant 17 : index
      %256 = memref.load %arg2[%c17] : memref<98xf32, #tpu.memory_space<smem>>
      %c0_128 = arith.constant 0 : index
      %c47 = arith.constant 47 : index
      %257 = vector.load %arg7[%c0_128, %c47] : memref<2x506xf32, #tpu.memory_space<vmem>>, vector<2x352xf32>
      %258 = vector.broadcast %256 : f32 to vector<2x352xf32>
      %259 = arith.mulf %258, %257 : vector<2x352xf32>
      %260 = arith.addf %250, %259 : vector<2x352xf32>
      %c66 = arith.constant 66 : index
      %261 = memref.load %arg2[%c66] : memref<98xf32, #tpu.memory_space<smem>>
      %c0_129 = arith.constant 0 : index
      %c47_130 = arith.constant 47 : index
      %262 = vector.load %arg8[%c0_129, %c47_130] : memref<2x506xf32, #tpu.memory_space<vmem>>, vector<2x352xf32>
      %263 = vector.broadcast %261 : f32 to vector<2x352xf32>
      %264 = arith.mulf %263, %262 : vector<2x352xf32>
      %265 = arith.addf %255, %264 : vector<2x352xf32>
      %c18 = arith.constant 18 : index
      %266 = memref.load %arg2[%c18] : memref<98xf32, #tpu.memory_space<smem>>
      %c0_131 = arith.constant 0 : index
      %c48 = arith.constant 48 : index
      %267 = vector.load %arg7[%c0_131, %c48] : memref<2x506xf32, #tpu.memory_space<vmem>>, vector<2x352xf32>
      %268 = vector.broadcast %266 : f32 to vector<2x352xf32>
      %269 = arith.mulf %268, %267 : vector<2x352xf32>
      %270 = arith.addf %260, %269 : vector<2x352xf32>
      %c67 = arith.constant 67 : index
      %271 = memref.load %arg2[%c67] : memref<98xf32, #tpu.memory_space<smem>>
      %c0_132 = arith.constant 0 : index
      %c48_133 = arith.constant 48 : index
      %272 = vector.load %arg8[%c0_132, %c48_133] : memref<2x506xf32, #tpu.memory_space<vmem>>, vector<2x352xf32>
      %273 = vector.broadcast %271 : f32 to vector<2x352xf32>
      %274 = arith.mulf %273, %272 : vector<2x352xf32>
      %275 = arith.addf %265, %274 : vector<2x352xf32>
      %c19 = arith.constant 19 : index
      %276 = memref.load %arg2[%c19] : memref<98xf32, #tpu.memory_space<smem>>
      %c0_134 = arith.constant 0 : index
      %c49_135 = arith.constant 49 : index
      %277 = vector.load %arg7[%c0_134, %c49_135] : memref<2x506xf32, #tpu.memory_space<vmem>>, vector<2x352xf32>
      %278 = vector.broadcast %276 : f32 to vector<2x352xf32>
      %279 = arith.mulf %278, %277 : vector<2x352xf32>
      %280 = arith.addf %270, %279 : vector<2x352xf32>
      %c68 = arith.constant 68 : index
      %281 = memref.load %arg2[%c68] : memref<98xf32, #tpu.memory_space<smem>>
      %c0_136 = arith.constant 0 : index
      %c49_137 = arith.constant 49 : index
      %282 = vector.load %arg8[%c0_136, %c49_137] : memref<2x506xf32, #tpu.memory_space<vmem>>, vector<2x352xf32>
      %283 = vector.broadcast %281 : f32 to vector<2x352xf32>
      %284 = arith.mulf %283, %282 : vector<2x352xf32>
      %285 = arith.addf %275, %284 : vector<2x352xf32>
      %c20 = arith.constant 20 : index
      %286 = memref.load %arg2[%c20] : memref<98xf32, #tpu.memory_space<smem>>
      %c0_138 = arith.constant 0 : index
      %c50_139 = arith.constant 50 : index
      %287 = vector.load %arg7[%c0_138, %c50_139] : memref<2x506xf32, #tpu.memory_space<vmem>>, vector<2x352xf32>
      %288 = vector.broadcast %286 : f32 to vector<2x352xf32>
      %289 = arith.mulf %288, %287 : vector<2x352xf32>
      %290 = arith.addf %280, %289 : vector<2x352xf32>
      %c69_140 = arith.constant 69 : index
      %291 = memref.load %arg2[%c69_140] : memref<98xf32, #tpu.memory_space<smem>>
      %c0_141 = arith.constant 0 : index
      %c50_142 = arith.constant 50 : index
      %292 = vector.load %arg8[%c0_141, %c50_142] : memref<2x506xf32, #tpu.memory_space<vmem>>, vector<2x352xf32>
      %293 = vector.broadcast %291 : f32 to vector<2x352xf32>
      %294 = arith.mulf %293, %292 : vector<2x352xf32>
      %295 = arith.addf %285, %294 : vector<2x352xf32>
      %c21 = arith.constant 21 : index
      %296 = memref.load %arg2[%c21] : memref<98xf32, #tpu.memory_space<smem>>
      %c0_143 = arith.constant 0 : index
      %c66_144 = arith.constant 66 : index
      %297 = vector.load %arg7[%c0_143, %c66_144] : memref<2x506xf32, #tpu.memory_space<vmem>>, vector<2x352xf32>
      %298 = vector.broadcast %296 : f32 to vector<2x352xf32>
      %299 = arith.mulf %298, %297 : vector<2x352xf32>
      %300 = arith.addf %290, %299 : vector<2x352xf32>
      %c70 = arith.constant 70 : index
      %301 = memref.load %arg2[%c70] : memref<98xf32, #tpu.memory_space<smem>>
      %c0_145 = arith.constant 0 : index
      %c66_146 = arith.constant 66 : index
      %302 = vector.load %arg8[%c0_145, %c66_146] : memref<2x506xf32, #tpu.memory_space<vmem>>, vector<2x352xf32>
      %303 = vector.broadcast %301 : f32 to vector<2x352xf32>
      %304 = arith.mulf %303, %302 : vector<2x352xf32>
      %305 = arith.addf %295, %304 : vector<2x352xf32>
      %c22_147 = arith.constant 22 : index
      %306 = memref.load %arg2[%c22_147] : memref<98xf32, #tpu.memory_space<smem>>
      %c0_148 = arith.constant 0 : index
      %c67_149 = arith.constant 67 : index
      %307 = vector.load %arg7[%c0_148, %c67_149] : memref<2x506xf32, #tpu.memory_space<vmem>>, vector<2x352xf32>
      %308 = vector.broadcast %306 : f32 to vector<2x352xf32>
      %309 = arith.mulf %308, %307 : vector<2x352xf32>
      %310 = arith.addf %300, %309 : vector<2x352xf32>
      %c71 = arith.constant 71 : index
      %311 = memref.load %arg2[%c71] : memref<98xf32, #tpu.memory_space<smem>>
      %c0_150 = arith.constant 0 : index
      %c67_151 = arith.constant 67 : index
      %312 = vector.load %arg8[%c0_150, %c67_151] : memref<2x506xf32, #tpu.memory_space<vmem>>, vector<2x352xf32>
      %313 = vector.broadcast %311 : f32 to vector<2x352xf32>
      %314 = arith.mulf %313, %312 : vector<2x352xf32>
      %315 = arith.addf %305, %314 : vector<2x352xf32>
      %c23_152 = arith.constant 23 : index
      %316 = memref.load %arg2[%c23_152] : memref<98xf32, #tpu.memory_space<smem>>
      %c0_153 = arith.constant 0 : index
      %c68_154 = arith.constant 68 : index
      %317 = vector.load %arg7[%c0_153, %c68_154] : memref<2x506xf32, #tpu.memory_space<vmem>>, vector<2x352xf32>
      %318 = vector.broadcast %316 : f32 to vector<2x352xf32>
      %319 = arith.mulf %318, %317 : vector<2x352xf32>
      %320 = arith.addf %310, %319 : vector<2x352xf32>
      %c72 = arith.constant 72 : index
      %321 = memref.load %arg2[%c72] : memref<98xf32, #tpu.memory_space<smem>>
      %c0_155 = arith.constant 0 : index
      %c68_156 = arith.constant 68 : index
      %322 = vector.load %arg8[%c0_155, %c68_156] : memref<2x506xf32, #tpu.memory_space<vmem>>, vector<2x352xf32>
      %323 = vector.broadcast %321 : f32 to vector<2x352xf32>
      %324 = arith.mulf %323, %322 : vector<2x352xf32>
      %325 = arith.addf %315, %324 : vector<2x352xf32>
      %c24_157 = arith.constant 24 : index
      %326 = memref.load %arg2[%c24_157] : memref<98xf32, #tpu.memory_space<smem>>
      %c0_158 = arith.constant 0 : index
      %c69_159 = arith.constant 69 : index
      %327 = vector.load %arg7[%c0_158, %c69_159] : memref<2x506xf32, #tpu.memory_space<vmem>>, vector<2x352xf32>
      %328 = vector.broadcast %326 : f32 to vector<2x352xf32>
      %329 = arith.mulf %328, %327 : vector<2x352xf32>
      %330 = arith.addf %320, %329 : vector<2x352xf32>
      %c73 = arith.constant 73 : index
      %331 = memref.load %arg2[%c73] : memref<98xf32, #tpu.memory_space<smem>>
      %c0_160 = arith.constant 0 : index
      %c69_161 = arith.constant 69 : index
      %332 = vector.load %arg8[%c0_160, %c69_161] : memref<2x506xf32, #tpu.memory_space<vmem>>, vector<2x352xf32>
      %333 = vector.broadcast %331 : f32 to vector<2x352xf32>
      %334 = arith.mulf %333, %332 : vector<2x352xf32>
      %335 = arith.addf %325, %334 : vector<2x352xf32>
      %c25_162 = arith.constant 25 : index
      %336 = memref.load %arg2[%c25_162] : memref<98xf32, #tpu.memory_space<smem>>
      %c0_163 = arith.constant 0 : index
      %c70_164 = arith.constant 70 : index
      %337 = vector.load %arg7[%c0_163, %c70_164] : memref<2x506xf32, #tpu.memory_space<vmem>>, vector<2x352xf32>
      %338 = vector.broadcast %336 : f32 to vector<2x352xf32>
      %339 = arith.mulf %338, %337 : vector<2x352xf32>
      %340 = arith.addf %330, %339 : vector<2x352xf32>
      %c74 = arith.constant 74 : index
      %341 = memref.load %arg2[%c74] : memref<98xf32, #tpu.memory_space<smem>>
      %c0_165 = arith.constant 0 : index
      %c70_166 = arith.constant 70 : index
      %342 = vector.load %arg8[%c0_165, %c70_166] : memref<2x506xf32, #tpu.memory_space<vmem>>, vector<2x352xf32>
      %343 = vector.broadcast %341 : f32 to vector<2x352xf32>
      %344 = arith.mulf %343, %342 : vector<2x352xf32>
      %345 = arith.addf %335, %344 : vector<2x352xf32>
      %c26_167 = arith.constant 26 : index
      %346 = memref.load %arg2[%c26_167] : memref<98xf32, #tpu.memory_space<smem>>
      %c0_168 = arith.constant 0 : index
      %c71_169 = arith.constant 71 : index
      %347 = vector.load %arg7[%c0_168, %c71_169] : memref<2x506xf32, #tpu.memory_space<vmem>>, vector<2x352xf32>
      %348 = vector.broadcast %346 : f32 to vector<2x352xf32>
      %349 = arith.mulf %348, %347 : vector<2x352xf32>
      %350 = arith.addf %340, %349 : vector<2x352xf32>
      %c75 = arith.constant 75 : index
      %351 = memref.load %arg2[%c75] : memref<98xf32, #tpu.memory_space<smem>>
      %c0_170 = arith.constant 0 : index
      %c71_171 = arith.constant 71 : index
      %352 = vector.load %arg8[%c0_170, %c71_171] : memref<2x506xf32, #tpu.memory_space<vmem>>, vector<2x352xf32>
      %353 = vector.broadcast %351 : f32 to vector<2x352xf32>
      %354 = arith.mulf %353, %352 : vector<2x352xf32>
      %355 = arith.addf %345, %354 : vector<2x352xf32>
      %c27_172 = arith.constant 27 : index
      %356 = memref.load %arg2[%c27_172] : memref<98xf32, #tpu.memory_space<smem>>
      %c0_173 = arith.constant 0 : index
      %c72_174 = arith.constant 72 : index
      %357 = vector.load %arg7[%c0_173, %c72_174] : memref<2x506xf32, #tpu.memory_space<vmem>>, vector<2x352xf32>
      %358 = vector.broadcast %356 : f32 to vector<2x352xf32>
      %359 = arith.mulf %358, %357 : vector<2x352xf32>
      %360 = arith.addf %350, %359 : vector<2x352xf32>
      %c76 = arith.constant 76 : index
      %361 = memref.load %arg2[%c76] : memref<98xf32, #tpu.memory_space<smem>>
      %c0_175 = arith.constant 0 : index
      %c72_176 = arith.constant 72 : index
      %362 = vector.load %arg8[%c0_175, %c72_176] : memref<2x506xf32, #tpu.memory_space<vmem>>, vector<2x352xf32>
      %363 = vector.broadcast %361 : f32 to vector<2x352xf32>
      %364 = arith.mulf %363, %362 : vector<2x352xf32>
      %365 = arith.addf %355, %364 : vector<2x352xf32>
      %c28_177 = arith.constant 28 : index
      %366 = memref.load %arg2[%c28_177] : memref<98xf32, #tpu.memory_space<smem>>
      %c0_178 = arith.constant 0 : index
      %c88 = arith.constant 88 : index
      %367 = vector.load %arg7[%c0_178, %c88] : memref<2x506xf32, #tpu.memory_space<vmem>>, vector<2x352xf32>
      %368 = vector.broadcast %366 : f32 to vector<2x352xf32>
      %369 = arith.mulf %368, %367 : vector<2x352xf32>
      %370 = arith.addf %360, %369 : vector<2x352xf32>
      %c77 = arith.constant 77 : index
      %371 = memref.load %arg2[%c77] : memref<98xf32, #tpu.memory_space<smem>>
      %c0_179 = arith.constant 0 : index
      %c88_180 = arith.constant 88 : index
      %372 = vector.load %arg8[%c0_179, %c88_180] : memref<2x506xf32, #tpu.memory_space<vmem>>, vector<2x352xf32>
      %373 = vector.broadcast %371 : f32 to vector<2x352xf32>
      %374 = arith.mulf %373, %372 : vector<2x352xf32>
      %375 = arith.addf %365, %374 : vector<2x352xf32>
      %c29 = arith.constant 29 : index
      %376 = memref.load %arg2[%c29] : memref<98xf32, #tpu.memory_space<smem>>
      %c0_181 = arith.constant 0 : index
      %c89 = arith.constant 89 : index
      %377 = vector.load %arg7[%c0_181, %c89] : memref<2x506xf32, #tpu.memory_space<vmem>>, vector<2x352xf32>
      %378 = vector.broadcast %376 : f32 to vector<2x352xf32>
      %379 = arith.mulf %378, %377 : vector<2x352xf32>
      %380 = arith.addf %370, %379 : vector<2x352xf32>
      %c78 = arith.constant 78 : index
      %381 = memref.load %arg2[%c78] : memref<98xf32, #tpu.memory_space<smem>>
      %c0_182 = arith.constant 0 : index
      %c89_183 = arith.constant 89 : index
      %382 = vector.load %arg8[%c0_182, %c89_183] : memref<2x506xf32, #tpu.memory_space<vmem>>, vector<2x352xf32>
      %383 = vector.broadcast %381 : f32 to vector<2x352xf32>
      %384 = arith.mulf %383, %382 : vector<2x352xf32>
      %385 = arith.addf %375, %384 : vector<2x352xf32>
      %c30 = arith.constant 30 : index
      %386 = memref.load %arg2[%c30] : memref<98xf32, #tpu.memory_space<smem>>
      %c0_184 = arith.constant 0 : index
      %c90 = arith.constant 90 : index
      %387 = vector.load %arg7[%c0_184, %c90] : memref<2x506xf32, #tpu.memory_space<vmem>>, vector<2x352xf32>
      %388 = vector.broadcast %386 : f32 to vector<2x352xf32>
      %389 = arith.mulf %388, %387 : vector<2x352xf32>
      %390 = arith.addf %380, %389 : vector<2x352xf32>
      %c79 = arith.constant 79 : index
      %391 = memref.load %arg2[%c79] : memref<98xf32, #tpu.memory_space<smem>>
      %c0_185 = arith.constant 0 : index
      %c90_186 = arith.constant 90 : index
      %392 = vector.load %arg8[%c0_185, %c90_186] : memref<2x506xf32, #tpu.memory_space<vmem>>, vector<2x352xf32>
      %393 = vector.broadcast %391 : f32 to vector<2x352xf32>
      %394 = arith.mulf %393, %392 : vector<2x352xf32>
      %395 = arith.addf %385, %394 : vector<2x352xf32>
      %c31 = arith.constant 31 : index
      %396 = memref.load %arg2[%c31] : memref<98xf32, #tpu.memory_space<smem>>
      %c0_187 = arith.constant 0 : index
      %c91_188 = arith.constant 91 : index
      %397 = vector.load %arg7[%c0_187, %c91_188] : memref<2x506xf32, #tpu.memory_space<vmem>>, vector<2x352xf32>
      %398 = vector.broadcast %396 : f32 to vector<2x352xf32>
      %399 = arith.mulf %398, %397 : vector<2x352xf32>
      %400 = arith.addf %390, %399 : vector<2x352xf32>
      %c80 = arith.constant 80 : index
      %401 = memref.load %arg2[%c80] : memref<98xf32, #tpu.memory_space<smem>>
      %c0_189 = arith.constant 0 : index
      %c91_190 = arith.constant 91 : index
      %402 = vector.load %arg8[%c0_189, %c91_190] : memref<2x506xf32, #tpu.memory_space<vmem>>, vector<2x352xf32>
      %403 = vector.broadcast %401 : f32 to vector<2x352xf32>
      %404 = arith.mulf %403, %402 : vector<2x352xf32>
      %405 = arith.addf %395, %404 : vector<2x352xf32>
      %c32 = arith.constant 32 : index
      %406 = memref.load %arg2[%c32] : memref<98xf32, #tpu.memory_space<smem>>
      %c0_191 = arith.constant 0 : index
      %c92 = arith.constant 92 : index
      %407 = vector.load %arg7[%c0_191, %c92] : memref<2x506xf32, #tpu.memory_space<vmem>>, vector<2x352xf32>
      %408 = vector.broadcast %406 : f32 to vector<2x352xf32>
      %409 = arith.mulf %408, %407 : vector<2x352xf32>
      %410 = arith.addf %400, %409 : vector<2x352xf32>
      %c81 = arith.constant 81 : index
      %411 = memref.load %arg2[%c81] : memref<98xf32, #tpu.memory_space<smem>>
      %c0_192 = arith.constant 0 : index
      %c92_193 = arith.constant 92 : index
      %412 = vector.load %arg8[%c0_192, %c92_193] : memref<2x506xf32, #tpu.memory_space<vmem>>, vector<2x352xf32>
      %413 = vector.broadcast %411 : f32 to vector<2x352xf32>
      %414 = arith.mulf %413, %412 : vector<2x352xf32>
      %415 = arith.addf %405, %414 : vector<2x352xf32>
      %c33 = arith.constant 33 : index
      %416 = memref.load %arg2[%c33] : memref<98xf32, #tpu.memory_space<smem>>
      %c0_194 = arith.constant 0 : index
      %c93 = arith.constant 93 : index
      %417 = vector.load %arg7[%c0_194, %c93] : memref<2x506xf32, #tpu.memory_space<vmem>>, vector<2x352xf32>
      %418 = vector.broadcast %416 : f32 to vector<2x352xf32>
      %419 = arith.mulf %418, %417 : vector<2x352xf32>
      %420 = arith.addf %410, %419 : vector<2x352xf32>
      %c82 = arith.constant 82 : index
      %421 = memref.load %arg2[%c82] : memref<98xf32, #tpu.memory_space<smem>>
      %c0_195 = arith.constant 0 : index
      %c93_196 = arith.constant 93 : index
      %422 = vector.load %arg8[%c0_195, %c93_196] : memref<2x506xf32, #tpu.memory_space<vmem>>, vector<2x352xf32>
      %423 = vector.broadcast %421 : f32 to vector<2x352xf32>
      %424 = arith.mulf %423, %422 : vector<2x352xf32>
      %425 = arith.addf %415, %424 : vector<2x352xf32>
      %c34 = arith.constant 34 : index
      %426 = memref.load %arg2[%c34] : memref<98xf32, #tpu.memory_space<smem>>
      %c0_197 = arith.constant 0 : index
      %c94 = arith.constant 94 : index
      %427 = vector.load %arg7[%c0_197, %c94] : memref<2x506xf32, #tpu.memory_space<vmem>>, vector<2x352xf32>
      %428 = vector.broadcast %426 : f32 to vector<2x352xf32>
      %429 = arith.mulf %428, %427 : vector<2x352xf32>
      %430 = arith.addf %420, %429 : vector<2x352xf32>
      %c83 = arith.constant 83 : index
      %431 = memref.load %arg2[%c83] : memref<98xf32, #tpu.memory_space<smem>>
      %c0_198 = arith.constant 0 : index
      %c94_199 = arith.constant 94 : index
      %432 = vector.load %arg8[%c0_198, %c94_199] : memref<2x506xf32, #tpu.memory_space<vmem>>, vector<2x352xf32>
      %433 = vector.broadcast %431 : f32 to vector<2x352xf32>
      %434 = arith.mulf %433, %432 : vector<2x352xf32>
      %435 = arith.addf %425, %434 : vector<2x352xf32>
      %c35 = arith.constant 35 : index
      %436 = memref.load %arg2[%c35] : memref<98xf32, #tpu.memory_space<smem>>
      %c0_200 = arith.constant 0 : index
      %c110 = arith.constant 110 : index
      %437 = vector.load %arg7[%c0_200, %c110] : memref<2x506xf32, #tpu.memory_space<vmem>>, vector<2x352xf32>
      %438 = vector.broadcast %436 : f32 to vector<2x352xf32>
      %439 = arith.mulf %438, %437 : vector<2x352xf32>
      %440 = arith.addf %430, %439 : vector<2x352xf32>
      %c84 = arith.constant 84 : index
      %441 = memref.load %arg2[%c84] : memref<98xf32, #tpu.memory_space<smem>>
      %c0_201 = arith.constant 0 : index
      %c110_202 = arith.constant 110 : index
      %442 = vector.load %arg8[%c0_201, %c110_202] : memref<2x506xf32, #tpu.memory_space<vmem>>, vector<2x352xf32>
      %443 = vector.broadcast %441 : f32 to vector<2x352xf32>
      %444 = arith.mulf %443, %442 : vector<2x352xf32>
      %445 = arith.addf %435, %444 : vector<2x352xf32>
      %c36 = arith.constant 36 : index
      %446 = memref.load %arg2[%c36] : memref<98xf32, #tpu.memory_space<smem>>
      %c0_203 = arith.constant 0 : index
      %c111 = arith.constant 111 : index
      %447 = vector.load %arg7[%c0_203, %c111] : memref<2x506xf32, #tpu.memory_space<vmem>>, vector<2x352xf32>
      %448 = vector.broadcast %446 : f32 to vector<2x352xf32>
      %449 = arith.mulf %448, %447 : vector<2x352xf32>
      %450 = arith.addf %440, %449 : vector<2x352xf32>
      %c85 = arith.constant 85 : index
      %451 = memref.load %arg2[%c85] : memref<98xf32, #tpu.memory_space<smem>>
      %c0_204 = arith.constant 0 : index
      %c111_205 = arith.constant 111 : index
      %452 = vector.load %arg8[%c0_204, %c111_205] : memref<2x506xf32, #tpu.memory_space<vmem>>, vector<2x352xf32>
      %453 = vector.broadcast %451 : f32 to vector<2x352xf32>
      %454 = arith.mulf %453, %452 : vector<2x352xf32>
      %455 = arith.addf %445, %454 : vector<2x352xf32>
      %c37 = arith.constant 37 : index
      %456 = memref.load %arg2[%c37] : memref<98xf32, #tpu.memory_space<smem>>
      %c0_206 = arith.constant 0 : index
      %c112 = arith.constant 112 : index
      %457 = vector.load %arg7[%c0_206, %c112] : memref<2x506xf32, #tpu.memory_space<vmem>>, vector<2x352xf32>
      %458 = vector.broadcast %456 : f32 to vector<2x352xf32>
      %459 = arith.mulf %458, %457 : vector<2x352xf32>
      %460 = arith.addf %450, %459 : vector<2x352xf32>
      %c86 = arith.constant 86 : index
      %461 = memref.load %arg2[%c86] : memref<98xf32, #tpu.memory_space<smem>>
      %c0_207 = arith.constant 0 : index
      %c112_208 = arith.constant 112 : index
      %462 = vector.load %arg8[%c0_207, %c112_208] : memref<2x506xf32, #tpu.memory_space<vmem>>, vector<2x352xf32>
      %463 = vector.broadcast %461 : f32 to vector<2x352xf32>
      %464 = arith.mulf %463, %462 : vector<2x352xf32>
      %465 = arith.addf %455, %464 : vector<2x352xf32>
      %c38 = arith.constant 38 : index
      %466 = memref.load %arg2[%c38] : memref<98xf32, #tpu.memory_space<smem>>
      %c0_209 = arith.constant 0 : index
      %c113_210 = arith.constant 113 : index
      %467 = vector.load %arg7[%c0_209, %c113_210] : memref<2x506xf32, #tpu.memory_space<vmem>>, vector<2x352xf32>
      %468 = vector.broadcast %466 : f32 to vector<2x352xf32>
      %469 = arith.mulf %468, %467 : vector<2x352xf32>
      %470 = arith.addf %460, %469 : vector<2x352xf32>
      %c87 = arith.constant 87 : index
      %471 = memref.load %arg2[%c87] : memref<98xf32, #tpu.memory_space<smem>>
      %c0_211 = arith.constant 0 : index
      %c113_212 = arith.constant 113 : index
      %472 = vector.load %arg8[%c0_211, %c113_212] : memref<2x506xf32, #tpu.memory_space<vmem>>, vector<2x352xf32>
      %473 = vector.broadcast %471 : f32 to vector<2x352xf32>
      %474 = arith.mulf %473, %472 : vector<2x352xf32>
      %475 = arith.addf %465, %474 : vector<2x352xf32>
      %c39 = arith.constant 39 : index
      %476 = memref.load %arg2[%c39] : memref<98xf32, #tpu.memory_space<smem>>
      %c0_213 = arith.constant 0 : index
      %c114 = arith.constant 114 : index
      %477 = vector.load %arg7[%c0_213, %c114] : memref<2x506xf32, #tpu.memory_space<vmem>>, vector<2x352xf32>
      %478 = vector.broadcast %476 : f32 to vector<2x352xf32>
      %479 = arith.mulf %478, %477 : vector<2x352xf32>
      %480 = arith.addf %470, %479 : vector<2x352xf32>
      %c88_214 = arith.constant 88 : index
      %481 = memref.load %arg2[%c88_214] : memref<98xf32, #tpu.memory_space<smem>>
      %c0_215 = arith.constant 0 : index
      %c114_216 = arith.constant 114 : index
      %482 = vector.load %arg8[%c0_215, %c114_216] : memref<2x506xf32, #tpu.memory_space<vmem>>, vector<2x352xf32>
      %483 = vector.broadcast %481 : f32 to vector<2x352xf32>
      %484 = arith.mulf %483, %482 : vector<2x352xf32>
      %485 = arith.addf %475, %484 : vector<2x352xf32>
      %c40 = arith.constant 40 : index
      %486 = memref.load %arg2[%c40] : memref<98xf32, #tpu.memory_space<smem>>
      %c0_217 = arith.constant 0 : index
      %c115 = arith.constant 115 : index
      %487 = vector.load %arg7[%c0_217, %c115] : memref<2x506xf32, #tpu.memory_space<vmem>>, vector<2x352xf32>
      %488 = vector.broadcast %486 : f32 to vector<2x352xf32>
      %489 = arith.mulf %488, %487 : vector<2x352xf32>
      %490 = arith.addf %480, %489 : vector<2x352xf32>
      %c89_218 = arith.constant 89 : index
      %491 = memref.load %arg2[%c89_218] : memref<98xf32, #tpu.memory_space<smem>>
      %c0_219 = arith.constant 0 : index
      %c115_220 = arith.constant 115 : index
      %492 = vector.load %arg8[%c0_219, %c115_220] : memref<2x506xf32, #tpu.memory_space<vmem>>, vector<2x352xf32>
      %493 = vector.broadcast %491 : f32 to vector<2x352xf32>
      %494 = arith.mulf %493, %492 : vector<2x352xf32>
      %495 = arith.addf %485, %494 : vector<2x352xf32>
      %c41 = arith.constant 41 : index
      %496 = memref.load %arg2[%c41] : memref<98xf32, #tpu.memory_space<smem>>
      %c0_221 = arith.constant 0 : index
      %c116 = arith.constant 116 : index
      %497 = vector.load %arg7[%c0_221, %c116] : memref<2x506xf32, #tpu.memory_space<vmem>>, vector<2x352xf32>
      %498 = vector.broadcast %496 : f32 to vector<2x352xf32>
      %499 = arith.mulf %498, %497 : vector<2x352xf32>
      %500 = arith.addf %490, %499 : vector<2x352xf32>
      %c90_222 = arith.constant 90 : index
      %501 = memref.load %arg2[%c90_222] : memref<98xf32, #tpu.memory_space<smem>>
      %c0_223 = arith.constant 0 : index
      %c116_224 = arith.constant 116 : index
      %502 = vector.load %arg8[%c0_223, %c116_224] : memref<2x506xf32, #tpu.memory_space<vmem>>, vector<2x352xf32>
      %503 = vector.broadcast %501 : f32 to vector<2x352xf32>
      %504 = arith.mulf %503, %502 : vector<2x352xf32>
      %505 = arith.addf %495, %504 : vector<2x352xf32>
      %c42 = arith.constant 42 : index
      %506 = memref.load %arg2[%c42] : memref<98xf32, #tpu.memory_space<smem>>
      %c0_225 = arith.constant 0 : index
      %c132 = arith.constant 132 : index
      %507 = vector.load %arg7[%c0_225, %c132] : memref<2x506xf32, #tpu.memory_space<vmem>>, vector<2x352xf32>
      %508 = vector.broadcast %506 : f32 to vector<2x352xf32>
      %509 = arith.mulf %508, %507 : vector<2x352xf32>
      %510 = arith.addf %500, %509 : vector<2x352xf32>
      %c91_226 = arith.constant 91 : index
      %511 = memref.load %arg2[%c91_226] : memref<98xf32, #tpu.memory_space<smem>>
      %c0_227 = arith.constant 0 : index
      %c132_228 = arith.constant 132 : index
      %512 = vector.load %arg8[%c0_227, %c132_228] : memref<2x506xf32, #tpu.memory_space<vmem>>, vector<2x352xf32>
      %513 = vector.broadcast %511 : f32 to vector<2x352xf32>
      %514 = arith.mulf %513, %512 : vector<2x352xf32>
      %515 = arith.addf %505, %514 : vector<2x352xf32>
      %c43 = arith.constant 43 : index
      %516 = memref.load %arg2[%c43] : memref<98xf32, #tpu.memory_space<smem>>
      %c0_229 = arith.constant 0 : index
      %c133 = arith.constant 133 : index
      %517 = vector.load %arg7[%c0_229, %c133] : memref<2x506xf32, #tpu.memory_space<vmem>>, vector<2x352xf32>
      %518 = vector.broadcast %516 : f32 to vector<2x352xf32>
      %519 = arith.mulf %518, %517 : vector<2x352xf32>
      %520 = arith.addf %510, %519 : vector<2x352xf32>
      %c92_230 = arith.constant 92 : index
      %521 = memref.load %arg2[%c92_230] : memref<98xf32, #tpu.memory_space<smem>>
      %c0_231 = arith.constant 0 : index
      %c133_232 = arith.constant 133 : index
      %522 = vector.load %arg8[%c0_231, %c133_232] : memref<2x506xf32, #tpu.memory_space<vmem>>, vector<2x352xf32>
      %523 = vector.broadcast %521 : f32 to vector<2x352xf32>
      %524 = arith.mulf %523, %522 : vector<2x352xf32>
      %525 = arith.addf %515, %524 : vector<2x352xf32>
      %c44_233 = arith.constant 44 : index
      %526 = memref.load %arg2[%c44_233] : memref<98xf32, #tpu.memory_space<smem>>
      %c0_234 = arith.constant 0 : index
      %c134 = arith.constant 134 : index
      %527 = vector.load %arg7[%c0_234, %c134] : memref<2x506xf32, #tpu.memory_space<vmem>>, vector<2x352xf32>
      %528 = vector.broadcast %526 : f32 to vector<2x352xf32>
      %529 = arith.mulf %528, %527 : vector<2x352xf32>
      %530 = arith.addf %520, %529 : vector<2x352xf32>
      %c93_235 = arith.constant 93 : index
      %531 = memref.load %arg2[%c93_235] : memref<98xf32, #tpu.memory_space<smem>>
      %c0_236 = arith.constant 0 : index
      %c134_237 = arith.constant 134 : index
      %532 = vector.load %arg8[%c0_236, %c134_237] : memref<2x506xf32, #tpu.memory_space<vmem>>, vector<2x352xf32>
      %533 = vector.broadcast %531 : f32 to vector<2x352xf32>
      %534 = arith.mulf %533, %532 : vector<2x352xf32>
      %535 = arith.addf %525, %534 : vector<2x352xf32>
      %c45_238 = arith.constant 45 : index
      %536 = memref.load %arg2[%c45_238] : memref<98xf32, #tpu.memory_space<smem>>
      %c0_239 = arith.constant 0 : index
      %c135_240 = arith.constant 135 : index
      %537 = vector.load %arg7[%c0_239, %c135_240] : memref<2x506xf32, #tpu.memory_space<vmem>>, vector<2x352xf32>
      %538 = vector.broadcast %536 : f32 to vector<2x352xf32>
      %539 = arith.mulf %538, %537 : vector<2x352xf32>
      %540 = arith.addf %530, %539 : vector<2x352xf32>
      %c94_241 = arith.constant 94 : index
      %541 = memref.load %arg2[%c94_241] : memref<98xf32, #tpu.memory_space<smem>>
      %c0_242 = arith.constant 0 : index
      %c135_243 = arith.constant 135 : index
      %542 = vector.load %arg8[%c0_242, %c135_243] : memref<2x506xf32, #tpu.memory_space<vmem>>, vector<2x352xf32>
      %543 = vector.broadcast %541 : f32 to vector<2x352xf32>
      %544 = arith.mulf %543, %542 : vector<2x352xf32>
      %545 = arith.addf %535, %544 : vector<2x352xf32>
      %c46_244 = arith.constant 46 : index
      %546 = memref.load %arg2[%c46_244] : memref<98xf32, #tpu.memory_space<smem>>
      %c0_245 = arith.constant 0 : index
      %c136 = arith.constant 136 : index
      %547 = vector.load %arg7[%c0_245, %c136] : memref<2x506xf32, #tpu.memory_space<vmem>>, vector<2x352xf32>
      %548 = vector.broadcast %546 : f32 to vector<2x352xf32>
      %549 = arith.mulf %548, %547 : vector<2x352xf32>
      %550 = arith.addf %540, %549 : vector<2x352xf32>
      %c95 = arith.constant 95 : index
      %551 = memref.load %arg2[%c95] : memref<98xf32, #tpu.memory_space<smem>>
      %c0_246 = arith.constant 0 : index
      %c136_247 = arith.constant 136 : index
      %552 = vector.load %arg8[%c0_246, %c136_247] : memref<2x506xf32, #tpu.memory_space<vmem>>, vector<2x352xf32>
      %553 = vector.broadcast %551 : f32 to vector<2x352xf32>
      %554 = arith.mulf %553, %552 : vector<2x352xf32>
      %555 = arith.addf %545, %554 : vector<2x352xf32>
      %c47_248 = arith.constant 47 : index
      %556 = memref.load %arg2[%c47_248] : memref<98xf32, #tpu.memory_space<smem>>
      %c0_249 = arith.constant 0 : index
      %c137 = arith.constant 137 : index
      %557 = vector.load %arg7[%c0_249, %c137] : memref<2x506xf32, #tpu.memory_space<vmem>>, vector<2x352xf32>
      %558 = vector.broadcast %556 : f32 to vector<2x352xf32>
      %559 = arith.mulf %558, %557 : vector<2x352xf32>
      %560 = arith.addf %550, %559 : vector<2x352xf32>
      %c96 = arith.constant 96 : index
      %561 = memref.load %arg2[%c96] : memref<98xf32, #tpu.memory_space<smem>>
      %c0_250 = arith.constant 0 : index
      %c137_251 = arith.constant 137 : index
      %562 = vector.load %arg8[%c0_250, %c137_251] : memref<2x506xf32, #tpu.memory_space<vmem>>, vector<2x352xf32>
      %563 = vector.broadcast %561 : f32 to vector<2x352xf32>
      %564 = arith.mulf %563, %562 : vector<2x352xf32>
      %565 = arith.addf %555, %564 : vector<2x352xf32>
      %c48_252 = arith.constant 48 : index
      %566 = memref.load %arg2[%c48_252] : memref<98xf32, #tpu.memory_space<smem>>
      %c0_253 = arith.constant 0 : index
      %c138 = arith.constant 138 : index
      %567 = vector.load %arg7[%c0_253, %c138] : memref<2x506xf32, #tpu.memory_space<vmem>>, vector<2x352xf32>
      %568 = vector.broadcast %566 : f32 to vector<2x352xf32>
      %569 = arith.mulf %568, %567 : vector<2x352xf32>
      %570 = arith.addf %560, %569 : vector<2x352xf32>
      %c97 = arith.constant 97 : index
      %571 = memref.load %arg2[%c97] : memref<98xf32, #tpu.memory_space<smem>>
      %c0_254 = arith.constant 0 : index
      %c138_255 = arith.constant 138 : index
      %572 = vector.load %arg8[%c0_254, %c138_255] : memref<2x506xf32, #tpu.memory_space<vmem>>, vector<2x352xf32>
      %573 = vector.broadcast %571 : f32 to vector<2x352xf32>
      %574 = arith.mulf %573, %572 : vector<2x352xf32>
      %575 = arith.addf %565, %574 : vector<2x352xf32>
      %576 = arith.addf %570, %575 : vector<2x352xf32>
      %577 = arith.negf %576 : vector<2x352xf32>
      %578 = math.exp %577 : vector<2x352xf32>
      %cst_256 = arith.constant 1.000000e+00 : f32
      %579 = vector.broadcast %cst_256 : f32 to vector<2x352xf32>
      %580 = arith.addf %579, %578 : vector<2x352xf32>
      %581 = arith.divf %579, %580 : vector<2x352xf32>
      %582 = arith.mulf %576, %581 : vector<2x352xf32>
      %583 = vector.extract_strided_slice %582 {offsets = [0, 0], sizes = [2, 16], strides = [1, 1]} : vector<2x352xf32> to vector<2x16xf32>
      %c0_257 = arith.constant 0 : index
      %c0_258 = arith.constant 0 : index
      %c0_259 = arith.constant 0 : index
      %584 = vector.load %arg4[%c0_257, %c0_258, %c0_259] : memref<2x1x256xf32, #tpu.memory_space<vmem>>, vector<2x1x16xf32>
      %585 = vector.shape_cast %584 : vector<2x1x16xf32> to vector<2x16xf32>
      %586 = vector.shape_cast %583 : vector<2x16xf32> to vector<2x1x16xf32>
      tpu.vector_store %arg4[%c0_257, %c0_258, %c0_259], %586 {strides = array<i32>} : memref<2x1x256xf32, #tpu.memory_space<vmem>>, vector<2x1x16xf32>,
      %587 = vector.extract_strided_slice %582 {offsets = [0, 22], sizes = [2, 16], strides = [1, 1]} : vector<2x352xf32> to vector<2x16xf32>
      %c0_260 = arith.constant 0 : index
      %c0_261 = arith.constant 0 : index
      %c16_262 = arith.constant 16 : index
      %588 = vector.load %arg4[%c0_260, %c0_261, %c16_262] : memref<2x1x256xf32, #tpu.memory_space<vmem>>, vector<2x1x16xf32>
      %589 = vector.shape_cast %588 : vector<2x1x16xf32> to vector<2x16xf32>
      %590 = vector.shape_cast %587 : vector<2x16xf32> to vector<2x1x16xf32>
      tpu.vector_store %arg4[%c0_260, %c0_261, %c16_262], %590 {strides = array<i32>} : memref<2x1x256xf32, #tpu.memory_space<vmem>>, vector<2x1x16xf32>,
      %591 = vector.extract_strided_slice %582 {offsets = [0, 44], sizes = [2, 16], strides = [1, 1]} : vector<2x352xf32> to vector<2x16xf32>
      %c0_263 = arith.constant 0 : index
      %c0_264 = arith.constant 0 : index
      %c32_265 = arith.constant 32 : index
      %592 = vector.load %arg4[%c0_263, %c0_264, %c32_265] : memref<2x1x256xf32, #tpu.memory_space<vmem>>, vector<2x1x16xf32>
      %593 = vector.shape_cast %592 : vector<2x1x16xf32> to vector<2x16xf32>
      %594 = vector.shape_cast %591 : vector<2x16xf32> to vector<2x1x16xf32>
      tpu.vector_store %arg4[%c0_263, %c0_264, %c32_265], %594 {strides = array<i32>} : memref<2x1x256xf32, #tpu.memory_space<vmem>>, vector<2x1x16xf32>,
      %595 = vector.extract_strided_slice %582 {offsets = [0, 66], sizes = [2, 16], strides = [1, 1]} : vector<2x352xf32> to vector<2x16xf32>
      %c0_266 = arith.constant 0 : index
      %c0_267 = arith.constant 0 : index
      %c48_268 = arith.constant 48 : index
      %596 = vector.load %arg4[%c0_266, %c0_267, %c48_268] : memref<2x1x256xf32, #tpu.memory_space<vmem>>, vector<2x1x16xf32>
      %597 = vector.shape_cast %596 : vector<2x1x16xf32> to vector<2x16xf32>
      %598 = vector.shape_cast %595 : vector<2x16xf32> to vector<2x1x16xf32>
      tpu.vector_store %arg4[%c0_266, %c0_267, %c48_268], %598 {strides = array<i32>} : memref<2x1x256xf32, #tpu.memory_space<vmem>>, vector<2x1x16xf32>,
      %599 = vector.extract_strided_slice %582 {offsets = [0, 88], sizes = [2, 16], strides = [1, 1]} : vector<2x352xf32> to vector<2x16xf32>
      %c0_269 = arith.constant 0 : index
      %c0_270 = arith.constant 0 : index
      %c64_271 = arith.constant 64 : index
      %600 = vector.load %arg4[%c0_269, %c0_270, %c64_271] : memref<2x1x256xf32, #tpu.memory_space<vmem>>, vector<2x1x16xf32>
      %601 = vector.shape_cast %600 : vector<2x1x16xf32> to vector<2x16xf32>
      %602 = vector.shape_cast %599 : vector<2x16xf32> to vector<2x1x16xf32>
      tpu.vector_store %arg4[%c0_269, %c0_270, %c64_271], %602 {strides = array<i32>} : memref<2x1x256xf32, #tpu.memory_space<vmem>>, vector<2x1x16xf32>,
      %603 = vector.extract_strided_slice %582 {offsets = [0, 110], sizes = [2, 16], strides = [1, 1]} : vector<2x352xf32> to vector<2x16xf32>
      %c0_272 = arith.constant 0 : index
      %c0_273 = arith.constant 0 : index
      %c80_274 = arith.constant 80 : index
      %604 = vector.load %arg4[%c0_272, %c0_273, %c80_274] : memref<2x1x256xf32, #tpu.memory_space<vmem>>, vector<2x1x16xf32>
      %605 = vector.shape_cast %604 : vector<2x1x16xf32> to vector<2x16xf32>
      %606 = vector.shape_cast %603 : vector<2x16xf32> to vector<2x1x16xf32>
      tpu.vector_store %arg4[%c0_272, %c0_273, %c80_274], %606 {strides = array<i32>} : memref<2x1x256xf32, #tpu.memory_space<vmem>>, vector<2x1x16xf32>,
      %607 = vector.extract_strided_slice %582 {offsets = [0, 132], sizes = [2, 16], strides = [1, 1]} : vector<2x352xf32> to vector<2x16xf32>
      %c0_275 = arith.constant 0 : index
      %c0_276 = arith.constant 0 : index
      %c96_277 = arith.constant 96 : index
      %608 = vector.load %arg4[%c0_275, %c0_276, %c96_277] : memref<2x1x256xf32, #tpu.memory_space<vmem>>, vector<2x1x16xf32>
      %609 = vector.shape_cast %608 : vector<2x1x16xf32> to vector<2x16xf32>
      %610 = vector.shape_cast %607 : vector<2x16xf32> to vector<2x1x16xf32>
      tpu.vector_store %arg4[%c0_275, %c0_276, %c96_277], %610 {strides = array<i32>} : memref<2x1x256xf32, #tpu.memory_space<vmem>>, vector<2x1x16xf32>,
      %611 = vector.extract_strided_slice %582 {offsets = [0, 154], sizes = [2, 16], strides = [1, 1]} : vector<2x352xf32> to vector<2x16xf32>
      %c0_278 = arith.constant 0 : index
      %c0_279 = arith.constant 0 : index
      %c112_280 = arith.constant 112 : index
      %612 = vector.load %arg4[%c0_278, %c0_279, %c112_280] : memref<2x1x256xf32, #tpu.memory_space<vmem>>, vector<2x1x16xf32>
      %613 = vector.shape_cast %612 : vector<2x1x16xf32> to vector<2x16xf32>
      %614 = vector.shape_cast %611 : vector<2x16xf32> to vector<2x1x16xf32>
      tpu.vector_store %arg4[%c0_278, %c0_279, %c112_280], %614 {strides = array<i32>} : memref<2x1x256xf32, #tpu.memory_space<vmem>>, vector<2x1x16xf32>,
      %615 = vector.extract_strided_slice %582 {offsets = [0, 176], sizes = [2, 16], strides = [1, 1]} : vector<2x352xf32> to vector<2x16xf32>
      %c0_281 = arith.constant 0 : index
      %c0_282 = arith.constant 0 : index
      %c128 = arith.constant 128 : index
      %616 = vector.load %arg4[%c0_281, %c0_282, %c128] : memref<2x1x256xf32, #tpu.memory_space<vmem>>, vector<2x1x16xf32>
      %617 = vector.shape_cast %616 : vector<2x1x16xf32> to vector<2x16xf32>
      %618 = vector.shape_cast %615 : vector<2x16xf32> to vector<2x1x16xf32>
      tpu.vector_store %arg4[%c0_281, %c0_282, %c128], %618 {strides = array<i32>} : memref<2x1x256xf32, #tpu.memory_space<vmem>>, vector<2x1x16xf32>,
      %619 = vector.extract_strided_slice %582 {offsets = [0, 198], sizes = [2, 16], strides = [1, 1]} : vector<2x352xf32> to vector<2x16xf32>
      %c0_283 = arith.constant 0 : index
      %c0_284 = arith.constant 0 : index
      %c144 = arith.constant 144 : index
      %620 = vector.load %arg4[%c0_283, %c0_284, %c144] : memref<2x1x256xf32, #tpu.memory_space<vmem>>, vector<2x1x16xf32>
      %621 = vector.shape_cast %620 : vector<2x1x16xf32> to vector<2x16xf32>
      %622 = vector.shape_cast %619 : vector<2x16xf32> to vector<2x1x16xf32>
      tpu.vector_store %arg4[%c0_283, %c0_284, %c144], %622 {strides = array<i32>} : memref<2x1x256xf32, #tpu.memory_space<vmem>>, vector<2x1x16xf32>,
      %623 = vector.extract_strided_slice %582 {offsets = [0, 220], sizes = [2, 16], strides = [1, 1]} : vector<2x352xf32> to vector<2x16xf32>
      %c0_285 = arith.constant 0 : index
      %c0_286 = arith.constant 0 : index
      %c160 = arith.constant 160 : index
      %624 = vector.load %arg4[%c0_285, %c0_286, %c160] : memref<2x1x256xf32, #tpu.memory_space<vmem>>, vector<2x1x16xf32>
      %625 = vector.shape_cast %624 : vector<2x1x16xf32> to vector<2x16xf32>
      %626 = vector.shape_cast %623 : vector<2x16xf32> to vector<2x1x16xf32>
      tpu.vector_store %arg4[%c0_285, %c0_286, %c160], %626 {strides = array<i32>} : memref<2x1x256xf32, #tpu.memory_space<vmem>>, vector<2x1x16xf32>,
      %627 = vector.extract_strided_slice %582 {offsets = [0, 242], sizes = [2, 16], strides = [1, 1]} : vector<2x352xf32> to vector<2x16xf32>
      %c0_287 = arith.constant 0 : index
      %c0_288 = arith.constant 0 : index
      %c176 = arith.constant 176 : index
      %628 = vector.load %arg4[%c0_287, %c0_288, %c176] : memref<2x1x256xf32, #tpu.memory_space<vmem>>, vector<2x1x16xf32>
      %629 = vector.shape_cast %628 : vector<2x1x16xf32> to vector<2x16xf32>
      %630 = vector.shape_cast %627 : vector<2x16xf32> to vector<2x1x16xf32>
      tpu.vector_store %arg4[%c0_287, %c0_288, %c176], %630 {strides = array<i32>} : memref<2x1x256xf32, #tpu.memory_space<vmem>>, vector<2x1x16xf32>,
      %631 = vector.extract_strided_slice %582 {offsets = [0, 264], sizes = [2, 16], strides = [1, 1]} : vector<2x352xf32> to vector<2x16xf32>
      %c0_289 = arith.constant 0 : index
      %c0_290 = arith.constant 0 : index
      %c192 = arith.constant 192 : index
      %632 = vector.load %arg4[%c0_289, %c0_290, %c192] : memref<2x1x256xf32, #tpu.memory_space<vmem>>, vector<2x1x16xf32>
      %633 = vector.shape_cast %632 : vector<2x1x16xf32> to vector<2x16xf32>
      %634 = vector.shape_cast %631 : vector<2x16xf32> to vector<2x1x16xf32>
      tpu.vector_store %arg4[%c0_289, %c0_290, %c192], %634 {strides = array<i32>} : memref<2x1x256xf32, #tpu.memory_space<vmem>>, vector<2x1x16xf32>,
      %635 = vector.extract_strided_slice %582 {offsets = [0, 286], sizes = [2, 16], strides = [1, 1]} : vector<2x352xf32> to vector<2x16xf32>
      %c0_291 = arith.constant 0 : index
      %c0_292 = arith.constant 0 : index
      %c208 = arith.constant 208 : index
      %636 = vector.load %arg4[%c0_291, %c0_292, %c208] : memref<2x1x256xf32, #tpu.memory_space<vmem>>, vector<2x1x16xf32>
      %637 = vector.shape_cast %636 : vector<2x1x16xf32> to vector<2x16xf32>
      %638 = vector.shape_cast %635 : vector<2x16xf32> to vector<2x1x16xf32>
      tpu.vector_store %arg4[%c0_291, %c0_292, %c208], %638 {strides = array<i32>} : memref<2x1x256xf32, #tpu.memory_space<vmem>>, vector<2x1x16xf32>,
      %639 = vector.extract_strided_slice %582 {offsets = [0, 308], sizes = [2, 16], strides = [1, 1]} : vector<2x352xf32> to vector<2x16xf32>
      %c0_293 = arith.constant 0 : index
      %c0_294 = arith.constant 0 : index
      %c224 = arith.constant 224 : index
      %640 = vector.load %arg4[%c0_293, %c0_294, %c224] : memref<2x1x256xf32, #tpu.memory_space<vmem>>, vector<2x1x16xf32>
      %641 = vector.shape_cast %640 : vector<2x1x16xf32> to vector<2x16xf32>
      %642 = vector.shape_cast %639 : vector<2x16xf32> to vector<2x1x16xf32>
      tpu.vector_store %arg4[%c0_293, %c0_294, %c224], %642 {strides = array<i32>} : memref<2x1x256xf32, #tpu.memory_space<vmem>>, vector<2x1x16xf32>,
      %643 = vector.extract_strided_slice %582 {offsets = [0, 330], sizes = [2, 16], strides = [1, 1]} : vector<2x352xf32> to vector<2x16xf32>
      %c0_295 = arith.constant 0 : index
      %c0_296 = arith.constant 0 : index
      %c240 = arith.constant 240 : index
      %644 = vector.load %arg4[%c0_295, %c0_296, %c240] : memref<2x1x256xf32, #tpu.memory_space<vmem>>, vector<2x1x16xf32>
      %645 = vector.shape_cast %644 : vector<2x1x16xf32> to vector<2x16xf32>
      %646 = vector.shape_cast %643 : vector<2x16xf32> to vector<2x1x16xf32>
      tpu.vector_store %arg4[%c0_295, %c0_296, %c240], %646 {strides = array<i32>} : memref<2x1x256xf32, #tpu.memory_space<vmem>>, vector<2x1x16xf32>,
    } else {
    }
    return
  }
  func.func @transform_0(%arg0: i32, %arg1: i32) -> i32 {
    %c0_i32 = arith.constant 0 : i32
    %c0_i32_0 = arith.constant 0 : i32
    return %c0_i32 : i32
  }
  func.func @transform_1(%arg0: i32, %arg1: i32) -> (i32, i32, i32) {
    %c0_i32 = arith.constant 0 : i32
    %c0_i32_0 = arith.constant 0 : i32
    return %arg0, %arg1, %c0_i32 : i32, i32, i32
  }
  func.func @transform_2(%arg0: i32, %arg1: i32) -> (i32, i32, i32) {
    %c0_i32 = arith.constant 0 : i32
    %c0_i32_0 = arith.constant 0 : i32
    %c0_i32_1 = arith.constant 0 : i32
    return %arg0, %c0_i32, %c0_i32_0 : i32, i32, i32
  }
}

</mosaic_0001>

<bundles_post_ra>
// kernel: tpu_custom_call.1
= control target key start
LH: loop header
LB: loop body
LE: loop exit
PB: predicated region body
PF: predicated region fallthrough
CT: control target
= control target key end

     0   :  { %7 = vsyncpa [#allocation9], 0  ;;  %s2768_s0 = inlined_call_operand.hbm [shape: f32[98], index: 0, kind: input, shape index: {}]   ;;  %s2769_s1 = inlined_call_operand.hbm [shape: f32[2,4,256], index: 1, kind: input, shape index: {}]   ;;  %s2770_s2 = inlined_call_operand.hbm [shape: f32[2,1,256], index: 2, kind: output, shape index: {}]  }
   0x1   :  { %8 = vsyncpa [#allocation7], 0 }
   0x2   :  { %9 = vsyncpa [#allocation8], 0  ;;  %s15_s11 = sshll.u32 %s2768_s0, 4  ;;  %s23_s14 = sshll.u32 %s2769_s1, 4  ;;  %s16_s11 = int_to_ptr.hbm [resolvable:$true] %s15_s11  ;;  %s24_s14 = int_to_ptr.hbm [resolvable:$true] %s23_s14 }
   0x3   :  { %s1945_s15 = smov [#allocation6]   ;;  %s1946_s16 = smov [#allocation10]  }
   0x4   :  { %18 = dma.hbm_to_smem %s16_s11, 16, %s1945_s15, [#allocation9]  }
   0x5   :  { %s25_s17 = sshll.u32 %s1946_s16, 4  ;;  %s1947_s18 = smov 128   ;;  %s26_s17 = int_to_ptr.vmem [resolvable:$true] %s25_s17 }
   0x6   :  { %s1948_s19 = smov 8  }
   0x7   :  { %31 = dma.hbm_to_vmem [thread:$0]  %s24_s14, 256, %s26_s17, [#allocation7], %s1947_s18, %s1947_s18, %s1948_s19  }
   0x8   :  { %1939 = dma.done.wait [#allocation9], 16  }
   0x9   :  { %1940 = vsyncadd [#allocation9], 4294967280 }
   0xa   :  { %1941 = dma.done.wait [#allocation7], 256  }
   0xb   :  { %1942 = vsyncadd [#allocation7], 4294967040 }
   0xc   :  { %40 = sfence }
   0xd   :  { %v41_v0 = vld [vmem:[#allocation10] sm:$0xff]  ;;  %v42_v1 = vld [vmem:[#allocation10 + $0x8] sm:$0xff]  ;;  %vm56_vm0 = vcmask 1043456   ;;  %vm2771_vm1 = vcmask 1041408   ;;  %vm2773_vm2 = vcmask 1041409   ;;  %vm2772_vm3 = vcmask 1043459  }
   0xe   :  { %45 = vst [vmem:[#allocation1] ss:$2 sm:$0xff] %v41_v0  ;;  %vm146_vm4 = vcmask 1045509   ;;  %vm148_vm5 = vcmask 1047559   ;;  %s1949_s0 = smov 75   ;;  %s1950_s1 = smov 69  }
   0xf   :  { %49 = vst [vmem:[#allocation1 + $0x10] ss:$2 sm:$0xff] %v42_v1  ;;  %s1951_s20 = smov 81   ;;  %s1952_s21 = smov 99   ;;  %vm225_vm6 = vcmask 1043458   ;;  %vm227_vm8 = vcmask 1045508  }
  0x10   :  { %s1953_s22 = smov 87   ;;  %s1954_s23 = smov 93   ;;  %vm226_vm7 = vmor %vm225_vm6, %vm2771_vm1  ;;  %vm229_vm10 = vcmask 998406   ;;  %vm2778_vm12 = vcmask 662528   ;;  %vm259_vm13 = vcmask 1042312   ;;  %vm260_vm14 = vcmask 3074  }
  0x11   :  { %s1955_s24 = smov 117   ;;  %s1956_s25 = smov 105   ;;  %vm228_vm9 = vmor %vm227_vm8, %vm226_vm7  ;;  %vm237_vm15 = vcmask 689704   ;;  %vm281_vm6 = vcmask 361704   ;;  %vm290_vm7 = vcmask 542104   ;;  %vm299_vm8 = vcmask 722504  }
  0x12   :  { %s1957_s26 = smov 111   ;;  %s1958_s27 = smov 123   ;;  %vm230_vm11 = vmor %vm229_vm10, %vm228_vm9  ;;  %vm320_vm9 = vcmask 1042344   ;;  %vm321_vm10 = vcmask 35842  }
  0x13   :  { %s1959_s28 = smov 1   ;;  %s1960_s29 = smov 7  }
  0x14   :  { %s1961_s30 = smov 13   ;;  %s1962_s3 = smov 19  }
  0x15   :  { %v46_v2 = vld.sshfl [vmem:[#allocation1] sm:$0xff pattern:$0x75316420]  ;;  %v47_v3 = vld.sshfl [vmem:[#allocation1 + $0x8] sm:$0xff pattern:$0x75316420] }
  0x16   :  { %v50_v4 = vld.sshfl [vmem:[#allocation1 + $0x10] sm:$0xff pattern:$0x75316420]  ;;  %v51_v5 = vld.sshfl [vmem:[#allocation1 + $0x18] sm:$0xff pattern:$0x75316420] }
  0x17   :  { %v57_v6 = vsel %vm56_vm0, %v46_v2, 0.0  ;;  %v64_v7 = vsel %vm56_vm0, %v47_v3, 0.0  ;;  %v71_v8 = vsel %vm56_vm0, %v50_v4, 0.0  ;;  %v78_v9 = vsel %vm56_vm0, %v51_v5, 0.0  ;;  %85 = vst [vmem:[#allocation1] ss:$2 sm:$0xff] %v41_v0 }
  0x18   :  { %v58_v10 = vrot.slane %v57_v6, 4  ;;  %v65_v11 = vrot.slane %v64_v7, 4  ;;  %v72_v12 = vrot.slane %v71_v8, 4  ;;  %v79_v13 = vrot.slane %v78_v9, 4  ;;  %89 = vst [vmem:[#allocation1 + $0x10] ss:$2 sm:$0xff] %v42_v1 }
  0x19   :  { %s1963_s4 = smov 25   ;;  %s1964_s5 = smov 31  }
  0x1a   :  { %v59_v14 = vadd.f32 %v58_v10, %v57_v6  ;;  %v66_v15 = vadd.f32 %v65_v11, %v64_v7  ;;  %v73_v16 = vadd.f32 %v72_v12, %v71_v8  ;;  %v80_v17 = vadd.f32 %v79_v13, %v78_v9  ;;  %s1708_s6 = sld [smem:[#allocation6 + $0x3]]  ;;  %s1966_s12 = smov 125  }
  0x1b   :  { %s1706_s7 = sld [smem:[#allocation6 + $0x2]]  ;;  %s1967_s13 = smov 126  }
  0x1c   :  { %v60_v18 = vrot.slane %v59_v14, 2  ;;  %v67_v19 = vrot.slane %v66_v15, 2  ;;  %v74_v20 = vrot.slane %v73_v16, 2  ;;  %v81_v21 = vrot.slane %v80_v17, 2  ;;  %s1704_s8 = sld [smem:[#allocation6 + $0x1]]  ;;  %s1968_s14 = smov 127  }
  0x1d   :  { %s1714_s9 = sld [smem:[#allocation6 + $0x6]]  ;;  %s1969_s18 = smov 122  }
  0x1e   :  { %v61_v22 = vadd.f32 %v60_v18, %v59_v14  ;;  %v68_v23 = vadd.f32 %v67_v19, %v66_v15  ;;  %v75_v24 = vadd.f32 %v74_v20, %v73_v16  ;;  %v82_v25 = vadd.f32 %v81_v21, %v80_v17  ;;  %v86_v26 = vld.sshfl [vmem:[#allocation1] sm:$0xff pattern:$0x75316420]  ;;  %v87_v27 = vld.sshfl [vmem:[#allocation1 + $0x8] sm:$0xff pattern:$0x75316420] }
  0x1f   :  { %v90_v28 = vld.sshfl [vmem:[#allocation1 + $0x10] sm:$0xff pattern:$0x75316420]  ;;  %v91_v29 = vld.sshfl [vmem:[#allocation1 + $0x18] sm:$0xff pattern:$0x75316420] }
  0x20   :  { %v62_v30 = vrot.slane %v61_v22, 1  ;;  %v69_v31 = vrot.slane %v68_v23, 1  ;;  %v76_v32 = vrot.slane %v75_v24, 1  ;;  %v83_v33 = vrot.slane %v82_v25, 1  ;;  %s1712_s10 = sld [smem:[#allocation6 + $0x5]]  ;;  %s1970_s19 = smov 124  }
  0x21   :  { %v96_v34 = vsel %vm56_vm0, %v86_v26, -inf  ;;  %v103_v35 = vsel %vm56_vm0, %v87_v27, -inf  ;;  %v110_v36 = vsel %vm56_vm0, %v90_v28, -inf  ;;  %v117_v37 = vsel %vm56_vm0, %v91_v29, -inf  ;;  %s1710_s11 = sld [smem:[#allocation6 + $0x4]] }
  0x22   :  { %v63_v38 = vadd.f32 %v62_v30, %v61_v22  ;;  %v70_v39 = vadd.f32 %v69_v31, %v68_v23  ;;  %v77_v40 = vadd.f32 %v76_v32, %v75_v24  ;;  %v84_v41 = vadd.f32 %v83_v33, %v82_v25  ;;  %s1720_s15 = sld [smem:[#allocation6 + $0x9]] }
  0x23   :  { %v97_v42 = vrot.slane %v96_v34, 4  ;;  %v104_v43 = vrot.slane %v103_v35, 4  ;;  %v111_v44 = vrot.slane %v110_v36, 4  ;;  %v118_v45 = vrot.slane %v117_v37, 4  ;;  %s1718_s16 = sld [smem:[#allocation6 + $0x8]] }
  0x24   :  { %v132_v46 = vrot.slane %v70_v39, 6  ;;  %v133_v47 = vrot.slane %v84_v41, 6  ;;  %v1965_v23 = vmov 0.0   ;;  %vm247_vm0 = vcmask 870104   ;;  %s1716_s17 = sld [smem:[#allocation6 + $0x7]] }
  0x25   :  { %v98_v48 = vmax.f32 %v96_v34, %v97_v42  ;;  %v105_v49 = vmax.f32 %v103_v35, %v104_v43  ;;  %v112_v50 = vmax.f32 %v110_v36, %v111_v44  ;;  %v119_v51 = vmax.f32 %v117_v37, %v118_v45  ;;  %231 = vst.msk [vmem:[#allocation4] sm:$0xff] %vm230_vm11, %v1965_v23 }
  0x26   :  { %v135_v52 = vsel %vm2771_vm1, %v63_v38, %v132_v46  ;;  %v136_v53 = vsel %vm2771_vm1, %v77_v40, %v133_v47  ;;  %232 = vst.msk [vmem:[#allocation5] sm:$0xff] %vm230_vm11, %v1965_v23  ;;  %vm308_vm11 = vcmask 902904  }
  0x27   :  { %v141_v54 = vrot.slane %v136_v53, 7  ;;  %v99_v55 = vrot.slane %v98_v48, 2  ;;  %v106_v56 = vrot.slane %v105_v49, 2  ;;  %v113_v57 = vrot.slane %v112_v50, 2 }
  0x28   :  { %v120_v58 = vrot.slane %v119_v51, 2 }
  0x29   :  { %v143_v59 = vsel %vm2773_vm2, %v141_v54, %v135_v52  ;;  %v100_v60 = vmax.f32 %v98_v48, %v99_v55  ;;  %v107_v61 = vmax.f32 %v105_v49, %v106_v56  ;;  %v114_v62 = vmax.f32 %v112_v50, %v113_v57 }
  0x2a   :  { %v145_v63 = vsel %vm2772_vm3, %v141_v54, %v143_v59  ;;  %v121_v0 = vmax.f32 %v119_v51, %v120_v58 }
  0x2b   :  { %v147_v1 = vsel %vm146_vm4, %v141_v54, %v145_v63  ;;  %v101_v2 = vrot.slane %v100_v60, 1  ;;  %v108_v3 = vrot.slane %v107_v61, 1  ;;  %v115_v4 = vrot.slane %v114_v62, 1 }
  0x2c   :  { %v149_v5 = vsel %vm148_vm5, %v141_v54, %v147_v1  ;;  %v122_v6 = vrot.slane %v121_v0, 1 }
  0x2d   :  { %151 = vst [vmem:[#allocation2] sm:$0xf] %v149_v5  ;;  %v109_v7 = vmax.f32 %v107_v61, %v108_v3  ;;  %v102_v8 = vmax.f32 %v100_v60, %v101_v2  ;;  %v116_v9 = vmax.f32 %v114_v62, %v115_v4 }
  0x2e   :  { %v123_v10 = vmax.f32 %v121_v0, %v122_v6 }
  0x2f   :  { %v156_v11 = vrot.slane %v109_v7, 6 }
  0x30   :  { %v157_v12 = vrot.slane %v123_v10, 6 }
  0x31   :  { %v158_v13 = vsel %vm2771_vm1, %v102_v8, %v156_v11 }
  0x32   :  { %v159_v14 = vsel %vm2771_vm1, %v116_v9, %v157_v12  ;;  %vm672_vm1 = vcmask 826368  }
  0x33   :  { %v162_v15 = vrot.slane %v159_v14, 7 }
  0x34   :  { %v221_v16 = vld [vmem:[#allocation2] sm:$0xf] }
  0x35   :  { %v222_v17 = vmul.f32 0.25, %v221_v16  ;;  %v163_v18 = vsel %vm2773_vm2, %v162_v15, %v158_v13  ;;  %vm715_vm2 = vcmask 687104  }
  0x36   :  { %v164_v19 = vsel %vm2772_vm3, %v162_v15, %v163_v18  ;;  %vm2775_vm3 = vcmask 818176  }
  0x37   :  { %244 = vrot.lane.b32.xlu1 %v222_v17, %s1949_s0  ;;  %234 = vrot.lane.b32.xlu0 %v222_v17, %s1950_s1  ;;  %v165_v20 = vsel %vm146_vm4, %v162_v15, %v164_v19  ;;  %vm2070_vm4 = vmor %vm260_vm14, %vm259_vm13  ;;  %vm317_vm13 = vcmask 957440  }
  0x38   :  { %v166_v21 = vsel %vm148_vm5, %v162_v15, %v165_v20  ;;  %253 = vrot.lane.b32.xlu2 %v222_v17, %s1951_s20  ;;  %vm272_vm5 = vcmask 181304   ;;  %vm2082_vm14 = vmor %vm321_vm10, %vm320_vm9  ;;  %vm375_vm9 = vcmask 755304   ;;  %vm389_vm10 = vcmask 935704  }
  0x39   :  { %168 = vst [vmem:[#allocation3] sm:$0xf] %v166_v21 }
  0x3f   :  { %287 = vrot.lane.b32.xlu1 %v222_v17, %s1952_s21  ;;  %269 = vrot.lane.b32.xlu0 %v222_v17, %s1953_s22 }
  0x40   :  { %278 = vrot.lane.b32.xlu2 %v222_v17, %s1954_s23  ;;  %v223_v22 = vld [vmem:[#allocation3] sm:$0xf] }
  0x47   :  { %314 = vrot.lane.b32.xlu1 %v222_v17, %s1955_s24  ;;  %296 = vrot.lane.b32.xlu0 %v222_v17, %s1956_s25 }
  0x48   :  { %305 = vrot.lane.b32.xlu2 %v222_v17, %s1957_s26 }
  0x4f   :  { %249 = vrot.lane.b32.xlu1 %v223_v22, %s1949_s0  ;;  %240 = vrot.lane.b32.xlu0 %v223_v22, %s1950_s1  ;;  %s1726_s0 = sld [smem:[#allocation6 + $0xc]] }
  0x50   :  { %263 = vrot.lane.b32.xlu2 %v223_v22, %s1951_s20  ;;  %s1724_s1 = sld [smem:[#allocation6 + $0xb]] }
  0x57   :  { %274 = vrot.lane.b32.xlu1 %v223_v22, %s1953_s22  ;;  %283 = vrot.lane.b32.xlu0 %v223_v22, %s1954_s23  ;;  %s1971_s22 = smov 104   ;;  %s1972_s23 = smov 106  }
  0x58   :  { %292 = vrot.lane.b32.xlu2 %v223_v22, %s1952_s21  ;;  %s1722_s21 = sld [smem:[#allocation6 + $0xa]] }
  0x5f   :  { %301 = vrot.lane.b32.xlu1 %v223_v22, %s1956_s25  ;;  %310 = vrot.lane.b32.xlu0 %v223_v22, %s1957_s26  ;;  %s1730_s26 = sld [smem:[#allocation6 + $0xe]] }
  0x60   :  { %324 = vrot.lane.b32.xlu2 %v223_v22, %s1955_s24  ;;  %s1732_s24 = sld [smem:[#allocation6 + $0xf]] }
  0x67   :  { %336 = vrot.lane.b32.xlu1 %v223_v22, %s1958_s27  ;;  %330 = vrot.lane.b32.xlu0 %v222_v17, %s1958_s27 }
  0x68   :  { %341 = vrot.lane.b32.xlu2 %v222_v17, %s1959_s28 }
  0x6f   :  { %355 = vrot.lane.b32.xlu1 %v222_v17, %s1960_s29  ;;  %349 = vrot.lane.b32.xlu0 %v223_v22, %s1959_s28  ;;  %s1728_s28 = sld [smem:[#allocation6 + $0xd]] }
  0x70   :  { %363 = vrot.lane.b32.xlu2 %v223_v22, %s1960_s29  ;;  %s1973_s29 = smov 101  }
  0x77   :  { %377 = vrot.lane.b32.xlu1 %v223_v22, %s1961_s30  ;;  %369 = vrot.lane.b32.xlu0 %v222_v17, %s1961_s30 }
  0x78   :  { %383 = vrot.lane.b32.xlu2 %v222_v17, %s1962_s3 }
  0x7f   :  { %397 = vrot.lane.b32.xlu1 %v222_v17, %s1963_s4  ;;  %391 = vrot.lane.b32.xlu0 %v223_v22, %s1962_s3  ;;  %s1974_s3 = smov 102  }
  0x80   :  { %407 = vrot.lane.b32.xlu2 %v223_v22, %s1963_s4  ;;  %s1975_s4 = smov 103  }
  0x87   :  { %419 = vrot.lane.b32.xlu1 %v223_v22, %s1964_s5  ;;  %413 = vrot.lane.b32.xlu0 %v222_v17, %s1964_s5  ;;  %s1738_s5 = sld [smem:[#allocation6 + $0x12]] }
  0x92   :  { %v254_v24 = vpop.permute.xlu2 %253 }
  0x93   :  { %v255_v26 = vrot.slane %v254_v24, 6 }
  0x95   :  { %v257_v30 = vsel %vm2778_vm12, %v255_v26, %v254_v24  ;;  %v477_v24 = vstv %s1708_s6  ;;  %s1736_s6 = sld [smem:[#allocation6 + $0x11]] }
  0x9a   :  { %v279_v25 = vpop.permute.xlu2 %278 }
  0xa2   :  { %v306_v27 = vpop.permute.xlu2 %305 }
  0xa9   :  { %v245_v28 = vpop.permute.xlu1 %244  ;;  %v235_v29 = vpop.permute.xlu0 %234 }
  0xaa   :  { %238 = vst.msk [vmem:[#allocation4] sm:$0x3] %vm237_vm15, %v235_v29  ;;  %v264_v32 = vpop.permute.xlu2 %263 }
  0xab   :  { %248 = vst.msk [vmem:[#allocation4] sm:$0x3] %vm247_vm0, %v245_v28  ;;  %v265_v41 = vrot.slane %v264_v32, 6  ;;  %v435_v28 = vstv %s1704_s8  ;;  %s1976_s8 = smov 83  }
  0xac   :  { %262 = vst.msk [vmem:[#allocation4] sm:$0xf] %vm2070_vm4, %v257_v30 }
  0xad   :  { %v266_v44 = vsel %vm2778_vm12, %v265_v41, %v264_v32  ;;  %v561_v41 = vstv %s1716_s17  ;;  %s1979_s17 = smov 80  }
  0xb1   :  { %v288_v33 = vpop.permute.xlu1 %287  ;;  %v270_v34 = vpop.permute.xlu0 %269 }
  0xb2   :  { %273 = vst.msk [vmem:[#allocation4 + $0x2] sm:$0x3] %vm272_vm5, %v270_v34  ;;  %v293_v39 = vpop.permute.xlu2 %292  ;;  %v519_v34 = vstv %s1712_s10  ;;  %s1978_s10 = smov 100  }
  0xb3   :  { %282 = vst.msk [vmem:[#allocation4 + $0x2] sm:$0x3] %vm281_vm6, %v279_v25 }
  0xb4   :  { %291 = vst.msk [vmem:[#allocation4 + $0x2] sm:$0x3] %vm290_vm7, %v288_v33  ;;  %v540_v33 = vstv %s1714_s9  ;;  %s1977_s9 = smov 84  }
  0xb9   :  { %v315_v35 = vpop.permute.xlu1 %314  ;;  %v297_v36 = vpop.permute.xlu0 %296 }
  0xba   :  { %v316_v37 = vrot.slane %v315_v35, 2  ;;  %300 = vst.msk [vmem:[#allocation4 + $0x2] sm:$0x3] %vm299_vm8, %v297_v36  ;;  %v325_v45 = vpop.permute.xlu2 %324 }
  0xbb   :  { %309 = vst.msk [vmem:[#allocation4 + $0x2] sm:$0x3] %vm308_vm11, %v306_v27  ;;  %v326_v48 = vrot.slane %v325_v45, 2  ;;  %v456_v27 = vstv %s1706_s7  ;;  %s1734_s7 = sld [smem:[#allocation6 + $0x10]] }
  0xbc   :  { %v318_v40 = vsel %vm317_vm13, %v315_v35, %v316_v37  ;;  %v498_v35 = vstv %s1710_s11  ;;  %s1705_s11 = sld [smem:[#allocation6 + $0x32]] }
  0xbd   :  { %323 = vst.msk [vmem:[#allocation4 + $0x2] sm:$0xf] %vm2082_vm14, %v318_v40  ;;  %v327_v52 = vsel %vm317_vm13, %v325_v45, %v326_v48  ;;  %vm404_vm13 = vcmask 68610   ;;  %v582_v40 = vstv %s1718_s16  ;;  %v666_v45 = vstv %s1726_s0  ;;  %s1740_s16 = sld [smem:[#allocation6 + $0x13]]  ;;  %s1980_s0 = smov 82  }
  0xc1   :  { %v250_v42 = vpop.permute.xlu1 %249  ;;  %v241_v43 = vpop.permute.xlu0 %240 }
  0xc2   :  { %243 = vst.msk [vmem:[#allocation5] sm:$0x3] %vm237_vm15, %v241_v43  ;;  %v342_v49 = vpop.permute.xlu2 %341  ;;  %vm344_vm15 = vcmask 7168  }
  0xc3   :  { %252 = vst.msk [vmem:[#allocation5] sm:$0x3] %vm247_vm0, %v250_v42  ;;  %v343_v53 = vrot.slane %v342_v49, 2  ;;  %vm334_vm0 = vcmask 214104  }
  0xc4   :  { %268 = vst.msk [vmem:[#allocation5] sm:$0xf] %vm2070_vm4, %v266_v44  ;;  %vm347_vm4 = vcmask 394504  }
  0xc5   :  { %v345_v59 = vsel %vm344_vm15, %v342_v49, %v343_v53  ;;  %v709_v53 = vstv %s1730_s26  ;;  %s1981_s26 = smov 78  }
  0xc9   :  { %v275_v46 = vpop.permute.xlu1 %274  ;;  %v284_v47 = vpop.permute.xlu0 %283 }
  0xca   :  { %277 = vst.msk [vmem:[#allocation5 + $0x2] sm:$0x3] %vm272_vm5, %v275_v46  ;;  %v364_v54 = vpop.permute.xlu2 %363  ;;  %vm358_vm5 = vcmask 56320   ;;  %v645_v46 = vstv %s1724_s1  ;;  %s1711_s1 = sld [smem:[#allocation6 + $0x35]] }
  0xcb   :  { %286 = vst.msk [vmem:[#allocation5 + $0x2] sm:$0x3] %vm281_vm6, %v284_v47  ;;  %v365_v60 = vrot.slane %v364_v54, 2  ;;  %vm361_vm6 = vcmask 574904   ;;  %v624_v47 = vstv %s1722_s21  ;;  %s1709_s21 = sld [smem:[#allocation6 + $0x34]] }
  0xcc   :  { %295 = vst.msk [vmem:[#allocation5 + $0x2] sm:$0x3] %vm290_vm7, %v293_v39  ;;  %vm2774_vm7 = vcmask 105472   ;;  %v603_v39 = vstv %s1720_s15  ;;  %s1742_s15 = sld [smem:[#allocation6 + $0x14]] }
  0xcd   :  { %v366_v4 = vsel %vm358_vm5, %v364_v54, %v365_v60  ;;  %v687_v54 = vstv %s1728_s28  ;;  %v752_v60 = vstv %s1734_s7  ;;  %s1982_s28 = smov 79   ;;  %s1713_s7 = sld [smem:[#allocation6 + $0x36]] }
  0xd1   :  { %v302_v50 = vpop.permute.xlu1 %301  ;;  %v311_v51 = vpop.permute.xlu0 %310 }
  0xd2   :  { %304 = vst.msk [vmem:[#allocation5 + $0x2] sm:$0x3] %vm299_vm8, %v302_v50  ;;  %v384_v1 = vpop.permute.xlu2 %383  ;;  %vm386_vm8 = vcmask 154624  }
  0xd3   :  { %313 = vst.msk [vmem:[#allocation5 + $0x2] sm:$0x3] %vm308_vm11, %v311_v51  ;;  %v385_v5 = vrot.slane %v384_v1, 2  ;;  %vm403_vm11 = vcmask 1042376  }
  0xd4   :  { %329 = vst.msk [vmem:[#allocation5 + $0x2] sm:$0xf] %vm2082_vm14, %v327_v52  ;;  %vm400_vm14 = vcmask 203776   ;;  %v731_v52 = vstv %s1732_s24  ;;  %s1707_s24 = sld [smem:[#allocation6 + $0x33]] }
  0xd5   :  { %v387_v12 = vsel %vm386_vm8, %v384_v1, %v385_v5  ;;  %v446_v1 = vstv %s1705_s11  ;;  %s1721_s11 = sld [smem:[#allocation6 + $0x3a]] }
  0xd9   :  { %v337_v55 = vpop.permute.xlu1 %336  ;;  %v331_v56 = vpop.permute.xlu0 %330 }
  0xda   :  { %v338_v57 = vrot.slane %v337_v55, 2  ;;  %v332_v58 = vrot.slane %v331_v56, 2  ;;  %v408_v13 = vpop.permute.xlu2 %407 }
  0xdb   :  { %v409_v14 = vrot.slane %v408_v13, 2 }
  0xdc   :  { %340 = vst.msk [vmem:[#allocation5 + $0x4] sm:$0x3] %vm334_vm0, %v338_v57 }
  0xdd   :  { %335 = vst.msk [vmem:[#allocation4 + $0x4] sm:$0x3] %vm334_vm0, %v332_v58  ;;  %v410_v21 = vsel %vm400_vm14, %v408_v13, %v409_v14  ;;  %vm417_vm0 = vcmask 246904   ;;  %v793_v58 = vstv %s1738_s5  ;;  %s1717_s5 = sld [smem:[#allocation6 + $0x38]] }
  0xde   :  { %348 = vst.msk [vmem:[#allocation4 + $0x4] sm:$0x3] %vm347_vm4, %v345_v59  ;;  %v773_v59 = vstv %s1736_s6  ;;  %s1715_s6 = sld [smem:[#allocation6 + $0x37]] }
  0xe1   :  { %v356_v61 = vpop.permute.xlu1 %355  ;;  %v350_v62 = vpop.permute.xlu0 %349 }
  0xe2   :  { %v357_v63 = vrot.slane %v356_v61, 2  ;;  %v351_v0 = vrot.slane %v350_v62, 2 }
  0xe3   :  { %v572_v13 = vstv %s1717_s5  ;;  %s1737_s5 = sld [smem:[#allocation6 + $0x42]] }
  0xe4   :  { %v359_v2 = vsel %vm358_vm5, %v356_v61, %v357_v63  ;;  %v352_v3 = vsel %vm344_vm15, %v350_v62, %v351_v0  ;;  %vm405_vm15 = vmor %vm404_vm13, %vm403_vm11  ;;  %v551_v14 = vstv %s1715_s6  ;;  %s1743_s6 = sld [smem:[#allocation6 + $0x45]]  ;;  %vm462_vm5 = vcmask 1031168  }
  0xe5   :  { %362 = vst.msk [vmem:[#allocation4 + $0x4] sm:$0x3] %vm361_vm6, %v359_v2  ;;  %v835_v2 = vstv %s1742_s15  ;;  %s1719_s15 = sld [smem:[#allocation6 + $0x39]]  ;;  %vm567_vm11 = vcmask 867328   ;;  %vm588_vm13 = vcmask 859136  }
  0xe6   :  { %354 = vst.msk [vmem:[#allocation5 + $0x4] sm:$0x3] %vm347_vm4, %v352_v3  ;;  %v814_v3 = vstv %s1740_s16  ;;  %s1725_s16 = sld [smem:[#allocation6 + $0x3c]]  ;;  %vm441_vm4 = vcmask 1039360  }
  0xe7   :  { %368 = vst.msk [vmem:[#allocation5 + $0x4] sm:$0x3] %vm361_vm6, %v366_v4  ;;  %vm483_vm6 = vcmask 1022976  }
  0xe9   :  { %v378_v6 = vpop.permute.xlu1 %377  ;;  %v370_v7 = vpop.permute.xlu0 %369 }
  0xea   :  { %v379_v8 = vrot.slane %v378_v6, 2  ;;  %v371_v9 = vrot.slane %v370_v7, 2 }
  0xec   :  { %v380_v10 = vsel %vm2774_vm7, %v378_v6, %v379_v8  ;;  %v373_v11 = vsel %vm2774_vm7, %v370_v7, %v371_v9  ;;  %v509_v7 = vstv %s1711_s1  ;;  %v488_v8 = vstv %s1709_s21  ;;  %s1733_s1 = sld [smem:[#allocation6 + $0x40]] }
  0xed   :  { %382 = vst.msk [vmem:[#allocation5 + $0x4] sm:$0x3] %vm375_vm9, %v380_v10  ;;  %v467_v9 = vstv %s1707_s24  ;;  %s1731_s21 = sld [smem:[#allocation6 + $0x3f]]  ;;  %vm2776_vm7 = vcmask 678912  }
  0xee   :  { %376 = vst.msk [vmem:[#allocation4 + $0x4] sm:$0x3] %vm375_vm9, %v373_v11  ;;  %s1739_s24 = sld [smem:[#allocation6 + $0x43]]  ;;  %vm525_vm9 = vcmask 1006592  }
  0xef   :  { %390 = vst.msk [vmem:[#allocation4 + $0x4] sm:$0x3] %vm389_vm10, %v387_v12 }
  0xf1   :  { %v398_v15 = vpop.permute.xlu1 %397  ;;  %v392_v16 = vpop.permute.xlu0 %391 }
  0xf2   :  { %v399_v17 = vrot.slane %v398_v15, 2  ;;  %v393_v18 = vrot.slane %v392_v16, 2 }
  0xf4   :  { %v401_v19 = vsel %vm400_vm14, %v398_v15, %v399_v17  ;;  %v394_v20 = vsel %vm386_vm8, %v392_v16, %v393_v18  ;;  %v530_v15 = vstv %s1713_s7  ;;  %s1983_s7 = smov 62   ;;  %vm504_vm8 = vcmask 1014784  }
  0xf5   :  { %406 = vst.msk [vmem:[#allocation4 + $0x4] sm:$0xf] %vm405_vm15, %v401_v19  ;;  %vm609_vm14 = vcmask 850944  }
  0xf6   :  { %396 = vst.msk [vmem:[#allocation5 + $0x4] sm:$0x3] %vm389_vm10, %v394_v20  ;;  %v614_v20 = vstv %s1721_s11  ;;  %s1984_s11 = smov 61   ;;  %vm546_vm10 = vcmask 998400  }
  0xf7   :  { %412 = vst.msk [vmem:[#allocation5 + $0x4] sm:$0xf] %vm405_vm15, %v410_v21  ;;  %v593_v21 = vstv %s1719_s15  ;;  %s1985_s15 = smov 60   ;;  %vm630_vm15 = vcmask 842752  }
  0xf9   :  { %v420_v22 = vpop.permute.xlu1 %419  ;;  %v414_v23 = vpop.permute.xlu0 %413 }
  0xfa   :  { %v421_v25 = vrot.slane %v420_v22, 2  ;;  %v415_v26 = vrot.slane %v414_v23, 2 }
  0xfc   :  { %v2113_v29 = vld [vmem:[#allocation4] sm:$0x3f]  ;;  %423 = vst.msk [vmem:[#allocation5 + $0x6] sm:$0x3] %vm417_vm0, %v421_v25 }
  0xfd   :  { %418 = vst.msk [vmem:[#allocation4 + $0x6] sm:$0x3] %vm417_vm0, %v415_v26  ;;  %v478_v30 = vmul.f32 %v477_v24, %v2113_v29  ;;  %v457_v31 = vmul.f32 %v456_v27, %v2113_v29  ;;  %v436_v32 = vmul.f32 %v435_v28, %v2113_v29  ;;  %v541_v36 = vmul.f32 %v540_v33, %v2113_v29 }
  0xfe   :  { %v520_v37 = vmul.f32 %v519_v34, %v2113_v29  ;;  %v499_v38 = vmul.f32 %v498_v35, %v2113_v29  ;;  %v604_v42 = vmul.f32 %v603_v39, %v2113_v29  ;;  %v583_v43 = vmul.f32 %v582_v40, %v2113_v29  ;;  %v2153_v0 = vld [vmem:[#allocation5] sm:$0x3f] }
  0xff   :  { %480 = vrot.lane.b32.xlu0 %v478_v30, %s1966_s12  ;;  %459 = vrot.lane.b32.xlu1 %v457_v31, %s1967_s13  ;;  %v562_v44 = vmul.f32 %v561_v41, %v2113_v29  ;;  %v667_v48 = vmul.f32 %v666_v45, %v2113_v29  ;;  %v646_v49 = vmul.f32 %v645_v46, %v2113_v29  ;;  %v656_v27 = vstv %s1725_s16  ;;  %s1986_s16 = smov 59  }
 0x100   :  { %438 = vrot.lane.b32.xlu2 %v436_v32, %s1968_s14  ;;  %v625_v50 = vmul.f32 %v624_v47, %v2113_v29  ;;  %v688_v57 = vmul.f32 %v687_v54, %v2113_v29  ;;  %v447_v4 = vmul.f32 %v446_v1, %v2153_v0  ;;  %v510_v10 = vmul.f32 %v509_v7, %v2153_v0 }
 0x101   :  { %v489_v11 = vmul.f32 %v488_v8, %v2153_v0  ;;  %v468_v12 = vmul.f32 %v467_v9, %v2153_v0  ;;  %v573_v16 = vmul.f32 %v572_v13, %v2153_v0  ;;  %v552_v17 = vmul.f32 %v551_v14, %v2153_v0 }
 0x102   :  { %v531_v18 = vmul.f32 %v530_v15, %v2153_v0  ;;  %v615_v23 = vmul.f32 %v614_v20, %v2153_v0  ;;  %v594_v24 = vmul.f32 %v593_v21, %v2153_v0  ;;  %v657_v31 = vmul.f32 %v656_v27, %v2153_v0 }
 0x103   :  { %v2185_v32 = vld [vmem:[#allocation5] sm:$0xff]  ;;  %v742_v34 = vstv %s1733_s1  ;;  %v721_v35 = vstv %s1731_s21  ;;  %s2233_s1 = sld [smem:[#allocation6 + $0x4c]]  ;;  %vm651_vm0 = vcmask 834560  }
 0x104   :  { %v2139_v51 = vld [vmem:[#allocation4] sm:$0xff]  ;;  %s2236_s21 = sld [smem:[#allocation6 + $0x4b]] }
 0x105   :  { %v732_v55 = vmul.f32 %v731_v52, %v2139_v51  ;;  %v710_v56 = vmul.f32 %v709_v53, %v2139_v51  ;;  %v794_v61 = vmul.f32 %v793_v58, %v2139_v51  ;;  %v774_v62 = vmul.f32 %v773_v59, %v2139_v51 }
 0x106   :  { %v753_v63 = vmul.f32 %v752_v60, %v2139_v51  ;;  %v836_v5 = vmul.f32 %v835_v2, %v2139_v51  ;;  %v815_v6 = vmul.f32 %v814_v3, %v2139_v51 }
 0x107   :  { %543 = vrot.lane.b32.xlu0 %v541_v36, %s1969_s18  ;;  %522 = vrot.lane.b32.xlu1 %v520_v37, %s1958_s27  ;;  %v743_v37 = vmul.f32 %v742_v34, %v2185_v32 }
 0x108   :  { %501 = vrot.lane.b32.xlu2 %v499_v38, %s1970_s19  ;;  %v722_v38 = vmul.f32 %v721_v35, %v2185_v32 }
 0x10f   :  { %606 = vrot.lane.b32.xlu0 %v604_v42, %s1971_s22  ;;  %585 = vrot.lane.b32.xlu1 %v583_v43, %s1956_s25  ;;  %v804_v42 = vstv %s1739_s24  ;;  %s2249_s24 = sld [smem:[#allocation6 + $0x4d]] }
 0x110   :  { %564 = vrot.lane.b32.xlu2 %v562_v44, %s1972_s23  ;;  %v783_v44 = vstv %s1737_s5  ;;  %s2255_s5 = sld [smem:[#allocation6 + $0x1d]] }
 0x117   :  { %669 = vrot.lane.b32.xlu0 %v667_v48, %s1973_s29  ;;  %648 = vrot.lane.b32.xlu1 %v646_v49, %s1974_s3  ;;  %v805_v48 = vmul.f32 %v804_v42, %v2185_v32 }
 0x118   :  { %627 = vrot.lane.b32.xlu2 %v625_v50, %s1975_s4  ;;  %v784_v50 = vmul.f32 %v783_v44, %v2185_v32 }
 0x11f   :  { %734 = vrot.lane.b32.xlu0 %v732_v55, %s1976_s8  ;;  %712 = vrot.lane.b32.xlu1 %v710_v56, %s1977_s9 }
 0x120   :  { %690 = vrot.lane.b32.xlu2 %v688_v57, %s1978_s10 }
 0x127   :  { %796 = vrot.lane.b32.xlu0 %v794_v61, %s1979_s17  ;;  %776 = vrot.lane.b32.xlu1 %v774_v62, %s1951_s20 }
 0x128   :  { %755 = vrot.lane.b32.xlu2 %v753_v63, %s1980_s0 }
 0x12f   :  { %449 = vrot.lane.b32.xlu0 %v447_v4, %s1968_s14  ;;  %838 = vrot.lane.b32.xlu1 %v836_v5, %s1981_s26  ;;  %s1723_s14 = sld [smem:[#allocation6 + $0x3b]] }
 0x130   :  { %817 = vrot.lane.b32.xlu2 %v815_v6, %s1982_s28 }
 0x135   :  { %v635_v19 = vstv %s1723_s14  ;;  %s1749_s14 = sld [smem:[#allocation6 + $0x48]] }
 0x136   :  { %v636_v22 = vmul.f32 %v635_v19, %v2153_v0 }
 0x137   :  { %512 = vrot.lane.b32.xlu0 %v510_v10, %s1970_s19  ;;  %491 = vrot.lane.b32.xlu1 %v489_v11, %s1966_s12  ;;  %s1729_s12 = sld [smem:[#allocation6 + $0x3e]] }
 0x138   :  { %470 = vrot.lane.b32.xlu2 %v468_v12, %s1967_s13  ;;  %s1727_s13 = sld [smem:[#allocation6 + $0x3d]] }
 0x13b   :  { %v909_v9 = vstv %s1749_s14  ;;  %s2298_s14 = sld [smem:[#allocation6 + $0x1f]] }
 0x13d   :  { %v698_v25 = vstv %s1729_s12  ;;  %s2217_s12 = sld [smem:[#allocation6 + $0x1a]] }
 0x13e   :  { %v677_v26 = vstv %s1727_s13  ;;  %v699_v28 = vmul.f32 %v698_v25, %v2153_v0  ;;  %s2219_s13 = sld [smem:[#allocation6 + $0x19]] }
 0x13f   :  { %575 = vrot.lane.b32.xlu0 %v573_v16, %s1972_s23  ;;  %554 = vrot.lane.b32.xlu1 %v552_v17, %s1969_s18  ;;  %s1735_s23 = sld [smem:[#allocation6 + $0x41]]  ;;  %v678_v30 = vmul.f32 %v677_v26, %v2153_v0  ;;  %v910_v16 = vmul.f32 %v909_v9, %v2185_v32 }
 0x140   :  { %533 = vrot.lane.b32.xlu2 %v531_v18, %s1958_s27 }
 0x143   :  { %v961_v26 = vstv %s2217_s12  ;;  %s2317_s12 = sld [smem:[#allocation6 + $0x52]] }
 0x144   :  { %v940_v27 = vstv %s2219_s13  ;;  %v962_v34 = vmul.f32 %v961_v26, %v2139_v51  ;;  %s2320_s13 = sld [smem:[#allocation6 + $0x51]] }
 0x145   :  { %v763_v33 = vstv %s1735_s23  ;;  %s2227_s23 = sld [smem:[#allocation6 + $0x1b]] }
 0x146   :  { %v764_v36 = vmul.f32 %v763_v33, %v2185_v32 }
 0x147   :  { %638 = vrot.lane.b32.xlu0 %v636_v22, %s1975_s4  ;;  %617 = vrot.lane.b32.xlu1 %v615_v23, %s1971_s22  ;;  %s424_s4 = sld [smem:[#allocation6]] }
 0x148   :  { %596 = vrot.lane.b32.xlu2 %v594_v24, %s1956_s25  ;;  %s1741_s25 = sld [smem:[#allocation6 + $0x44]] }
 0x14d   :  { %v426_v39 = vstv %s424_s4  ;;  %s1987_s4 = smov 58  }
 0x14e   :  { %v825_v41 = vstv %s1741_s25  ;;  %v427_v45 = vmul.f32 %v426_v39, %v2113_v29  ;;  %v846_v29 = vstv %s1743_s6  ;;  %s1988_s25 = smov 57   ;;  %s2269_s6 = sld [smem:[#allocation6 + $0x1e]] }
 0x14f   :  { %701 = vrot.lane.b32.xlu0 %v699_v28, %s1978_s10  ;;  %680 = vrot.lane.b32.xlu1 %v678_v30, %s1973_s29  ;;  %s1744_s29 = sld [smem:[#allocation6 + $0x15]]  ;;  %v826_v47 = vmul.f32 %v825_v41, %v2185_v32  ;;  %v847_v57 = vmul.f32 %v846_v29, %v2185_v32 }
 0x150   :  { %659 = vrot.lane.b32.xlu2 %v657_v31, %s1974_s3  ;;  %s1745_s10 = sld [smem:[#allocation6 + $0x46]] }
 0x155   :  { %v856_v53 = vstv %s1744_s29  ;;  %s2258_s29 = sld [smem:[#allocation6 + $0x1c]] }
 0x156   :  { %v867_v54 = vstv %s1745_s10  ;;  %v857_v55 = vmul.f32 %v856_v53, %v2139_v51  ;;  %s1989_s10 = smov 56  }
 0x157   :  { %766 = vrot.lane.b32.xlu0 %v764_v36, %s1980_s0  ;;  %745 = vrot.lane.b32.xlu1 %v743_v37, %s1976_s8  ;;  %s1747_s8 = sld [smem:[#allocation6 + $0x47]]  ;;  %v868_v56 = vmul.f32 %v867_v54, %v2185_v32  ;;  %v941_v36 = vmul.f32 %v940_v27, %v2139_v51 }
 0x158   :  { %724 = vrot.lane.b32.xlu2 %v722_v38, %s1977_s9  ;;  %s1748_s9 = sld [smem:[#allocation6 + $0x17]] }
 0x159   :  { %s1746_s0 = sld [smem:[#allocation6 + $0x16]] }
 0x15a   :  { %v439_v40 = vpop.permute.xlu2 %438 }
 0x15b   :  { %v440_v43 = vrot.slane %v439_v40, 2 }
 0x15d   :  { %v442_v46 = vsel %vm441_vm4, %v439_v40, %v440_v43  ;;  %v888_v59 = vstv %s1747_s8  ;;  %s2275_s8 = sld [smem:[#allocation6 + $0x4f]] }
 0x15e   :  { %v444_v49 = vadd.f32 %v442_v46, %v427_v45  ;;  %v898_v60 = vstv %s1748_s9  ;;  %v889_v62 = vmul.f32 %v888_v59, %v2185_v32  ;;  %v982_v45 = vstv %s2227_s23  ;;  %s2278_s9 = sld [smem:[#allocation6 + $0x4e]]  ;;  %s1994_s23 = smov 36  }
 0x15f   :  { %828 = vrot.lane.b32.xlu0 %v826_v47, %s1982_s28  ;;  %807 = vrot.lane.b32.xlu1 %v805_v48, %s1979_s17  ;;  %s2205_s28 = sld [smem:[#allocation6 + $0x18]]  ;;  %v877_v61 = vstv %s1746_s0  ;;  %v899_v63 = vmul.f32 %v898_v60, %v2139_v51  ;;  %v993_v46 = vstv %s2233_s1  ;;  %s1990_s0 = smov 40  }
 0x160   :  { %786 = vrot.lane.b32.xlu2 %v784_v50, %s1951_s20  ;;  %s1751_s20 = sld [smem:[#allocation6 + $0x49]]  ;;  %v878_v1 = vmul.f32 %v877_v61, %v2139_v51  ;;  %v972_v47 = vstv %s2236_s21  ;;  %v994_v53 = vmul.f32 %v993_v46, %v2185_v32 }
 0x161   :  { %v973_v29 = vmul.f32 %v972_v47, %v2185_v32  ;;  %s2333_s1 = sld [smem:[#allocation6 + $0x53]] }
 0x162   :  { %v502_v52 = vpop.permute.xlu2 %501  ;;  %s2339_s21 = sld [smem:[#allocation6 + $0x23]] }
 0x163   :  { %v503_v10 = vrot.slane %v502_v52, 2 }
 0x165   :  { %v919_v7 = vstv %s2205_s28  ;;  %v505_v18 = vsel %vm504_vm8, %v502_v52, %v503_v10  ;;  %v983_v52 = vmul.f32 %v982_v45, %v2139_v51  ;;  %s2289_s28 = sld [smem:[#allocation6 + $0x50]] }
 0x166   :  { %v930_v8 = vstv %s1751_s20  ;;  %v920_v13 = vmul.f32 %v919_v7, %v2139_v51  ;;  %s2295_s20 = sld [smem:[#allocation6 + $0x20]] }
 0x167   :  { %859 = vrot.lane.b32.xlu0 %v857_v55, %s1983_s7  ;;  %870 = vrot.lane.b32.xlu1 %v868_v56, %s1983_s7  ;;  %v931_v14 = vmul.f32 %v930_v8, %v2185_v32  ;;  %s1991_s7 = smov 39  }
 0x168   :  { %849 = vrot.lane.b32.xlu2 %v847_v57, %s1981_s26  ;;  %s2212_s26 = sld [smem:[#allocation6 + $0x4a]] }
 0x16a   :  { %v2207_v58 = vpop.permute.xlu2 %564 }
 0x16b   :  { %v566_v28 = vrot.slane %v2207_v58, 2 }
 0x16d   :  { %v568_v38 = vsel %vm567_vm11, %v2207_v58, %v566_v28 }
 0x16e   :  { %v951_v25 = vstv %s2212_s26  ;;  %s2311_s26 = sld [smem:[#allocation6 + $0x21]] }
 0x16f   :  { %891 = vrot.lane.b32.xlu0 %v889_v62, %s1984_s11  ;;  %901 = vrot.lane.b32.xlu1 %v899_v63, %s1985_s15  ;;  %v952_v33 = vmul.f32 %v951_v25, %v2185_v32  ;;  %v1014_v63 = vstv %s2249_s24  ;;  %s1995_s24 = smov 35  }
 0x170   :  { %880 = vrot.lane.b32.xlu2 %v878_v1, %s1984_s11  ;;  %v1024_v1 = vstv %s2255_s5  ;;  %s1992_s11 = smov 38   ;;  %s2355_s5 = sld [smem:[#allocation6 + $0x24]] }
 0x171   :  { %v460_v2 = vpop.permute.xlu1 %459  ;;  %v481_v3 = vpop.permute.xlu0 %480  ;;  %v1025_v7 = vmul.f32 %v1024_v1, %v2139_v51 }
 0x172   :  { %v461_v4 = vrot.slane %v460_v2, 2  ;;  %v2214_v5 = vpop.permute.xlu2 %627  ;;  %v482_v6 = vrot.slane %v481_v3, 2 }
 0x173   :  { %v629_v48 = vrot.slane %v2214_v5, 2 }
 0x174   :  { %v463_v11 = vsel %vm462_vm5, %v460_v2, %v461_v4  ;;  %v484_v15 = vsel %vm483_vm6, %v481_v3, %v482_v6  ;;  %v1003_v2 = vstv %s2258_s29  ;;  %v1015_v6 = vmul.f32 %v1014_v63, %v2185_v32  ;;  %s2361_s29 = sld [smem:[#allocation6 + $0x55]] }
 0x175   :  { %v465_v12 = vadd.f32 %v463_v11, %v444_v49  ;;  %v631_v56 = vsel %vm630_vm15, %v2214_v5, %v629_v48  ;;  %v1004_v9 = vmul.f32 %v1003_v2, %v2139_v51 }
 0x177   :  { %v486_v17 = vadd.f32 %v484_v15, %v465_v12  ;;  %922 = vrot.lane.b32.xlu0 %v920_v13, %s1986_s16  ;;  %933 = vrot.lane.b32.xlu1 %v931_v14, %s1986_s16  ;;  %s1993_s16 = smov 37  }
 0x178   :  { %912 = vrot.lane.b32.xlu2 %v910_v16, %s1985_s15  ;;  %s2309_s15 = sld [smem:[#allocation6 + $0x31]] }
 0x179   :  { %v507_v19 = vadd.f32 %v505_v18, %v486_v17  ;;  %v523_v20 = vpop.permute.xlu1 %522  ;;  %v544_v21 = vpop.permute.xlu0 %543  ;;  %v1045_v18 = vstv %s2269_s6  ;;  %s1996_s6 = smov 34  }
 0x17a   :  { %v524_v22 = vrot.slane %v523_v20, 2  ;;  %v2229_v23 = vpop.permute.xlu2 %690  ;;  %v545_v24 = vrot.slane %v544_v21, 2 }
 0x17b   :  { %v692_v3 = vrot.slane %v2229_v23, 2 }
 0x17c   :  { %v526_v30 = vsel %vm525_vm9, %v523_v20, %v524_v22  ;;  %v547_v35 = vsel %vm546_vm10, %v544_v21, %v545_v24  ;;  %v1035_v20 = vstv %s2278_s9  ;;  %v1046_v24 = vmul.f32 %v1045_v18, %v2139_v51  ;;  %s2374_s9 = sld [smem:[#allocation6 + $0x56]] }
 0x17d   :  { %v528_v31 = vadd.f32 %v526_v30, %v507_v19  ;;  %v694_v11 = vsel %vm2775_vm3, %v2229_v23, %v692_v3  ;;  %v1056_v19 = vstv %s2275_s8  ;;  %vm2777_vm3 = vcmask 670720   ;;  %s1997_s8 = smov 18  }
 0x17e   :  { %v1057_v25 = vmul.f32 %v1056_v19, %v2185_v32  ;;  %v1036_v27 = vmul.f32 %v1035_v20, %v2185_v32 }
 0x17f   :  { %v549_v37 = vadd.f32 %v547_v35, %v528_v31  ;;  %954 = vrot.lane.b32.xlu0 %v952_v33, %s1987_s4  ;;  %964 = vrot.lane.b32.xlu1 %v962_v34, %s1988_s25 }
 0x180   :  { %943 = vrot.lane.b32.xlu2 %v941_v36, %s1987_s4 }
 0x181   :  { %v586_v39 = vpop.permute.xlu1 %585  ;;  %v570_v40 = vadd.f32 %v568_v38, %v549_v37  ;;  %v607_v41 = vpop.permute.xlu0 %606  ;;  %v1077_v38 = vstv %s2289_s28  ;;  %s1998_s28 = smov 17  }
 0x182   :  { %v587_v42 = vrot.slane %v586_v39, 2  ;;  %v2251_v43 = vpop.permute.xlu2 %755  ;;  %v608_v44 = vrot.slane %v607_v41, 2 }
 0x183   :  { %v757_v21 = vrot.slane %v2251_v43, 2 }
 0x184   :  { %v589_v49 = vsel %vm588_vm13, %v586_v39, %v587_v42  ;;  %v610_v54 = vsel %vm609_vm14, %v607_v41, %v608_v44  ;;  %v1087_v39 = vstv %s2295_s20  ;;  %v1078_v44 = vmul.f32 %v1077_v38, %v2185_v32  ;;  %s2393_s20 = sld [smem:[#allocation6 + $0x27]] }
 0x185   :  { %v591_v50 = vadd.f32 %v589_v49, %v570_v40  ;;  %v759_v30 = vsel %vm2777_vm3, %v2251_v43, %v757_v21  ;;  %v1066_v40 = vstv %s2298_s14  ;;  %vm820_vm3 = vcmask 646144   ;;  %s2399_s14 = sld [smem:[#allocation6 + $0x58]] }
 0x186   :  { %v1088_v45 = vmul.f32 %v1087_v39, %v2139_v51  ;;  %v1067_v47 = vmul.f32 %v1066_v40, %v2139_v51 }
 0x187   :  { %v612_v55 = vadd.f32 %v610_v54, %v591_v50  ;;  %985 = vrot.lane.b32.xlu0 %v983_v52, %s1989_s10  ;;  %996 = vrot.lane.b32.xlu1 %v994_v53, %s1989_s10  ;;  %v431_v50 = vstv %s2309_s15  ;;  %s2364_s10 = sld [smem:[#allocation6 + $0x54]]  ;;  %s1999_s15 = smov 16  }
 0x188   :  { %975 = vrot.lane.b32.xlu2 %v973_v29, %s1988_s25  ;;  %v1108_v29 = vstv %s2311_s26  ;;  %s2343_s25 = sld [smem:[#allocation6 + $0x22]]  ;;  %s2000_s26 = smov 15  }
 0x189   :  { %v649_v57 = vpop.permute.xlu1 %648  ;;  %v633_v58 = vadd.f32 %v631_v56, %v612_v55  ;;  %v670_v59 = vpop.permute.xlu0 %669  ;;  %v1109_v3 = vmul.f32 %v1108_v29, %v2139_v51 }
 0x18a   :  { %v650_v60 = vrot.slane %v649_v57, 2  ;;  %v2271_v61 = vpop.permute.xlu2 %817  ;;  %v671_v62 = vrot.slane %v670_v59, 2 }
 0x18b   :  { %v819_v41 = vrot.slane %v2271_v61, 2 }
 0x18c   :  { %v652_v4 = vsel %vm651_vm0, %v649_v57, %v650_v60  ;;  %v673_v8 = vsel %vm672_vm1, %v670_v59, %v671_v62  ;;  %v1119_v59 = vstv %s2317_s12  ;;  %v432_v60 = vmul.f32 %v431_v50, %v2153_v0  ;;  %s2414_s12 = sld [smem:[#allocation6 + $0x59]] }
 0x18d   :  { %v654_v5 = vadd.f32 %v652_v4, %v633_v58  ;;  %v821_v49 = vsel %vm820_vm3, %v2271_v61, %v819_v41  ;;  %v1098_v61 = vstv %s2320_s13  ;;  %v1120_v4 = vmul.f32 %v1119_v59, %v2185_v32  ;;  %s2420_s13 = sld [smem:[#allocation6 + $0x29]] }
 0x18e   :  { %v1099_v0 = vmul.f32 %v1098_v61, %v2185_v32  ;;  %v1203_v50 = vstv %s2374_s9  ;;  %s2491_s9 = sld [smem:[#allocation6 + $0x5d]] }
 0x18f   :  { %v675_v10 = vadd.f32 %v673_v8, %v654_v5  ;;  %1017 = vrot.lane.b32.xlu0 %v1015_v6, %s1990_s0  ;;  %1027 = vrot.lane.b32.xlu1 %v1025_v7, %s1991_s7 }
 0x190   :  { %1006 = vrot.lane.b32.xlu2 %v1004_v9, %s1990_s0  ;;  %s2380_s0 = sld [smem:[#allocation6 + $0x26]] }
 0x191   :  { %v713_v12 = vpop.permute.xlu1 %712  ;;  %v696_v13 = vadd.f32 %v694_v11, %v675_v10  ;;  %v735_v14 = vpop.permute.xlu0 %734 }
 0x192   :  { %v2291_v15 = vpop.permute.xlu2 %470  ;;  %v714_v16 = vrot.slane %v713_v12, 2  ;;  %v736_v17 = vrot.slane %v735_v14, 2 }
 0x193   :  { %v472_v55 = vrot.slane %v2291_v15, 2 }
 0x194   :  { %v716_v22 = vsel %vm715_vm2, %v713_v12, %v714_v16  ;;  %v738_v26 = vsel %vm2776_vm7, %v735_v14, %v736_v17  ;;  %vm799_vm7 = vcmask 654336   ;;  %v1140_v12 = vstv %s2333_s1  ;;  %s2001_s1 = smov 14  }
 0x195   :  { %v718_v23 = vadd.f32 %v716_v22, %v696_v13  ;;  %v473_v5 = vsel %vm462_vm5, %v2291_v15, %v472_v55  ;;  %v1150_v13 = vstv %s2339_s21  ;;  %v1129_v14 = vstv %s2343_s25  ;;  %s2435_s21 = sld [smem:[#allocation6 + $0x2a]] }
 0x196   :  { %v1141_v18 = vmul.f32 %v1140_v12, %v2185_v32  ;;  %v1151_v19 = vmul.f32 %v1150_v13, %v2139_v51  ;;  %v1130_v21 = vmul.f32 %v1129_v14, %v2139_v51  ;;  %s2441_s25 = sld [smem:[#allocation6 + $0x5b]]  ;;  %vm2786_vm5 = vcmask 662528  }
 0x197   :  { %v740_v28 = vadd.f32 %v738_v26, %v718_v23  ;;  %1048 = vrot.lane.b32.xlu0 %v1046_v24, %s1992_s11  ;;  %1059 = vrot.lane.b32.xlu1 %v1057_v25, %s1992_s11  ;;  %s2402_s11 = sld [smem:[#allocation6 + $0x57]] }
 0x198   :  { %1038 = vrot.lane.b32.xlu2 %v1036_v27, %s1991_s7  ;;  %s2383_s7 = sld [smem:[#allocation6 + $0x25]] }
 0x199   :  { %v777_v31 = vpop.permute.xlu1 %776  ;;  %v761_v33 = vadd.f32 %v759_v30, %v740_v28  ;;  %v797_v34 = vpop.permute.xlu0 %796 }
 0x19a   :  { %v2313_v35 = vpop.permute.xlu2 %533  ;;  %v778_v36 = vrot.slane %v777_v31, 2  ;;  %v798_v37 = vrot.slane %v797_v34, 2 }
 0x19b   :  { %v535_v15 = vrot.slane %v2313_v35, 2 }
 0x19c   :  { %v779_v42 = vsel %vm2778_vm12, %v777_v31, %v778_v36  ;;  %v800_v46 = vsel %vm799_vm7, %v797_v34, %v798_v37  ;;  %vm841_vm12 = vcmask 637952   ;;  %v1171_v31 = vstv %s2355_s5  ;;  %s2002_s5 = smov 12  }
 0x19d   :  { %v781_v43 = vadd.f32 %v779_v42, %v761_v33  ;;  %v536_v23 = vsel %vm525_vm9, %v2313_v35, %v535_v15  ;;  %v1182_v33 = vstv %s2361_s29  ;;  %v1161_v34 = vstv %s2364_s10  ;;  %s2456_s29 = sld [smem:[#allocation6 + $0x5c]] }
 0x19e   :  { %v1172_v38 = vmul.f32 %v1171_v31, %v2139_v51  ;;  %v1183_v39 = vmul.f32 %v1182_v33, %v2185_v32  ;;  %v1162_v41 = vmul.f32 %v1161_v34, %v2185_v32  ;;  %s2458_s10 = sld [smem:[#allocation6 + $0x2c]] }
 0x19f   :  { %v802_v48 = vadd.f32 %v800_v46, %v781_v43  ;;  %1080 = vrot.lane.b32.xlu0 %v1078_v44, %s1993_s16  ;;  %1090 = vrot.lane.b32.xlu1 %v1088_v45, %s1994_s23 }
 0x1a0   :  { %1069 = vrot.lane.b32.xlu2 %v1067_v47, %s1993_s16  ;;  %s2423_s16 = sld [smem:[#allocation6 + $0x28]] }
 0x1a1   :  { %v839_v52 = vpop.permute.xlu1 %838  ;;  %v823_v53 = vadd.f32 %v821_v49, %v802_v48  ;;  %v450_v54 = vpop.permute.xlu0 %449 }
 0x1a2   :  { %v2336_v56 = vpop.permute.xlu2 %596  ;;  %v840_v57 = vrot.slane %v839_v52, 2  ;;  %v451_v58 = vrot.slane %v450_v54, 2 }
 0x1a3   :  { %v598_v36 = vrot.slane %v2336_v56, 2 }
 0x1a4   :  { %v842_v62 = vsel %vm841_vm12, %v839_v52, %v840_v57  ;;  %v452_v63 = vsel %vm441_vm4, %v450_v54, %v451_v58  ;;  %v1213_v52 = vstv %s2380_s0  ;;  %vm2783_vm4 = vcmask 818176   ;;  %s2505_s0 = sld [smem:[#allocation6 + $0x5f]] }
 0x1a5   :  { %v2347_v1 = vadd.f32 %v842_v62, %v823_v53  ;;  %v454_v2 = vadd.f32 %v452_v63, %v432_v60  ;;  %v599_v43 = vsel %vm588_vm13, %v2336_v56, %v598_v36  ;;  %v1192_v53 = vstv %s2383_s7  ;;  %s2511_s7 = sld [smem:[#allocation6 + $0x2f]] }
 0x1a6   :  { %v1204_v56 = vmul.f32 %v1203_v50, %v2185_v32  ;;  %v1214_v57 = vmul.f32 %v1213_v52, %v2139_v51  ;;  %v1193_v59 = vmul.f32 %v1192_v53, %v2139_v51  ;;  %vm967_vm13 = vcmask 465920  }
 0x1a7   :  { %v475_v6 = vadd.f32 %v473_v5, %v454_v2  ;;  %1111 = vrot.lane.b32.xlu0 %v1109_v3, %s1995_s24  ;;  %1122 = vrot.lane.b32.xlu1 %v1120_v4, %s1995_s24  ;;  %s2444_s24 = sld [smem:[#allocation6 + $0x5a]] }
 0x1a8   :  { %1101 = vrot.lane.b32.xlu2 %v1099_v0, %s1994_s23  ;;  %v1234_v0 = vstv %s2393_s20  ;;  %s2523_s20 = sld [smem:[#allocation6 + $0x30]] }
 0x1a9   :  { %v492_v7 = vpop.permute.xlu1 %491  ;;  %v513_v8 = vpop.permute.xlu0 %512 }
 0x1aa   :  { %v2357_v9 = vpop.permute.xlu2 %659  ;;  %v493_v10 = vrot.slane %v492_v7, 2  ;;  %v514_v11 = vrot.slane %v513_v8, 2 }
 0x1ab   :  { %v661_v54 = vrot.slane %v2357_v9, 2 }
 0x1ac   :  { %v494_v16 = vsel %vm483_vm6, %v492_v7, %v493_v10  ;;  %v515_v20 = vsel %vm504_vm8, %v513_v8, %v514_v11  ;;  %v1224_v7 = vstv %s2402_s11  ;;  %v1235_v11 = vmul.f32 %v1234_v0, %v2139_v51  ;;  %s2530_s11 = sld [smem:[#allocation6 + $0x60]] }
 0x1ad   :  { %v496_v17 = vadd.f32 %v494_v16, %v475_v6  ;;  %v662_v61 = vsel %vm651_vm0, %v2357_v9, %v661_v54  ;;  %v1245_v6 = vstv %s2399_s14  ;;  %v1225_v14 = vmul.f32 %v1224_v7, %v2185_v32  ;;  %s2527_s14 = sld [smem:[#allocation6 + $0x61]] }
 0x1ae   :  { %v1246_v12 = vmul.f32 %v1245_v6, %v2185_v32  ;;  %vm925_vm6 = vcmask 482304   ;;  %vm1030_vm0 = vcmask 318464  }
 0x1af   :  { %v517_v22 = vadd.f32 %v515_v20, %v496_v17  ;;  %1143 = vrot.lane.b32.xlu0 %v1141_v18, %s1996_s6  ;;  %1153 = vrot.lane.b32.xlu1 %v1151_v19, %s1997_s8 }
 0x1b0   :  { %1132 = vrot.lane.b32.xlu2 %v1130_v21, %s1996_s6  ;;  %s2469_s6 = sld [smem:[#allocation6 + $0x2b]] }
 0x1b1   :  { %v555_v24 = vpop.permute.xlu1 %554  ;;  %v538_v25 = vadd.f32 %v536_v23, %v517_v22  ;;  %v576_v26 = vpop.permute.xlu0 %575  ;;  %v1265_v23 = vstv %s2414_s12  ;;  %s2005_s12 = smov 119  }
 0x1b2   :  { %v2376_v27 = vpop.permute.xlu2 %724  ;;  %v556_v28 = vrot.slane %v555_v24, 2  ;;  %v577_v30 = vrot.slane %v576_v26, 2 }
 0x1b3   :  { %v726_v8 = vrot.slane %v2376_v27, 2 }
 0x1b4   :  { %v557_v35 = vsel %vm546_vm10, %v555_v24, %v556_v28  ;;  %v578_v40 = vsel %vm567_vm11, %v576_v26, %v577_v30  ;;  %v1275_v24 = vstv %s2420_s13  ;;  %v1266_v30 = vmul.f32 %v1265_v23, %v2185_v32  ;;  %s2006_s13 = smov 118  }
 0x1b5   :  { %v559_v37 = vadd.f32 %v557_v35, %v538_v25  ;;  %v727_v16 = vsel %vm715_vm2, %v2376_v27, %v726_v8  ;;  %v1255_v25 = vstv %s2423_s16  ;;  %v1276_v31 = vmul.f32 %v1275_v24, %v2139_v51  ;;  %s2007_s16 = smov 110  }
 0x1b6   :  { %vm2785_vm2 = vcmask 670720   ;;  %v1256_v34 = vmul.f32 %v1255_v25, %v2139_v51  ;;  %vm946_vm11 = vcmask 474112  }
 0x1b7   :  { %v580_v42 = vadd.f32 %v578_v40, %v559_v37  ;;  %1174 = vrot.lane.b32.xlu0 %v1172_v38, %s1998_s28  ;;  %1185 = vrot.lane.b32.xlu1 %v1183_v39, %s1998_s28  ;;  %s2514_s28 = sld [smem:[#allocation6 + $0x2e]] }
 0x1b8   :  { %1164 = vrot.lane.b32.xlu2 %v1162_v41, %s1997_s8  ;;  %s2488_s8 = sld [smem:[#allocation6 + $0x5e]] }
 0x1b9   :  { %v618_v44 = vpop.permute.xlu1 %617  ;;  %v601_v45 = vadd.f32 %v599_v43, %v580_v42  ;;  %v639_v46 = vpop.permute.xlu0 %638  ;;  %v2462_v42 = vld [vmem:[#allocation4 + $0x2] sm:$0x3f]  ;;  %v1297_v43 = vstv %s2435_s21  ;;  %s2008_s21 = smov 116  }
 0x1ba   :  { %v2395_v47 = vpop.permute.xlu2 %786  ;;  %v619_v48 = vrot.slane %v618_v44, 2  ;;  %v640_v49 = vrot.slane %v639_v46, 2  ;;  %v1298_v50 = vmul.f32 %v1297_v43, %v2462_v42 }
 0x1bb   :  { %v788_v26 = vrot.slane %v2395_v47, 2 }
 0x1bc   :  { %v620_v29 = vsel %vm609_vm14, %v618_v44, %v619_v48  ;;  %v641_v58 = vsel %vm630_vm15, %v639_v46, %v640_v49  ;;  %v2465_v44 = vld [vmem:[#allocation5 + $0x2] sm:$0x3f]  ;;  %v1286_v46 = vstv %s2444_s24  ;;  %vm988_vm14 = vcmask 457728   ;;  %s2010_s24 = smov 76  }
 0x1bd   :  { %v622_v55 = vadd.f32 %v620_v29, %v601_v45  ;;  %v789_v35 = vsel %vm2786_vm5, %v2395_v47, %v788_v26  ;;  %v1308_v45 = vstv %s2441_s25  ;;  %v1287_v54 = vmul.f32 %v1286_v46, %v2185_v32  ;;  %s2009_s25 = smov 98  }
 0x1be   :  { %v1309_v52 = vmul.f32 %v1308_v45, %v2465_v44  ;;  %vm1009_vm15 = vcmask 326656   ;;  %vm1114_vm5 = vcmask 285696  }
 0x1bf   :  { %v643_v60 = vadd.f32 %v641_v58, %v622_v55  ;;  %1206 = vrot.lane.b32.xlu0 %v1204_v56, %s1999_s15  ;;  %1216 = vrot.lane.b32.xlu1 %v1214_v57, %s2000_s26 }
 0x1c0   :  { %1195 = vrot.lane.b32.xlu2 %v1193_v59, %s1999_s15  ;;  %v1328_v59 = vstv %s2456_s29 }
 0x1c1   :  { %v681_v62 = vpop.permute.xlu1 %680  ;;  %v664_v63 = vadd.f32 %v662_v61, %v643_v60  ;;  %v702_v2 = vpop.permute.xlu0 %701  ;;  %v1329_v6 = vmul.f32 %v1328_v59, %v2465_v44 }
 0x1c2   :  { %v2416_v3 = vpop.permute.xlu2 %849  ;;  %v682_v4 = vrot.slane %v681_v62, 2  ;;  %v703_v5 = vrot.slane %v702_v2, 2 }
 0x1c3   :  { %v851_v47 = vrot.slane %v2416_v3, 2 }
 0x1c4   :  { %v683_v9 = vsel %vm672_vm1, %v681_v62, %v682_v4  ;;  %v704_v13 = vsel %vm2783_vm4, %v702_v2, %v703_v5  ;;  %vm2784_vm1 = vcmask 678912   ;;  %v1318_v2 = vstv %s2469_s6 }
 0x1c5   :  { %v685_v10 = vadd.f32 %v683_v9, %v664_v63  ;;  %v852_v55 = vsel %vm841_vm12, %v2416_v3, %v851_v47  ;;  %v1338_v63 = vstv %s2458_s10  ;;  %v1319_v9 = vmul.f32 %v1318_v2, %v2462_v42  ;;  %s2018_s10 = smov 2  }
 0x1c6   :  { %v1339_v7 = vmul.f32 %v1338_v63, %v2462_v42  ;;  %vm904_vm12 = vcmask 490496   ;;  %vm1051_vm4 = vcmask 310272  }
 0x1c7   :  { %v706_v15 = vadd.f32 %v704_v13, %v685_v10  ;;  %1237 = vrot.lane.b32.xlu0 %v1235_v11, %s2001_s1  ;;  %1248 = vrot.lane.b32.xlu1 %v1246_v12, %s2001_s1 }
 0x1c8   :  { %1227 = vrot.lane.b32.xlu2 %v1225_v14, %s2000_s26  ;;  %s2004_s26 = smov 120  }
 0x1c9   :  { %v746_v17 = vpop.permute.xlu1 %745  ;;  %v729_v18 = vadd.f32 %v727_v16, %v706_v15  ;;  %v767_v19 = vpop.permute.xlu0 %766 }
 0x1ca   :  { %v2437_v20 = vpop.permute.xlu2 %880  ;;  %v747_v21 = vrot.slane %v746_v17, 2  ;;  %v768_v22 = vrot.slane %v767_v19, 2 }
 0x1cb   :  { %v882_v32 = vrot.slane %v2437_v20, 2 }
 0x1cc   :  { %v748_v27 = vsel %vm2784_vm1, %v746_v17, %v747_v21  ;;  %v769_v33 = vsel %vm2785_vm2, %v767_v19, %v768_v22  ;;  %v1369_v17 = vstv %s2488_s8  ;;  %vm1072_vm1 = vcmask 302080  }
 0x1cd   :  { %v750_v28 = vadd.f32 %v748_v27, %v729_v18  ;;  %v1348_v18 = vstv %s2491_s9  ;;  %v1370_v24 = vmul.f32 %v1369_v17, %v2465_v44  ;;  %vm1093_vm2 = vcmask 293888  }
 0x1ce   :  { %v1349_v26 = vmul.f32 %v1348_v18, %v2465_v44 }
 0x1cf   :  { %v771_v36 = vadd.f32 %v769_v33, %v750_v28  ;;  %1268 = vrot.lane.b32.xlu0 %v1266_v30, %s1961_s30  ;;  %1278 = vrot.lane.b32.xlu1 %v1276_v31, %s2002_s5  ;;  %v1390_v31 = vstv %s2505_s0 }
 0x1d0   :  { %1258 = vrot.lane.b32.xlu2 %v1256_v34, %s1961_s30  ;;  %s2482_s30 = sld [smem:[#allocation6 + $0x2d]]  ;;  %v1391_v43 = vmul.f32 %v1390_v31, %v2465_v44 }
 0x1d1   :  { %v808_v37 = vpop.permute.xlu1 %807  ;;  %v791_v38 = vadd.f32 %v789_v35, %v771_v36  ;;  %v829_v39 = vpop.permute.xlu0 %828 }
 0x1d2   :  { %v2460_v51 = vpop.permute.xlu2 %912  ;;  %v809_v40 = vrot.slane %v808_v37, 2  ;;  %v830_v41 = vrot.slane %v829_v39, 2 }
 0x1d3   :  { %v914_v13 = vrot.slane %v2460_v51, 2 }
 0x1d4   :  { %v810_v48 = vsel %vm799_vm7, %v808_v37, %v809_v40  ;;  %v831_v53 = vsel %vm820_vm3, %v829_v39, %v830_v41  ;;  %vm862_vm7 = vcmask 506880   ;;  %vm883_vm3 = vcmask 498688  }
 0x1d5   :  { %v812_v49 = vadd.f32 %v810_v48, %v791_v38  ;;  %v884_v8 = vsel %vm883_vm3, %v2437_v20, %v882_v32  ;;  %v915_v25 = vsel %vm904_vm12, %v2460_v51, %v914_v13  ;;  %v1400_v37 = vstv %s2511_s7 }
 0x1d6   :  { %v1358_v12 = vstv %s2482_s30  ;;  %v1379_v38 = vstv %s2514_s28  ;;  %v1401_v45 = vmul.f32 %v1400_v37, %v2462_v42 }
 0x1d7   :  { %v833_v29 = vadd.f32 %v831_v53, %v812_v49  ;;  %1300 = vrot.lane.b32.xlu0 %v1298_v50, %s1970_s19  ;;  %1311 = vrot.lane.b32.xlu1 %v1309_v52, %s1970_s19  ;;  %v1359_v23 = vmul.f32 %v1358_v12, %v2462_v42  ;;  %v1380_v47 = vmul.f32 %v1379_v38, %v2462_v42  ;;  %v1421_v52 = vstv %s2523_s20 }
 0x1d8   :  { %1289 = vrot.lane.b32.xlu2 %v1287_v54, %s2002_s5  ;;  %s2011_s5 = smov 54  }
 0x1d9   :  { %v871_v56 = vpop.permute.xlu1 %870  ;;  %v854_v57 = vadd.f32 %v852_v55, %v833_v29  ;;  %v860_v58 = vpop.permute.xlu0 %859 }
 0x1da   :  { %v2485_v60 = vpop.permute.xlu2 %943  ;;  %v872_v61 = vrot.slane %v871_v56, 2  ;;  %v861_v62 = vrot.slane %v860_v58, 2 }
 0x1db   :  { %v945_v33 = vrot.slane %v2485_v60, 2 }
 0x1dc   :  { %v873_v3 = vsel %vm862_vm7, %v871_v56, %v872_v61  ;;  %v863_v4 = vsel %vm862_vm7, %v860_v58, %v861_v62  ;;  %v1432_v56 = vstv %s2527_s14  ;;  %v1422_v61 = vmul.f32 %v1421_v52, %v2462_v42 }
 0x1dd   :  { %v875_v5 = vadd.f32 %v873_v3, %v854_v57  ;;  %v865_v0 = vadd.f32 %v863_v4, %v2347_v1  ;;  %v947_v46 = vsel %vm946_vm11, %v2485_v60, %v945_v33  ;;  %v1411_v57 = vstv %s2530_s11 }
 0x1de   :  { %v1433_v62 = vmul.f32 %v1432_v56, %v2465_v44  ;;  %v1412_v2 = vmul.f32 %v1411_v57, %v2465_v44  ;;  %vm1135_vm7 = vcmask 277504  }
 0x1df   :  { %1331 = vrot.lane.b32.xlu0 %v1329_v6, %s1958_s27  ;;  %1341 = vrot.lane.b32.xlu1 %v1339_v7, %s1969_s18  ;;  %v886_v10 = vadd.f32 %v884_v8, %v865_v0 }
 0x1e0   :  { %1321 = vrot.lane.b32.xlu2 %v1319_v9, %s1958_s27  ;;  %s2003_s27 = smov 121  }
 0x1e1   :  { %v902_v11 = vpop.permute.xlu1 %901  ;;  %v892_v1 = vpop.permute.xlu0 %891 }
 0x1e2   :  { %v2508_v14 = vpop.permute.xlu2 %975  ;;  %v903_v15 = vrot.slane %v902_v11, 2  ;;  %v893_v16 = vrot.slane %v892_v1, 2 }
 0x1e3   :  { %v977_v53 = vrot.slane %v2508_v14, 2 }
 0x1e4   :  { %v905_v19 = vsel %vm904_vm12, %v902_v11, %v903_v15  ;;  %v894_v20 = vsel %vm883_vm3, %v892_v1, %v893_v16  ;;  %vm1156_vm3 = vcmask 146432   ;;  %vm1177_vm12 = vcmask 138240  }
 0x1e5   :  { %v907_v21 = vadd.f32 %v905_v19, %v886_v10  ;;  %v896_v22 = vadd.f32 %v894_v20, %v875_v5  ;;  %v978_v63 = vsel %vm967_vm13, %v2508_v14, %v977_v53 }
 0x1e7   :  { %1361 = vrot.lane.b32.xlu0 %v1359_v23, %s2003_s27  ;;  %1372 = vrot.lane.b32.xlu1 %v1370_v24, %s2003_s27  ;;  %v917_v27 = vadd.f32 %v915_v25, %v896_v22 }
 0x1e8   :  { %1351 = vrot.lane.b32.xlu2 %v1349_v26, %s1969_s18 }
 0x1e9   :  { %v934_v28 = vpop.permute.xlu1 %933  ;;  %v923_v30 = vpop.permute.xlu0 %922 }
 0x1ea   :  { %v1007_v34 = vpop.permute.xlu2 %1006  ;;  %v935_v36 = vrot.slane %v934_v28, 2  ;;  %v924_v35 = vrot.slane %v923_v30, 2 }
 0x1eb   :  { %v1008_v0 = vrot.slane %v1007_v34, 2 }
 0x1ec   :  { %v936_v39 = vsel %vm925_vm6, %v934_v28, %v935_v36  ;;  %v926_v51 = vsel %vm925_vm6, %v923_v30, %v924_v35  ;;  %vm1198_vm6 = vcmask 130048  }
 0x1ed   :  { %v938_v40 = vadd.f32 %v936_v39, %v917_v27  ;;  %v928_v41 = vadd.f32 %v926_v51, %v907_v21  ;;  %v1010_v1 = vsel %vm1009_vm15, %v1007_v34, %v1008_v0 }
 0x1ef   :  { %1393 = vrot.lane.b32.xlu0 %v1391_v43, %s2004_s26  ;;  %1403 = vrot.lane.b32.xlu1 %v1401_v45, %s2005_s12  ;;  %v949_v48 = vadd.f32 %v947_v46, %v928_v41 }
 0x1f0   :  { %1382 = vrot.lane.b32.xlu2 %v1380_v47, %s2004_s26 }
 0x1f1   :  { %v965_v49 = vpop.permute.xlu1 %964  ;;  %v955_v50 = vpop.permute.xlu0 %954 }
 0x1f2   :  { %v2541_v54 = vpop.permute.xlu2 %1038  ;;  %v966_v29 = vrot.slane %v965_v49, 2  ;;  %v956_v55 = vrot.slane %v955_v50, 2 }
 0x1f3   :  { %v1040_v51 = vrot.slane %v2541_v54, 2 }
 0x1f4   :  { %v968_v58 = vsel %vm967_vm13, %v965_v49, %v966_v29  ;;  %v957_v59 = vsel %vm946_vm11, %v955_v50, %v956_v55  ;;  %vm1219_vm11 = vcmask 121856   ;;  %vm1240_vm13 = vcmask 113664  }
 0x1f5   :  { %v970_v32 = vadd.f32 %v968_v58, %v949_v48  ;;  %v959_v60 = vadd.f32 %v957_v59, %v938_v40  ;;  %v1041_v47 = vsel %vm1030_vm0, %v2541_v54, %v1040_v51 }
 0x1f7   :  { %1424 = vrot.lane.b32.xlu0 %v1422_v61, %s2006_s13  ;;  %1435 = vrot.lane.b32.xlu1 %v1433_v62, %s2006_s13  ;;  %v980_v3 = vadd.f32 %v978_v63, %v959_v60 }
 0x1f8   :  { %1414 = vrot.lane.b32.xlu2 %v1412_v2, %s2005_s12 }
 0x1f9   :  { %v997_v4 = vpop.permute.xlu1 %996  ;;  %v986_v5 = vpop.permute.xlu0 %985 }
 0x1fa   :  { %v1070_v6 = vpop.permute.xlu2 %1069  ;;  %v998_v7 = vrot.slane %v997_v4, 2  ;;  %v987_v8 = vrot.slane %v986_v5, 2 }
 0x1fb   :  { %v1071_v53 = vrot.slane %v1070_v6, 2 }
 0x1fc   :  { %v999_v42 = vsel %vm988_vm14, %v997_v4, %v998_v7  ;;  %v989_v9 = vsel %vm988_vm14, %v986_v5, %v987_v8  ;;  %vm2787_vm14 = vcmask 105472  }
 0x1fd   :  { %v1001_v10 = vadd.f32 %v999_v42, %v980_v3  ;;  %v991_v11 = vadd.f32 %v989_v9, %v970_v32  ;;  %v1073_v61 = vsel %vm1072_vm1, %v1070_v6, %v1071_v53 }
 0x1ff   :  { %v1012_v12 = vadd.f32 %v1010_v1, %v991_v11 }
 0x201   :  { %v1028_v44 = vpop.permute.xlu1 %1027  ;;  %v1018_v13 = vpop.permute.xlu0 %1017 }
 0x202   :  { %v1102_v14 = vpop.permute.xlu2 %1101  ;;  %v1029_v15 = vrot.slane %v1028_v44, 2  ;;  %v1019_v16 = vrot.slane %v1018_v13, 2 }
 0x203   :  { %v1103_v58 = vrot.slane %v1102_v14, 2 }
 0x204   :  { %v1031_v17 = vsel %vm1030_vm0, %v1028_v44, %v1029_v15  ;;  %v1020_v18 = vsel %vm1009_vm15, %v1018_v13, %v1019_v16  ;;  %vm1281_vm15 = vcmask 97280   ;;  %vm2788_vm0 = vmmov %vm2787_vm14 }
 0x205   :  { %v1033_v19 = vadd.f32 %v1031_v17, %v1012_v12  ;;  %v1022_v20 = vadd.f32 %v1020_v18, %v1001_v10  ;;  %v1104_v4 = vsel %vm1093_vm2, %v1102_v14, %v1103_v58 }
 0x207   :  { %v1043_v52 = vadd.f32 %v1041_v47, %v1022_v20 }
 0x209   :  { %v1060_v21 = vpop.permute.xlu1 %1059  ;;  %v1049_v22 = vpop.permute.xlu0 %1048 }
 0x20a   :  { %v2551_v23 = vpop.permute.xlu2 %1132  ;;  %v1061_v40 = vrot.slane %v1060_v21, 2  ;;  %v1050_v41 = vrot.slane %v1049_v22, 2 }
 0x20b   :  { %v1134_v42 = vrot.slane %v2551_v23, 2 }
 0x20c   :  { %v1062_v48 = vsel %vm1051_vm4, %v1060_v21, %v1061_v40  ;;  %v1052_v49 = vsel %vm1051_vm4, %v1049_v22, %v1050_v41  ;;  %vm1364_vm4 = vcmask 990208  }
 0x20d   :  { %v1064_v56 = vadd.f32 %v1062_v48, %v1043_v52  ;;  %v1054_v57 = vadd.f32 %v1052_v49, %v1033_v19  ;;  %v1136_v14 = vsel %vm1135_vm7, %v2551_v23, %v1134_v42 }
 0x20f   :  { %v1075_v63 = vadd.f32 %v1073_v61, %v1054_v57 }
 0x211   :  { %v1091_v24 = vpop.permute.xlu1 %1090  ;;  %v1081_v25 = vpop.permute.xlu0 %1080 }
 0x212   :  { %v2553_v26 = vpop.permute.xlu2 %1164  ;;  %v1082_v43 = vrot.slane %v1081_v25, 2  ;;  %v1092_v29 = vrot.slane %v1091_v24, 2 }
 0x213   :  { %v1166_v12 = vrot.slane %v2553_v26, 2 }
 0x214   :  { %v1083_v55 = vsel %vm1072_vm1, %v1081_v25, %v1082_v43  ;;  %v1094_v62 = vsel %vm1093_vm2, %v1091_v24, %v1092_v29  ;;  %vm1427_vm1 = vcmask 965632  }
 0x215   :  { %v1085_v60 = vadd.f32 %v1083_v55, %v1064_v56  ;;  %v1096_v7 = vadd.f32 %v1094_v62, %v1075_v63  ;;  %v1167_v21 = vsel %vm1156_vm3, %v2553_v26, %v1166_v12 }
 0x217   :  { %v1106_v8 = vadd.f32 %v1104_v4, %v1085_v60 }
 0x219   :  { %v1123_v27 = vpop.permute.xlu1 %1122  ;;  %v1112_v28 = vpop.permute.xlu0 %1111 }
 0x21a   :  { %v2555_v30 = vpop.permute.xlu2 %1195  ;;  %v1124_v59 = vrot.slane %v1123_v27, 2  ;;  %v1113_v32 = vrot.slane %v1112_v28, 2 }
 0x21c   :  { %v1125_v5 = vsel %vm1114_vm5, %v1123_v27, %v1124_v59  ;;  %v1115_v0 = vsel %vm1114_vm5, %v1112_v28, %v1113_v32  ;;  %v1197_v28 = vrot.slane %v2555_v30, 2 }
 0x21d   :  { %v1127_v1 = vadd.f32 %v1125_v5, %v1106_v8  ;;  %v1117_v6 = vadd.f32 %v1115_v0, %v1096_v7 }
 0x21f   :  { %v1138_v18 = vadd.f32 %v1136_v14, %v1117_v6 }
 0x221   :  { %v1154_v31 = vpop.permute.xlu1 %1153  ;;  %v1144_v33 = vpop.permute.xlu0 %1143 }
 0x222   :  { %v2557_v34 = vpop.permute.xlu2 %1227  ;;  %v1145_v54 = vrot.slane %v1144_v33, 2  ;;  %v1155_v9 = vrot.slane %v1154_v31, 2 }
 0x223   :  { %v1229_v40 = vrot.slane %v2557_v34, 2 }
 0x224   :  { %v1146_v10 = vsel %vm1135_vm7, %v1144_v33, %v1145_v54  ;;  %v1157_v16 = vsel %vm1156_vm3, %v1154_v31, %v1155_v9  ;;  %vm1466_vm3 = vcmask 1040384  }
 0x225   :  { %v1148_v15 = vadd.f32 %v1146_v10, %v1127_v1  ;;  %v1159_v25 = vadd.f32 %v1157_v16, %v1138_v18  ;;  %v1230_v53 = vsel %vm1219_vm11, %v2557_v34, %v1229_v40 }
 0x227   :  { %v1169_v27 = vadd.f32 %v1167_v21, %v1148_v15 }
 0x229   :  { %v1186_v36 = vpop.permute.xlu1 %1185  ;;  %v1175_v35 = vpop.permute.xlu0 %1174 }
 0x22a   :  { %v2559_v37 = vpop.permute.xlu2 %1258  ;;  %v1187_v44 = vrot.slane %v1186_v36, 2  ;;  %v1176_v13 = vrot.slane %v1175_v35, 2 }
 0x22b   :  { %v1260_v58 = vrot.slane %v2559_v37, 2 }
 0x22c   :  { %v1188_v22 = vsel %vm1177_vm12, %v1186_v36, %v1187_v44  ;;  %v1178_v24 = vsel %vm1177_vm12, %v1175_v35, %v1176_v13  ;;  %v1199_v35 = vsel %vm1198_vm6, %v2555_v30, %v1197_v28  ;;  %vm1468_vm12 = vcmask 1042434  }
 0x22d   :  { %v1190_v23 = vadd.f32 %v1188_v22, %v1169_v27  ;;  %v1180_v31 = vadd.f32 %v1178_v24, %v1159_v25 }
 0x22f   :  { %v1201_v49 = vadd.f32 %v1199_v35, %v1180_v31 }
 0x231   :  { %v2561_v38 = vpop.permute.xlu1 %1216  ;;  %v2563_v39 = vpop.permute.xlu0 %1206 }
 0x232   :  { %v2572_v50 = vpop.permute.xlu2 %1289  ;;  %v1208_v17 = vrot.slane %v2563_v39, 2  ;;  %v1218_v33 = vrot.slane %v2561_v38, 2 }
 0x233   :  { %v1291_v60 = vrot.slane %v2572_v50, 2 }
 0x234   :  { %v1209_v51 = vsel %vm1198_vm6, %v2563_v39, %v1208_v17  ;;  %v1220_v47 = vsel %vm1219_vm11, %v2561_v38, %v1218_v33  ;;  %vm1475_vm6 = vcmask 1042433  }
 0x235   :  { %v1211_v36 = vadd.f32 %v1209_v51, %v1190_v23  ;;  %v1222_v56 = vadd.f32 %v1220_v47, %v1201_v49 }
 0x237   :  { %v1232_v57 = vadd.f32 %v1230_v53, %v1211_v36 }
 0x239   :  { %v2566_v45 = vpop.permute.xlu1 %1248  ;;  %v2568_v46 = vpop.permute.xlu0 %1237 }
 0x23a   :  { %v2577_v11 = vpop.permute.xlu2 %1321  ;;  %v1250_v41 = vrot.slane %v2566_v45, 2  ;;  %v1239_v43 = vrot.slane %v2568_v46, 2 }
 0x23b   :  { %v1323_v10 = vrot.slane %v2577_v11, 2 }
 0x23c   :  { %v1251_v29 = vsel %vm1240_vm13, %v2566_v45, %v1250_v41  ;;  %v1241_v55 = vsel %vm1240_vm13, %v2568_v46, %v1239_v43  ;;  %v1261_v45 = vsel %vm2788_vm0, %v2559_v37, %v1260_v58  ;;  %vm2793_vm0 = vcmask 1041408  }
 0x23d   :  { %v1253_v59 = vadd.f32 %v1251_v29, %v1232_v57  ;;  %v1243_v32 = vadd.f32 %v1241_v55, %v1222_v56 }
 0x23f   :  { %v1263_v4 = vadd.f32 %v1261_v45, %v1243_v32 }
 0x241   :  { %v2574_v2 = vpop.permute.xlu1 %1278  ;;  %v1269_v3 = vpop.permute.xlu0 %1268 }
 0x242   :  { %v1352_v26 = vpop.permute.xlu2 %1351  ;;  %v1270_v48 = vrot.slane %v1269_v3, 2  ;;  %v1280_v30 = vrot.slane %v2574_v2, 2 }
 0x243   :  { %v1353_v12 = vrot.slane %v1352_v26, 2 }
 0x244   :  { %v1271_v38 = vsel %vm2787_vm14, %v1269_v3, %v1270_v48  ;;  %v1282_v46 = vsel %vm1281_vm15, %v2574_v2, %v1280_v30  ;;  %v1292_v3 = vsel %vm1281_vm15, %v2572_v50, %v1291_v60  ;;  %v1324_v50 = vsel %vm525_vm9, %v2577_v11, %v1323_v10 }
 0x245   :  { %v1273_v62 = vadd.f32 %v1271_v38, %v1253_v59  ;;  %v1284_v42 = vadd.f32 %v1282_v46, %v1263_v4  ;;  %v1480_v4 = vlaneseq  ;;  %vm2791_vm14 = vcmask 1041409  }
 0x246   :  { %vm2792_vm15 = vcmask 1043459  }
 0x247   :  { %v1294_v9 = vadd.f32 %v1292_v3, %v1273_v62  ;;  %vm2613_vm11 = vcmp.lt.s32.totalorder %v1480_v4, 16 }
 0x249   :  { %v1312_v19 = vpop.permute.xlu1 %1311  ;;  %v1301_v20 = vpop.permute.xlu0 %1300 }
 0x24a   :  { %v1313_v61 = vrot.slane %v1312_v19, 2  ;;  %v1302_v34 = vrot.slane %v1301_v20, 2  ;;  %v1383_v54 = vpop.permute.xlu2 %1382 }
 0x24b   :  { %v1384_v28 = vrot.slane %v1383_v54, 2 }
 0x24c   :  { %v1314_v7 = vsel %vm504_vm8, %v1312_v19, %v1313_v61  ;;  %v1303_v8 = vsel %vm504_vm8, %v1301_v20, %v1302_v34  ;;  %v1354_v19 = vsel %vm546_vm10, %v1352_v26, %v1353_v12  ;;  %vm1385_vm8 = vcmask 982016  }
 0x24d   :  { %v1316_v6 = vadd.f32 %v1314_v7, %v1294_v9  ;;  %v1305_v2 = vadd.f32 %v1303_v8, %v1284_v42  ;;  %v1386_v41 = vsel %vm1385_vm8, %v1383_v54, %v1384_v28 }
 0x24f   :  { %v1326_v16 = vadd.f32 %v1324_v50, %v1305_v2 }
 0x251   :  { %v1342_v52 = vpop.permute.xlu1 %1341  ;;  %v1332_v39 = vpop.permute.xlu0 %1331 }
 0x252   :  { %v1333_v63 = vrot.slane %v1332_v39, 2  ;;  %v1343_v1 = vrot.slane %v1342_v52, 2  ;;  %v1415_v24 = vpop.permute.xlu2 %1414 }
 0x253   :  { %v1416_v11 = vrot.slane %v1415_v24, 2 }
 0x254   :  { %v1334_v37 = vsel %vm525_vm9, %v1332_v39, %v1333_v63  ;;  %v1344_v14 = vsel %vm546_vm10, %v1342_v52, %v1343_v1  ;;  %vm1406_vm9 = vcmask 973824  }
 0x255   :  { %v1336_v15 = vadd.f32 %v1334_v37, %v1316_v6  ;;  %v1346_v25 = vadd.f32 %v1344_v14, %v1326_v16  ;;  %v1417_v47 = vsel %vm1406_vm9, %v1415_v24, %v1416_v11 }
 0x257   :  { %v1356_v27 = vadd.f32 %v1354_v19, %v1336_v15 }
 0x259   :  { %v1373_v5 = vpop.permute.xlu1 %1372  ;;  %v1362_v0 = vpop.permute.xlu0 %1361 }
 0x25a   :  { %v1374_v44 = vrot.slane %v1373_v5, 2  ;;  %v1363_v13 = vrot.slane %v1362_v0, 2 }
 0x25c   :  { %v1375_v20 = vsel %vm1364_vm4, %v1373_v5, %v1374_v44  ;;  %v1365_v21 = vsel %vm1364_vm4, %v1362_v0, %v1363_v13  ;;  %vm1492_vm4 = vcmp.ge.s32.totalorder %v1480_v4, 16 }
 0x25d   :  { %v1377_v23 = vadd.f32 %v1375_v20, %v1356_v27  ;;  %v1367_v31 = vadd.f32 %v1365_v21, %v1346_v25 }
 0x25f   :  { %v1388_v36 = vadd.f32 %v1386_v41, %v1367_v31 }
 0x261   :  { %v1404_v17 = vpop.permute.xlu1 %1403  ;;  %v1394_v18 = vpop.permute.xlu0 %1393 }
 0x262   :  { %v1395_v22 = vrot.slane %v1394_v18, 2  ;;  %v1405_v33 = vrot.slane %v1404_v17, 2 }
 0x264   :  { %v1396_v51 = vsel %vm1385_vm8, %v1394_v18, %v1395_v22  ;;  %v1407_v43 = vsel %vm1406_vm9, %v1404_v17, %v1405_v33  ;;  %vm1493_vm8 = vcmp.lt.s32.totalorder %v1480_v4, 32 }
 0x265   :  { %v1398_v40 = vadd.f32 %v1396_v51, %v1377_v23  ;;  %v1409_v52 = vadd.f32 %v1407_v43, %v1388_v36  ;;  %vm2644_vm9 = vmand %vm1492_vm4, %vm1493_vm8  ;;  %vm1554_vm8 = vcmp.lt.s32.totalorder %v1480_v4, 112 }
 0x267   :  { %v1419_v39 = vadd.f32 %v1417_v47, %v1398_v40 }
 0x269   :  { %v1436_v26 = vpop.permute.xlu1 %1435  ;;  %v1425_v35 = vpop.permute.xlu0 %1424 }
 0x26a   :  { %v1437_v48 = vrot.slane %v1436_v26, 2  ;;  %v1426_v49 = vrot.slane %v1425_v35, 2 }
 0x26c   :  { %v1438_v53 = vsel %vm1427_vm1, %v1436_v26, %v1437_v48  ;;  %v1428_v29 = vsel %vm1427_vm1, %v1425_v35, %v1426_v49  ;;  %vm1503_vm1 = vcmp.ge.s32.totalorder %v1480_v4, 32 }
 0x26d   :  { %v1440_v55 = vadd.f32 %v1438_v53, %v1419_v39  ;;  %v1430_v56 = vadd.f32 %v1428_v29, %v1409_v52 }
 0x26f   :  { %v1441_v57 = vadd.f32 %v1440_v55, %v1430_v56 }
 0x271   :  { %v1800_v58 = vmul.f32 -1.442695, %v1441_v57 }
 0x273   :  { %1875 = vpow2.f32 %v1800_v58 }
 0x279   :  { %v1876_v30 = vpop.eup %1875 }
 0x27a   :  { %v1445_v38 = vadd.f32 1.0, %v1876_v30 }
 0x27c   :  { %1877 = vrcp.f32 %v1445_v38  ;;  %v1457_v61 = vand.u32 2147483648, %v1445_v38  ;;  %v1455_v62 = vand.u32 2147483647, %v1445_v38  ;;  %vm1451_vm2 = vweird.f32 %v1445_v38 }
 0x27e   :  { %v1458_v46 = vor.u32 1.1754944e-38, %v1457_v61  ;;  %vm1456_vm7 = vcmp.eq.f32.partialorder %v1455_v62, 8.507059e+37 }
 0x282   :  { %v1878_v59 = vpop.eup %1877 }
 0x283   :  { %v1447_v32 = vmul.f32 %v1878_v59, %v1445_v38  ;;  %vm1452_vm10 = vweird.f32 %v1878_v59 }
 0x284   :  { %vm1453_vm5 = vmor %vm1451_vm2, %vm1452_vm10  ;;  %vm1504_vm10 = vcmp.lt.s32.totalorder %v1480_v4, 48  ;;  %vm1514_vm2 = vcmp.ge.s32.totalorder %v1480_v4, 48 }
 0x285   :  { %v1448_v60 = vsub.f32 1.0, %v1447_v32 }
 0x287   :  { %v1449_v34 = vmul.f32 %v1878_v59, %v1448_v60 }
 0x289   :  { %v1450_v45 = vadd.f32 %v1878_v59, %v1449_v34 }
 0x28b   :  { %v1454_v54 = vsel %vm1453_vm5, %v1878_v59, %v1450_v45  ;;  %vm1515_vm5 = vcmp.lt.s32.totalorder %v1480_v4, 64 }
 0x28c   :  { %v1459_v63 = vsel %vm1456_vm7, %v1458_v46, %v1454_v54  ;;  %vm1525_vm7 = vcmp.ge.s32.totalorder %v1480_v4, 64 }
 0x28d   :  { %v1461_v5 = vmul.f32 %v1459_v63, %v1441_v57 }
 0x28f   :  { %v1463_v0 = vrot.slane %v1461_v5, 1  ;;  %v1464_v3 = vrot.slane %v1461_v5, 2  ;;  %v1465_v7 = vrot.slane %v1461_v5, 3 }
 0x291   :  { %v1467_v42 = vsel %vm1466_vm3, %v1461_v5, %v1463_v0  ;;  %v1469_v9 = vsel %vm1468_vm12, %v1464_v3, %v1465_v7  ;;  %v1472_v10 = vsel %vm2791_vm14, %v1461_v5, %v1463_v0  ;;  %v1474_v1 = vsel %vm2792_vm15, %v1464_v3, %v1465_v7  ;;  %vm2656_vm12 = vmand %vm1503_vm1, %vm1504_vm10 }
 0x292   :  { %v1470_v37 = vsel %vm2793_vm0, %v1467_v42, %v1469_v9  ;;  %v1476_v6 = vsel %vm1475_vm6, %v1472_v10, %v1474_v1  ;;  %vm1526_vm3 = vcmp.lt.s32.totalorder %v1480_v4, 80  ;;  %vm2660_vm6 = vmand %vm1514_vm2, %vm1515_vm5  ;;  %vm1536_vm15 = vcmp.ge.s32.totalorder %v1480_v4, 80 }
 0x293   :  { %v1477_v2 = vrot.slane %v1476_v6, 1  ;;  %1508 = vrot.lane.b32.xlu0 %v1470_v37, %s2007_s16  ;;  %1497 = vrot.lane.b32.xlu1 %v1470_v37, %s2008_s21  ;;  %1484 = vst.msk [vmem:[#allocation11] sm:$0x1] %vm2613_vm11, %v1470_v37  ;;  %vm2664_vm14 = vmand %vm1525_vm7, %vm1526_vm3  ;;  %vm1537_vm0 = vcmp.lt.s32.totalorder %v1480_v4, 96  ;;  %vm1571_vm10 = vcmp.lt.s32.totalorder %v1480_v4, 128 }
 0x294   :  { %1486 = vrot.lane.b32.xlu2 %v1470_v37, %s1969_s18  ;;  %vm2678_vm4 = vmand %vm1536_vm15, %vm1537_vm0 }
 0x295   :  { %1485 = vst.msk [vmem:[#allocation11 + $0x2] sm:$0x1] %vm2613_vm11, %v1477_v2 }
 0x29b   :  { %1541 = vrot.lane.b32.xlu0 %v1470_v37, %s1970_s19  ;;  %1530 = vrot.lane.b32.xlu1 %v1470_v37, %s2009_s25 }
 0x29c   :  { %1519 = vrot.lane.b32.xlu2 %v1470_v37, %s1971_s22 }
 0x2a3   :  { %1599 = vrot.lane.b32.xlu0 %v1470_v37, %s1994_s23  ;;  %1558 = vrot.lane.b32.xlu1 %v1470_v37, %s1974_s3 }
 0x2a4   :  { %1613 = vrot.lane.b32.xlu2 %v1470_v37, %s2001_s1 }
 0x2ab   :  { %1655 = vrot.lane.b32.xlu0 %v1470_v37, %s2010_s24  ;;  %1585 = vrot.lane.b32.xlu1 %v1470_v37, %s1987_s4 }
 0x2ac   :  { %1669 = vrot.lane.b32.xlu2 %v1470_v37, %s2011_s5 }
 0x2b3   :  { %1488 = vrot.lane.b32.xlu0 %v1477_v2, %s1969_s18  ;;  %1631 = vrot.lane.b32.xlu1 %v1470_v37, %s2004_s26  ;;  %s2012_s18 = smov 96  }
 0x2b4   :  { %1575 = vrot.lane.b32.xlu2 %v1470_v37, %s1979_s17 }
 0x2bb   :  { %1521 = vrot.lane.b32.xlu0 %v1477_v2, %s1971_s22  ;;  %1510 = vrot.lane.b32.xlu1 %v1477_v2, %s2007_s16  ;;  %s2014_s22 = smov 32  }
 0x2bc   :  { %1499 = vrot.lane.b32.xlu2 %v1477_v2, %s2008_s21 }
 0x2c3   :  { %1615 = vrot.lane.b32.xlu0 %v1477_v2, %s2001_s1  ;;  %1543 = vrot.lane.b32.xlu1 %v1477_v2, %s1970_s19  ;;  %s2013_s19 = smov 112   ;;  %s2017_s1 = smov [#allocation11]  }
 0x2c4   :  { %1532 = vrot.lane.b32.xlu2 %v1477_v2, %s2009_s25  ;;  %s1687_s29 = sshll.u32 %s2017_s1, 4  ;;  %s1688_s29 = int_to_ptr.vmem [resolvable:$true] %s1687_s29 }
 0x2cb   :  { %1671 = vrot.lane.b32.xlu0 %v1477_v2, %s2011_s5  ;;  %1601 = vrot.lane.b32.xlu1 %v1477_v2, %s1994_s23 }
 0x2cc   :  { %1560 = vrot.lane.b32.xlu2 %v1477_v2, %s1974_s3  ;;  %s2015_s3 = smov 64  }
 0x2d3   :  { %1577 = vrot.lane.b32.xlu0 %v1477_v2, %s1979_s17  ;;  %1657 = vrot.lane.b32.xlu1 %v1477_v2, %s2010_s24 }
 0x2d4   :  { %1587 = vrot.lane.b32.xlu2 %v1477_v2, %s1987_s4  ;;  %s2016_s4 = smov 48  }
 0x2dc   :  { %1633 = vrot.lane.b32.xlu2 %v1477_v2, %s2004_s26 }
 0x2ee   :  { %v1487_v44 = vpop.permute.xlu2 %1486 }
 0x2ef   :  { %1495 = vst.msk [vmem:[#allocation11] sm:$0x1] %vm2644_vm9, %v1487_v44 }
 0x2f6   :  { %v1520_v13 = vpop.permute.xlu2 %1519 }
 0x2fe   :  { %v1614_v15 = vpop.permute.xlu2 %1613 }
 0x2ff   :  { %v1617_v26 = vrot.slane %v1614_v15, 1  ;;  %v1619_v35 = vrot.slane %v1614_v15, 2 }
 0x301   :  { %v1621_v53 = vsel %vm1240_vm13, %v1617_v26, %v1619_v35 }
 0x305   :  { %v1509_v16 = vpop.permute.xlu0 %1508  ;;  %v1498_v17 = vpop.permute.xlu1 %1497 }
 0x306   :  { %1506 = vst.msk [vmem:[#allocation11] sm:$0x1] %vm2656_vm12, %v1498_v17  ;;  %v2670_v19 = vpop.permute.xlu2 %1669 }
 0x307   :  { %1517 = vst.msk [vmem:[#allocation11] sm:$0x1] %vm2660_vm6, %v1509_v16  ;;  %v1673_v9 = vrot.slane %v2670_v19, 2 }
 0x308   :  { %1528 = vst.msk [vmem:[#allocation11] sm:$0x1] %vm2664_vm14, %v1520_v13 }
 0x30d   :  { %v1542_v21 = vpop.permute.xlu0 %1541  ;;  %v1531_v22 = vpop.permute.xlu1 %1530 }
 0x30e   :  { %v1545_v24 = vrot.slane %v1542_v21, 1  ;;  %1539 = vst.msk [vmem:[#allocation11] sm:$0x1] %vm2678_vm4, %v1531_v22  ;;  %v1576_v25 = vpop.permute.xlu2 %1575  ;;  %v1645_v49 = vrot.slane %v1531_v22, 2 }
 0x30f   :  { %v1579_v27 = vrot.slane %v1576_v25, 1 }
 0x310   :  { %1547 = vrot.lane.b32.xlu2 %v1545_v24, %s2012_s18 }
 0x311   :  { %1583 = vst.msk [vmem:[#allocation11 + $0x1] sm:$0x1] %vm2613_vm11, %v1579_v27 }
 0x315   :  { %v1600_v28 = vpop.permute.xlu0 %1599  ;;  %v1559_v33 = vpop.permute.xlu1 %1558 }
 0x316   :  { %v1562_v51 = vrot.slane %v1559_v33, 1  ;;  %v1500_v23 = vpop.permute.xlu2 %1499  ;;  %v1603_v40 = vrot.slane %v1600_v28, 1 }
 0x318   :  { %1564 = vrot.lane.b32.xlu0 %v1562_v51, %s2013_s19 }
 0x31d   :  { %v1656_v31 = vpop.permute.xlu0 %1655  ;;  %v1586_v11 = vpop.permute.xlu1 %1585 }
 0x31e   :  { %v1659_v41 = vrot.slane %v1656_v31, 2  ;;  %v1589_v43 = vrot.slane %v1586_v11, 1  ;;  %v1533_v36 = vpop.permute.xlu2 %1532 }
 0x31f   :  { %v1646_v3 = vrot.slane %v1533_v36, 2 }
 0x320   :  { %1605 = vrot.lane.b32.xlu0 %v1603_v40, %s2014_s22  ;;  %1591 = vrot.lane.b32.xlu1 %v1589_v43, %s1999_s15 }
 0x321   :  { %1661 = vrot.lane.b32.xlu2 %v1659_v41, %s2012_s18 }
 0x325   :  { %v1489_v47 = vpop.permute.xlu0 %1488  ;;  %v1632_v48 = vpop.permute.xlu1 %1631 }
 0x326   :  { %1496 = vst.msk [vmem:[#allocation11 + $0x2] sm:$0x1] %vm2644_vm9, %v1489_v47  ;;  %v1635_v52 = vrot.slane %v1632_v48, 2  ;;  %v1561_v39 = vpop.permute.xlu2 %1560 }
 0x327   :  { %1507 = vst.msk [vmem:[#allocation11 + $0x2] sm:$0x1] %vm2656_vm12, %v1500_v23  ;;  %v1563_v56 = vrot.slane %v1561_v39, 1 }
 0x328   :  { %1647 = vrot.lane.b32.xlu0 %v1645_v49, %s1979_s17  ;;  %1637 = vrot.lane.b32.xlu1 %v1635_v52, %s2015_s3 }
 0x329   :  { %1623 = vrot.lane.b32.xlu2 %v1621_v53, %s2016_s4 }
 0x32d   :  { %v1522_v29 = vpop.permute.xlu0 %1521  ;;  %v1511_v55 = vpop.permute.xlu1 %1510 }
 0x32e   :  { %1518 = vst.msk [vmem:[#allocation11 + $0x2] sm:$0x1] %vm2660_vm6, %v1511_v55  ;;  %v1588_v57 = vpop.permute.xlu2 %1587 }
 0x32f   :  { %1529 = vst.msk [vmem:[#allocation11 + $0x2] sm:$0x1] %vm2664_vm14, %v1522_v29  ;;  %v1590_v58 = vrot.slane %v1588_v57, 1 }
 0x330   :  { %1540 = vst.msk [vmem:[#allocation11 + $0x2] sm:$0x1] %vm2678_vm4, %v1533_v36  ;;  %1566 = vrot.lane.b32.xlu1 %v1563_v56, %s2013_s19 }
 0x331   :  { %1593 = vrot.lane.b32.xlu2 %v1590_v58, %s1999_s15  ;;  %s1689_s15 = sshll.u32 %s2770_s2, 4  ;;  %s1690_s15 = int_to_ptr.hbm [resolvable:$true] %s1689_s15 }
 0x335   :  { %v1616_v30 = vpop.permute.xlu0 %1615  ;;  %v1544_v38 = vpop.permute.xlu1 %1543 }
 0x336   :  { %v1546_v59 = vrot.slane %v1544_v38, 1  ;;  %v1634_v32 = vpop.permute.xlu2 %1633  ;;  %v1618_v61 = vrot.slane %v1616_v30, 1  ;;  %v1620_v34 = vrot.slane %v1616_v30, 2 }
 0x337   :  { %v1636_v60 = vrot.slane %v1634_v32, 2 }
 0x338   :  { %1549 = vrot.lane.b32.xlu0 %v1546_v59, %s2012_s18  ;;  %v1622_v63 = vsel %vm1240_vm13, %v1618_v61, %v1620_v34  ;;  %vm1553_vm13 = vcmp.ge.s32.totalorder %v1480_v4, 96 }
 0x339   :  { %1639 = vrot.lane.b32.xlu2 %v1636_v60, %s2015_s3  ;;  %vm2717_vm1 = vmand %vm1553_vm13, %vm1554_vm8 }
 0x33d   :  { %v1672_v62 = vpop.permute.xlu0 %1671  ;;  %v1602_v45 = vpop.permute.xlu1 %1601 }
 0x33e   :  { %v1674_v46 = vrot.slane %v1672_v62, 2  ;;  %v1604_v54 = vrot.slane %v1602_v45, 1 }
 0x340   :  { %1625 = vrot.lane.b32.xlu0 %v1622_v63, %s2016_s4  ;;  %1607 = vrot.lane.b32.xlu1 %v1604_v54, %s2014_s22 }
 0x341   :  { %1677 = vrot.lane.b32.xlu2 %v1674_v46, %s2013_s19 }
 0x345   :  { %v1578_v5 = vpop.permute.xlu0 %1577  ;;  %v1658_v0 = vpop.permute.xlu1 %1657 }
 0x346   :  { %v1580_v7 = vrot.slane %v1578_v5, 1  ;;  %v1660_v42 = vrot.slane %v1658_v0, 2 }
 0x348   :  { %1584 = vst.msk [vmem:[#allocation11 + $0x3] sm:$0x1] %vm2613_vm11, %v1580_v7  ;;  %1663 = vrot.lane.b32.xlu0 %v1660_v42, %s2012_s18  ;;  %1649 = vrot.lane.b32.xlu1 %v1646_v3, %s1979_s17  ;;  %vm1570_vm11 = vcmp.ge.s32.totalorder %v1480_v4, 112 }
 0x349   :  { %vm2725_vm2 = vmand %vm1570_vm11, %vm1571_vm10 }
 0x350   :  { %1675 = vrot.lane.b32.xlu1 %v1673_v9, %s2013_s19 }
 0x36a   :  { %v1548_v1 = vpop.permute.xlu2 %1547 }
 0x36b   :  { %1556 = vst.msk [vmem:[#allocation11] sm:$0x1] %vm2717_vm1, %v1548_v1 }
 0x37b   :  { %v1662_v8 = vpop.permute.xlu2 %1661 }
 0x383   :  { %v1624_v37 = vpop.permute.xlu2 %1623 }
 0x38a   :  { %v1565_v2 = vpop.permute.xlu0 %1564 }
 0x38b   :  { %1573 = vst.msk [vmem:[#allocation11] sm:$0x1] %vm2725_vm2, %v1565_v2  ;;  %v1594_v44 = vpop.permute.xlu2 %1593 }
 0x38c   :  { %1598 = vst.msk [vmem:[#allocation11 + $0x3] sm:$0x1] %vm2644_vm9, %v1594_v44 }
 0x392   :  { %v1606_v13 = vpop.permute.xlu0 %1605  ;;  %v1592_v15 = vpop.permute.xlu1 %1591 }
 0x393   :  { %1597 = vst.msk [vmem:[#allocation11 + $0x1] sm:$0x1] %vm2644_vm9, %v1592_v15  ;;  %v1640_v19 = vpop.permute.xlu2 %1639 }
 0x394   :  { %1611 = vst.msk [vmem:[#allocation11 + $0x1] sm:$0x1] %vm2656_vm12, %v1606_v13 }
 0x395   :  { %1629 = vst.msk [vmem:[#allocation11 + $0x1] sm:$0x1] %vm2660_vm6, %v1624_v37 }
 0x39a   :  { %v1648_v4 = vpop.permute.xlu0 %1647  ;;  %v1638_v16 = vpop.permute.xlu1 %1637 }
 0x39b   :  { %1643 = vst.msk [vmem:[#allocation11 + $0x1] sm:$0x1] %vm2664_vm14, %v1638_v16  ;;  %v1678_v27 = vpop.permute.xlu2 %1677 }
 0x39c   :  { %1653 = vst.msk [vmem:[#allocation11 + $0x1] sm:$0x1] %vm2678_vm4, %v1648_v4 }
 0x39d   :  { %1667 = vst.msk [vmem:[#allocation11 + $0x1] sm:$0x1] %vm2717_vm1, %v1662_v8 }
 0x3a2   :  { %v1567_v17 = vpop.permute.xlu1 %1566 }
 0x3aa   :  { %v1550_v12 = vpop.permute.xlu0 %1549 }
 0x3ab   :  { %1557 = vst.msk [vmem:[#allocation11 + $0x2] sm:$0x1] %vm2717_vm1, %v1550_v12 }
 0x3ac   :  { %1574 = vst.msk [vmem:[#allocation11 + $0x2] sm:$0x1] %vm2725_vm2, %v1567_v17 }
 0x3b2   :  { %v1626_v21 = vpop.permute.xlu0 %1625  ;;  %v1608_v22 = vpop.permute.xlu1 %1607 }
 0x3b3   :  { %1612 = vst.msk [vmem:[#allocation11 + $0x3] sm:$0x1] %vm2656_vm12, %v1608_v22 }
 0x3b4   :  { %1630 = vst.msk [vmem:[#allocation11 + $0x3] sm:$0x1] %vm2660_vm6, %v1626_v21 }
 0x3b5   :  { %1644 = vst.msk [vmem:[#allocation11 + $0x3] sm:$0x1] %vm2664_vm14, %v1640_v19 }
 0x3ba   :  { %v1664_v24 = vpop.permute.xlu0 %1663  ;;  %v1650_v25 = vpop.permute.xlu1 %1649 }
 0x3bb   :  { %1654 = vst.msk [vmem:[#allocation11 + $0x3] sm:$0x1] %vm2678_vm4, %v1650_v25 }
 0x3bc   :  { %1668 = vst.msk [vmem:[#allocation11 + $0x3] sm:$0x1] %vm2717_vm1, %v1664_v24 }
 0x3bd   :  { %1682 = vst.msk [vmem:[#allocation11 + $0x3] sm:$0x1] %vm2725_vm2, %v1678_v27 }
 0x3c2   :  { %v1676_v50 = vpop.permute.xlu1 %1675 }
 0x3c3   :  { %1681 = vst.msk [vmem:[#allocation11 + $0x1] sm:$0x1] %vm2725_vm2, %v1676_v50 }
 0x3c4   :  { %1695 = dma.vmem_to_hbm [thread:$0]  %s1688_s29, 64, %s1690_s15, [#allocation8], %s2014_s22, %s2014_s22, %s2018_s10  }
 0x3c5   :  { %1943 = dma.done.wait [#allocation8], 64  }
 0x3c6   :  { %1944 = vsyncadd [#allocation8], 4294967232 }
 0x3c7   :  { %1700 = vsyncpa [#allocation7], 1 }
 0x3c8   :  { %1701 = vsyncpa [#allocation8], 1 }
 0x3c9   :  { %1702 = vsyncpa [#allocation9], 1 }

</bundles_post_ra>
